<compile_context>
chip_gen: v5e
topology: v5e:2x2
jax: 0.10.0
libtpu: 0.0.40
codegen_flags: <defaults>
</compile_context>

<pallas_src>
import math
from functools import partial

import numpy as np
import jax
import jax.numpy as jnp
from jax.experimental import pallas as pl
from jax.experimental.pallas import tpu as pltpu

# ---------------- small deterministic configuration (stand-in for defaults) ----
BATCH = 2
IMG_C, IMG_H, IMG_W = 1, 16, 16          # img_size
VEC_IN = 8                               # input_vector_size
OUT_DIM = 4                              # output_dim
FEATURES = 4                             # features
DEPTH = 2                                # depth
KERNEL = 3                               # kernel
IMG_EMBED = 8                            # img_embed_dim
VEC_EMBED = 8                            # vector_embed_dim
REDUCE_THRESH = (8, 8)                   # size_reduce_threshold
VEC_FEATS = (8, 8)                       # vector_feature_list
OUT_FEATS = (16, 16)                     # output_feature_list

_BN_EPS = 1e-5
_LN_EPS = 1e-5
_BN_SCALE = 1.0 / math.sqrt(1.0 + _BN_EPS)   # eval-mode BN with running stats (0, 1)
_GELU_C = math.sqrt(2.0 / math.pi)


# ---------------- geometry helpers ---------------------------------------------
def _conv_out(n, k, stride, pad):
    return (n + 2 * pad - k) // stride + 1


def _reduction_plan(h, w, k, thresh):
    """(h_in, w_in, h_out, w_out) per stride-2 reduction conv."""
    plan = []
    pad = k // 2
    while h > thresh[0] or w > thresh[1]:
        ho, wo = _conv_out(h, k, 2, pad), _conv_out(w, k, 2, pad)
        plan.append((h, w, ho, wo))
        h, w = ho, wo
    return plan


_RED_PLAN = _reduction_plan(IMG_H, IMG_W, KERNEL, REDUCE_THRESH)
N_REDUCE = len(_RED_PLAN)
FINAL_H, FINAL_W = (_RED_PLAN[-1][2], _RED_PLAN[-1][3]) if _RED_PLAN else (IMG_H, IMG_W)


def _make_tap_masks(h, w, k):
    """(k*k, h*w) 0/1 masks: mask[t, i*w+j] = 1 iff input (i+dh, j+dw) is in
    bounds for tap t = kh*k + kw (dh = kh-pad, dw = kw-pad).  Applied to the
    rolled activation so wrapped / out-of-bounds taps contribute zero (pad)."""
    pad = k // 2
    m = np.zeros((k * k, h * w), np.float32)
    for kh in range(k):
        for kw in range(k):
            dh, dw = kh - pad, kw - pad
            vi = (np.arange(h) + dh >= 0) & (np.arange(h) + dh < h)
            vj = (np.arange(w) + dw >= 0) & (np.arange(w) + dw < w)
            m[kh * k + kw] = (vi[:, None] & vj[None, :]).astype(np.float32).reshape(-1)
    return jnp.asarray(m)


def _make_subsample_mat(h, w, ho, wo, stride):
    """(h*w, ho*wo) selection matrix: stride-2 conv == stride-1 conv (same pad)
    subsampled at rows/cols 0, 2, 4, ..."""
    s = np.zeros((h * w, ho * wo), np.float32)
    for i in range(ho):
        for j in range(wo):
            s[(i * stride) * w + (j * stride), i * wo + j] = 1.0
    return jnp.asarray(s)


# ---------------- elementwise helper --------------------------------------------
def _gelu(x):
    # tanh-approx GELU: tanh runs on the EUP slot (free next to MXU/VALU work).
    return 0.5 * x * (1.0 + jnp.tanh(_GELU_C * (x + 0.044715 * x * x * x)))


# ---------------- fully fused kernel (convs + embeds + vector MLP + final MLP) --
def _make_fused_kernel(cfg):
    n_masks = cfg["n_masks"]
    n_red = cfg["n_reduce"]
    conv_descs = cfg["conv_descs"]
    n_conv = len(conv_descs)
    F = cfg["features"]
    B = cfg["batch"]
    hwf = cfg["hwf"]
    e_hid = cfg["e_hid"]
    ie = cfg["img_embed"]
    ve = cfg["vec_embed"]
    vec_ln_flags = cfg["vec_ln_flags"]
    n_final = cfg["n_final"]
    n_tap = KERNEL * KERNEL

    def kernel(*refs):
        i = 0
        y_ref = refs[i]; i += 1                         # (B, VEC_IN)
        h_ref = refs[i]; i += 1                         # (2*C*B, H*W) both branches
        mask_refs = refs[i:i + n_masks]; i += n_masks   # each (k*k, hw)
        sub_refs = refs[i:i + n_red]; i += n_red        # each (hw_in, hw_out)
        conv_refs = refs[i:i + 2 * n_conv]; i += 2 * n_conv
        we1_ref, be1_ref, g1_ref, bt1_ref, we2_ref, be2_ref = refs[i:i + 6]; i += 6
        head_refs = refs[i:-1]
        o_ref = refs[-1]                                # (B, OUT_DIM)

        a = h_ref[...]                                  # (2*C*B, HW) lane-dense

        # ---- merged-branch conv stack: rolls (XLU) + masks (VPU) + 1 MXU dot ----
        for li, desc in enumerate(conv_descs):
            w_ref = conv_refs[2 * li]                   # (Rout, n_tap*Rin)
            b_ref = conv_refs[2 * li + 1]               # (Rout, 1)
            m_ref = mask_refs[desc["mask_idx"]]
            rin = desc["rin2"]
            hw = desc["hw"]
            taps = []
            for t, shift in enumerate(desc["shifts"]):
                rolled = a if shift == 0 else pltpu.roll(a, shift, axis=1)
                taps.append(rolled * m_ref[t:t + 1, :])
            if rin % 8 == 0:
                # collapsed: one big-K matmul per layer
                stacked = jnp.concatenate(taps, axis=0)          # (n_tap*Rin, hw)
                acc = jnp.dot(w_ref[...], stacked,
                              preferred_element_type=jnp.float32)
            else:
                # unaligned sublane count (first layer): per-tap dot-sum
                acc = jnp.zeros((w_ref.shape[0], hw), jnp.float32)
                for t in range(n_tap):
                    acc = acc + jnp.dot(w_ref[:, t * rin:(t + 1) * rin], taps[t],
                                        preferred_element_type=jnp.float32)
            if desc["sub_idx"] is not None:              # stride-2 reduction layer
                acc = jnp.dot(acc, sub_refs[desc["sub_idx"]][...],
                              preferred_element_type=jnp.float32)
            a = _gelu(acc + b_ref[...])                  # BN scale pre-folded into w

        # ---- per-branch flatten + embed MLP (SSA slices, no scratch) ------------
        embs = []
        for br in range(2):
            w1 = we1_ref[br]                             # (F*hwf, e_hid)
            base = br * F * B
            z = jnp.zeros((B, e_hid), jnp.float32)
            for c in range(F):
                z = z + jnp.dot(a[base + c * B: base + (c + 1) * B, :],
                                w1[c * hwf:(c + 1) * hwf, :],
                                preferred_element_type=jnp.float32)
            z = z + be1_ref[br]
            mu = jnp.mean(z, axis=-1, keepdims=True)
            var = jnp.mean((z - mu) ** 2, axis=-1, keepdims=True)
            z = (z - mu) * jax.lax.rsqrt(var + _LN_EPS)
            z = _gelu(z * g1_ref[br] + bt1_ref[br])
            z = jnp.dot(z, we2_ref[br], preferred_element_type=jnp.float32) + be2_ref[br]
            embs.append(_gelu(z))                        # h*_embed_act
        h1e, h2e = embs

        # ---- vector_mlp: Linear->LN->GELU hidden layers, last layer Linear ------
        v = y_ref[...]
        hi = 0
        for has_ln in vec_ln_flags:
            w_ref, b_ref = head_refs[hi], head_refs[hi + 1]; hi += 2
            v = jnp.dot(v, w_ref[...], preferred_element_type=jnp.float32) + b_ref[...]
            if has_ln:
                g_ref, bt_ref = head_refs[hi], head_refs[hi + 1]; hi += 2
                mu = jnp.mean(v, axis=-1, keepdims=True)
                var = jnp.mean((v - mu) ** 2, axis=-1, keepdims=True)
                v = (v - mu) * jax.lax.rsqrt(var + _LN_EPS)
                v = _gelu(v * g_ref[...] + bt_ref[...])
        v = _gelu(v)                                     # vector_embed_act

        # ---- final_mlp (norm = Identity); concat folded into first matmul -------
        z = v
        for li in range(n_final):
            w_ref, b_ref = head_refs[hi], head_refs[hi + 1]; hi += 2
            if li == 0:
                z = (jnp.dot(v, w_ref[0:ve, :], preferred_element_type=jnp.float32)
                     + jnp.dot(h1e, w_ref[ve:ve + ie, :],
                               preferred_element_type=jnp.float32)
                     + jnp.dot(h2e, w_ref[ve + ie:ve + 2 * ie, :],
                               preferred_element_type=jnp.float32)
                     + b_ref[...])
            else:
                z = jnp.dot(z, w_ref[...], preferred_element_type=jnp.float32) + b_ref[...]
            if li < n_final - 1:
                z = _gelu(z)
        o_ref[...] = z

    return kernel


def _estimate_cost(in_arrays, out_sds, conv_descs, batch):
    bytes_accessed = int(np.prod(out_sds.shape)) * out_sds.dtype.itemsize
    for a in in_arrays:
        bytes_accessed += int(np.prod(a.shape)) * a.dtype.itemsize
    rout = 2 * FEATURES * batch
    flops, trans = 0, 0
    for d in conv_descs:
        flops += 2 * rout * (KERNEL * KERNEL * d["rin2"]) * d["hw"]
        if d["sub_idx"] is not None:
            flops += 2 * rout * d["hw"] * d["hw_out"]
        trans += rout * d["hw_out"]
    e_hid = 2 * IMG_EMBED
    hwf = FINAL_H * FINAL_W
    flops += 2 * 2 * batch * (FEATURES * hwf * e_hid + e_hid * IMG_EMBED)
    trans += 2 * batch * (e_hid + 2 * IMG_EMBED)
    flops += 2 * batch * 2048          # vector + final MLPs (rough)
    trans += batch * 128
    return pl.CostEstimate(flops=int(flops), transcendentals=int(trans),
                           bytes_accessed=int(bytes_accessed))


def _fused_call(packed, y, hcat):
    batch = y.shape[0]
    cfg = dict(
        n_masks=len(packed["masks"]),
        n_reduce=len(packed["subs"]),
        conv_descs=packed["conv_descs"],
        features=FEATURES, batch=batch, hwf=FINAL_H * FINAL_W,
        e_hid=2 * IMG_EMBED, img_embed=IMG_EMBED, vec_embed=VEC_EMBED,
        vec_ln_flags=packed["vec_ln_flags"], n_final=packed["n_final"],
    )
    kernel = _make_fused_kernel(cfg)
    in_arrays = ([y, hcat] + packed["masks"] + packed["subs"]
                 + packed["conv"] + packed["embed"] + packed["head"])
    out_sds = jax.ShapeDtypeStruct((batch, OUT_DIM), jnp.float32)
    cost = _estimate_cost(in_arrays, out_sds, packed["conv_descs"], batch)
    # Single invocation (no grid): all operands are tiny and live entirely in VMEM.
    return pl.pallas_call(kernel, out_shape=out_sds, cost_estimate=cost)(*in_arrays)


# ---------------- deterministic parameter construction --------------------------
def _init_conv(key, cout, cin, k):
    kw_, kb_ = jax.random.split(key)
    w = jax.random.normal(kw_, (cout, cin, k, k), jnp.float32) / math.sqrt(cin * k * k)
    bn_bias = 0.05 * jax.random.normal(kb_, (cout,), jnp.float32)
    return w, bn_bias


def _init_mlp(key, feature_list, use_ln):
    layers = []
    n = len(feature_list) - 1
    keys = jax.random.split(key, n)
    for i in range(n):
        din, dout = feature_list[i], feature_list[i + 1]
        kw_, kb_, kg_, kbe_ = jax.random.split(keys[i], 4)
        layer = {
            "w": jax.random.normal(kw_, (din, dout), jnp.float32) / math.sqrt(din),
            "b": 0.05 * jax.random.normal(kb_, (dout,), jnp.float32),
        }
        if use_ln and i < n - 1:
            layer["g"] = 1.0 + 0.05 * jax.random.normal(kg_, (dout,), jnp.float32)
            layer["beta"] = 0.05 * jax.random.normal(kbe_, (dout,), jnp.float32)
        layers.append(layer)
    return layers


def init_params(key):
    keys = jax.random.split(key, 8)

    def conv_stack(k, chans):
        ks = jax.random.split(k, len(chans))
        return [_init_conv(ks[i], co, ci, KERNEL) for i, (ci, co) in enumerate(chans)]

    interp_chans = [(IMG_C, FEATURES)] + [(FEATURES, FEATURES)] * (DEPTH - 1)
    reduce_chans = [(FEATURES, FEATURES)] * N_REDUCE
    embed_feats = (FINAL_H * FINAL_W * FEATURES, 2 * IMG_EMBED, IMG_EMBED)
    vec_feats = (VEC_IN,) + VEC_FEATS + (VEC_EMBED,)
    final_feats = (VEC_EMBED + 2 * IMG_EMBED,) + OUT_FEATS + (OUT_DIM,)

    return {
        "interpH1": conv_stack(keys[0], interp_chans),
        "reduceH1": conv_stack(keys[1], reduce_chans),
        "lin_embed_h1": _init_mlp(keys[2], embed_feats, use_ln=True),
        "interpH2": conv_stack(keys[3], interp_chans),
        "reduceH2": conv_stack(keys[4], reduce_chans),
        "lin_embed_h2": _init_mlp(keys[5], embed_feats, use_ln=True),
        "vector_mlp": _init_mlp(keys[6], vec_feats, use_ln=True),
        "final_mlp": _init_mlp(keys[7], final_feats, use_ln=False),  # norm = Identity
    }


def _pack_conv_pair(w1, bn_b1, w2, bn_b2, batch):
    """Fold eval-mode BN scale into w; build the per-tap weight block that is
    block-diagonal over {branch} x {batch}, then concatenate all taps along the
    contraction axis: Wcat (2*cout*B, k*k*2*cin*B). Row/col order = (br, c, b)."""
    cout, cin, k, _ = w1.shape
    eye_b = jnp.eye(batch, dtype=jnp.float32)
    zeros = jnp.zeros((cout * batch, cin * batch), jnp.float32)
    taps = []
    for kh in range(k):
        for kw in range(k):
            blk1 = jnp.kron(w1[:, :, kh, kw] * _BN_SCALE, eye_b)   # (cout*B, cin*B)
            blk2 = jnp.kron(w2[:, :, kh, kw] * _BN_SCALE, eye_b)
            taps.append(jnp.concatenate(
                [jnp.concatenate([blk1, zeros], axis=1),
                 jnp.concatenate([zeros, blk2], axis=1)], axis=0))  # (2coutB, 2cinB)
    wcat = jnp.concatenate(taps, axis=1)                            # (2coutB, kk*2cinB)
    bias = jnp.concatenate([jnp.repeat(bn_b1, batch),
                            jnp.repeat(bn_b2, batch)])[:, None]     # (2coutB, 1)
    return wcat, bias


def pack_params(raw, batch):
    # conv layer geometry plan: DEPTH stride-1 interp layers, then reductions.
    plan = [(IMG_H, IMG_W, IMG_H, IMG_W, False)] * DEPTH
    plan += [(hi, wi, ho, wo, True) for (hi, wi, ho, wo) in _RED_PLAN]

    pad = KERNEL // 2
    uniq_hw, mask_arrays, sub_mats, conv_descs = [], [], [], []
    for (h, w, ho, wo, is_red) in plan:
        if (h, w) not in uniq_hw:
            uniq_hw.append((h, w))
            mask_arrays.append(_make_tap_masks(h, w, KERNEL))
        # roll shift so rolled[p] = a[p + dh*w + dw]   (jnp.roll convention)
        shifts = tuple((-((kh - pad) * w + (kw - pad))) % (h * w)
                       for kh in range(KERNEL) for kw in range(KERNEL))
        desc = dict(mask_idx=uniq_hw.index((h, w)), shifts=shifts,
                    hw=h * w, hw_out=ho * wo, sub_idx=None)
        if is_red:
            desc["sub_idx"] = len(sub_mats)
            sub_mats.append(_make_subsample_mat(h, w, ho, wo, 2))
        conv_descs.append(desc)

    conv_arrays = []
    pairs = list(zip(raw["interpH1"] + raw["reduceH1"],
                     raw["interpH2"] + raw["reduceH2"]))
    for desc, ((w1, b1), (w2, b2)) in zip(conv_descs, pairs):
        wcat, bias = _pack_conv_pair(w1, b1, w2, b2, batch)
        conv_arrays += [wcat, bias]
        desc["rin2"] = 2 * w1.shape[1] * batch          # merged-branch input rows

    e1, e2 = raw["lin_embed_h1"], raw["lin_embed_h2"]
    embed_arrays = [
        jnp.stack([e1[0]["w"], e2[0]["w"]], 0),                     # (2, F*hwf, 2*IE)
        jnp.stack([e1[0]["b"][None], e2[0]["b"][None]], 0),
        jnp.stack([e1[0]["g"][None], e2[0]["g"][None]], 0),
        jnp.stack([e1[0]["beta"][None], e2[0]["beta"][None]], 0),
        jnp.stack([e1[1]["w"], e2[1]["w"]], 0),                     # (2, 2*IE, IE)
        jnp.stack([e1[1]["b"][None], e2[1]["b"][None]], 0),
    ]

    head = []
    for layer in raw["vector_mlp"]:
        head += [layer["w"], layer["b"][None]]
        if "g" in layer:
            head += [layer["g"][None], layer["beta"][None]]
    for layer in raw["final_mlp"]:
        head += [layer["w"], layer["b"][None]]

    return dict(masks=mask_arrays, subs=sub_mats, conv=conv_arrays,
                embed=embed_arrays, head=head, conv_descs=conv_descs,
                vec_ln_flags=tuple("g" in l for l in raw["vector_mlp"]),
                n_final=len(raw["final_mlp"]))


# ---------------- full hybrid2vectorCNN forward ----------------------------------
def hybrid_forward(packed, y, h1, h2):
    batch = y.shape[0]
    n_ch = h1.shape[1]

    def to_rows(h):
        # NCHW -> (C*B, H*W): lane-dense rows ordered channel-major (c*B + b).
        return h.transpose(1, 0, 2, 3).reshape(n_ch * batch, -1)

    # merge branches along sublanes so the single fused kernel sees one slab.
    hcat = jnp.concatenate([to_rows(h1), to_rows(h2)], axis=0)      # (2*C*B, H*W)
    return _fused_call(packed, y, hcat)                             # (B, OUT_DIM)


if __name__ == "__main__":
    root = jax.random.PRNGKey(0)
    k_in, k_par = jax.random.split(root)
    ky, kh1, kh2 = jax.random.split(k_in, 3)

    y = jax.random.normal(ky, (BATCH, VEC_IN), jnp.float32)
    h1 = jax.random.normal(kh1, (BATCH, IMG_C, IMG_H, IMG_W), jnp.float32)
    h2 = jax.random.normal(kh2, (BATCH, IMG_C, IMG_H, IMG_W), jnp.float32)

    raw = init_params(k_par)
    packed = pack_params(raw, BATCH)

    fwd = jax.jit(partial(hybrid_forward, packed))
    out = fwd(y, h1, h2)
    jax.block_until_ready(out)

    assert out.shape == (BATCH, OUT_DIM), out.shape
    assert bool(jnp.all(jnp.isfinite(out)))
    print("KERNEL_OK")
</pallas_src>

<mosaic_0001>
module attributes {stable_mosaic.version = 11 : i64} {
  func.func @kernel(%arg0: memref<2x8xf32, #tpu.memory_space<vmem>>, %arg1: memref<4x256xf32, #tpu.memory_space<vmem>>, %arg2: memref<9x256xf32, #tpu.memory_space<vmem>>, %arg3: memref<256x64xf32, #tpu.memory_space<vmem>>, %arg4: memref<16x36xf32, #tpu.memory_space<vmem>>, %arg5: memref<16x1xf32, #tpu.memory_space<vmem>>, %arg6: memref<16x144xf32, #tpu.memory_space<vmem>>, %arg7: memref<16x1xf32, #tpu.memory_space<vmem>>, %arg8: memref<16x144xf32, #tpu.memory_space<vmem>>, %arg9: memref<16x1xf32, #tpu.memory_space<vmem>>, %arg10: memref<2x256x16xf32, #tpu.memory_space<vmem>>, %arg11: memref<2x1x16xf32, #tpu.memory_space<vmem>>, %arg12: memref<2x1x16xf32, #tpu.memory_space<vmem>>, %arg13: memref<2x1x16xf32, #tpu.memory_space<vmem>>, %arg14: memref<2x16x8xf32, #tpu.memory_space<vmem>>, %arg15: memref<2x1x8xf32, #tpu.memory_space<vmem>>, %arg16: memref<8x8xf32, #tpu.memory_space<vmem>>, %arg17: memref<1x8xf32, #tpu.memory_space<vmem>>, %arg18: memref<1x8xf32, #tpu.memory_space<vmem>>, %arg19: memref<1x8xf32, #tpu.memory_space<vmem>>, %arg20: memref<8x8xf32, #tpu.memory_space<vmem>>, %arg21: memref<1x8xf32, #tpu.memory_space<vmem>>, %arg22: memref<1x8xf32, #tpu.memory_space<vmem>>, %arg23: memref<1x8xf32, #tpu.memory_space<vmem>>, %arg24: memref<8x8xf32, #tpu.memory_space<vmem>>, %arg25: memref<1x8xf32, #tpu.memory_space<vmem>>, %arg26: memref<24x16xf32, #tpu.memory_space<vmem>>, %arg27: memref<1x16xf32, #tpu.memory_space<vmem>>, %arg28: memref<16x16xf32, #tpu.memory_space<vmem>>, %arg29: memref<1x16xf32, #tpu.memory_space<vmem>>, %arg30: memref<16x4xf32, #tpu.memory_space<vmem>>, %arg31: memref<1x4xf32, #tpu.memory_space<vmem>>, %arg32: memref<2x4xf32, #tpu.memory_space<vmem>>) attributes {dimension_semantics = [], scalar_prefetch = 0 : i64, scratch_operands = 0 : i64, tpu.core_type = #tpu.core_type<tc>} {
    %c0 = arith.constant 0 : index
    %c0_0 = arith.constant 0 : index
    %0 = vector.load %arg1[%c0, %c0_0] : memref<4x256xf32, #tpu.memory_space<vmem>>, vector<4x256xf32>
    %c17_i32 = arith.constant 17 : i32
    %1 = tpu.dynamic_rotate %0 by %c17_i32 dim 1 : vector<4x256xf32>, i32 -> vector<4x256xf32>
    %c0_1 = arith.constant 0 : index
    %c0_2 = arith.constant 0 : index
    %2 = vector.load %arg2[%c0_1, %c0_2] : memref<9x256xf32, #tpu.memory_space<vmem>>, vector<1x256xf32>
    %3 = vector.broadcast %2 : vector<1x256xf32> to vector<4x256xf32>
    %4 = arith.mulf %1, %3 : vector<4x256xf32>
    %c16_i32 = arith.constant 16 : i32
    %5 = tpu.dynamic_rotate %0 by %c16_i32 dim 1 : vector<4x256xf32>, i32 -> vector<4x256xf32>
    %c1 = arith.constant 1 : index
    %c0_3 = arith.constant 0 : index
    %6 = vector.load %arg2[%c1, %c0_3] : memref<9x256xf32, #tpu.memory_space<vmem>>, vector<1x256xf32>
    %7 = vector.broadcast %6 : vector<1x256xf32> to vector<4x256xf32>
    %8 = arith.mulf %5, %7 : vector<4x256xf32>
    %c15_i32 = arith.constant 15 : i32
    %9 = tpu.dynamic_rotate %0 by %c15_i32 dim 1 : vector<4x256xf32>, i32 -> vector<4x256xf32>
    %c2 = arith.constant 2 : index
    %c0_4 = arith.constant 0 : index
    %10 = vector.load %arg2[%c2, %c0_4] : memref<9x256xf32, #tpu.memory_space<vmem>>, vector<1x256xf32>
    %11 = vector.broadcast %10 : vector<1x256xf32> to vector<4x256xf32>
    %12 = arith.mulf %9, %11 : vector<4x256xf32>
    %c1_i32 = arith.constant 1 : i32
    %13 = tpu.dynamic_rotate %0 by %c1_i32 dim 1 : vector<4x256xf32>, i32 -> vector<4x256xf32>
    %c3 = arith.constant 3 : index
    %c0_5 = arith.constant 0 : index
    %14 = vector.load %arg2[%c3, %c0_5] : memref<9x256xf32, #tpu.memory_space<vmem>>, vector<1x256xf32>
    %15 = vector.broadcast %14 : vector<1x256xf32> to vector<4x256xf32>
    %16 = arith.mulf %13, %15 : vector<4x256xf32>
    %c4 = arith.constant 4 : index
    %c0_6 = arith.constant 0 : index
    %17 = vector.load %arg2[%c4, %c0_6] : memref<9x256xf32, #tpu.memory_space<vmem>>, vector<1x256xf32>
    %18 = vector.broadcast %17 : vector<1x256xf32> to vector<4x256xf32>
    %19 = arith.mulf %0, %18 : vector<4x256xf32>
    %c255_i32 = arith.constant 255 : i32
    %20 = tpu.dynamic_rotate %0 by %c255_i32 dim 1 : vector<4x256xf32>, i32 -> vector<4x256xf32>
    %c5 = arith.constant 5 : index
    %c0_7 = arith.constant 0 : index
    %21 = vector.load %arg2[%c5, %c0_7] : memref<9x256xf32, #tpu.memory_space<vmem>>, vector<1x256xf32>
    %22 = vector.broadcast %21 : vector<1x256xf32> to vector<4x256xf32>
    %23 = arith.mulf %20, %22 : vector<4x256xf32>
    %c241_i32 = arith.constant 241 : i32
    %24 = tpu.dynamic_rotate %0 by %c241_i32 dim 1 : vector<4x256xf32>, i32 -> vector<4x256xf32>
    %c6 = arith.constant 6 : index
    %c0_8 = arith.constant 0 : index
    %25 = vector.load %arg2[%c6, %c0_8] : memref<9x256xf32, #tpu.memory_space<vmem>>, vector<1x256xf32>
    %26 = vector.broadcast %25 : vector<1x256xf32> to vector<4x256xf32>
    %27 = arith.mulf %24, %26 : vector<4x256xf32>
    %c240_i32 = arith.constant 240 : i32
    %28 = tpu.dynamic_rotate %0 by %c240_i32 dim 1 : vector<4x256xf32>, i32 -> vector<4x256xf32>
    %c7 = arith.constant 7 : index
    %c0_9 = arith.constant 0 : index
    %29 = vector.load %arg2[%c7, %c0_9] : memref<9x256xf32, #tpu.memory_space<vmem>>, vector<1x256xf32>
    %30 = vector.broadcast %29 : vector<1x256xf32> to vector<4x256xf32>
    %31 = arith.mulf %28, %30 : vector<4x256xf32>
    %c239_i32 = arith.constant 239 : i32
    %32 = tpu.dynamic_rotate %0 by %c239_i32 dim 1 : vector<4x256xf32>, i32 -> vector<4x256xf32>
    %c8 = arith.constant 8 : index
    %c0_10 = arith.constant 0 : index
    %33 = vector.load %arg2[%c8, %c0_10] : memref<9x256xf32, #tpu.memory_space<vmem>>, vector<1x256xf32>
    %34 = vector.broadcast %33 : vector<1x256xf32> to vector<4x256xf32>
    %35 = arith.mulf %32, %34 : vector<4x256xf32>
    %cst = arith.constant 0.000000e+00 : f32
    %36 = vector.broadcast %cst : f32 to vector<16x256xf32>
    %c0_11 = arith.constant 0 : index
    %c0_12 = arith.constant 0 : index
    %37 = vector.load %arg4[%c0_11, %c0_12] : memref<16x36xf32, #tpu.memory_space<vmem>>, vector<16x4xf32>
    %cst_13 = arith.constant dense<0.000000e+00> : vector<16x256xf32>
    %38 = tpu.matmul %37, %4, %cst_13 {dimension_numbers = #tpu.dot_dimension_numbers<[1], [0], [0], [1], [0, 0, 1, 1], [], []>} : vector<16x4xf32>, vector<4x256xf32>, vector<16x256xf32> -> vector<16x256xf32>
    %39 = arith.addf %36, %38 : vector<16x256xf32>
    %c0_14 = arith.constant 0 : index
    %c4_15 = arith.constant 4 : index
    %40 = vector.load %arg4[%c0_14, %c4_15] : memref<16x36xf32, #tpu.memory_space<vmem>>, vector<16x4xf32>
    %cst_16 = arith.constant dense<0.000000e+00> : vector<16x256xf32>
    %41 = tpu.matmul %40, %8, %cst_16 {dimension_numbers = #tpu.dot_dimension_numbers<[1], [0], [0], [1], [0, 0, 1, 1], [], []>} : vector<16x4xf32>, vector<4x256xf32>, vector<16x256xf32> -> vector<16x256xf32>
    %42 = arith.addf %39, %41 : vector<16x256xf32>
    %c0_17 = arith.constant 0 : index
    %c8_18 = arith.constant 8 : index
    %43 = vector.load %arg4[%c0_17, %c8_18] : memref<16x36xf32, #tpu.memory_space<vmem>>, vector<16x4xf32>
    %cst_19 = arith.constant dense<0.000000e+00> : vector<16x256xf32>
    %44 = tpu.matmul %43, %12, %cst_19 {dimension_numbers = #tpu.dot_dimension_numbers<[1], [0], [0], [1], [0, 0, 1, 1], [], []>} : vector<16x4xf32>, vector<4x256xf32>, vector<16x256xf32> -> vector<16x256xf32>
    %45 = arith.addf %42, %44 : vector<16x256xf32>
    %c0_20 = arith.constant 0 : index
    %c12 = arith.constant 12 : index
    %46 = vector.load %arg4[%c0_20, %c12] : memref<16x36xf32, #tpu.memory_space<vmem>>, vector<16x4xf32>
    %cst_21 = arith.constant dense<0.000000e+00> : vector<16x256xf32>
    %47 = tpu.matmul %46, %16, %cst_21 {dimension_numbers = #tpu.dot_dimension_numbers<[1], [0], [0], [1], [0, 0, 1, 1], [], []>} : vector<16x4xf32>, vector<4x256xf32>, vector<16x256xf32> -> vector<16x256xf32>
    %48 = arith.addf %45, %47 : vector<16x256xf32>
    %c0_22 = arith.constant 0 : index
    %c16 = arith.constant 16 : index
    %49 = vector.load %arg4[%c0_22, %c16] : memref<16x36xf32, #tpu.memory_space<vmem>>, vector<16x4xf32>
    %cst_23 = arith.constant dense<0.000000e+00> : vector<16x256xf32>
    %50 = tpu.matmul %49, %19, %cst_23 {dimension_numbers = #tpu.dot_dimension_numbers<[1], [0], [0], [1], [0, 0, 1, 1], [], []>} : vector<16x4xf32>, vector<4x256xf32>, vector<16x256xf32> -> vector<16x256xf32>
    %51 = arith.addf %48, %50 : vector<16x256xf32>
    %c0_24 = arith.constant 0 : index
    %c20 = arith.constant 20 : index
    %52 = vector.load %arg4[%c0_24, %c20] : memref<16x36xf32, #tpu.memory_space<vmem>>, vector<16x4xf32>
    %cst_25 = arith.constant dense<0.000000e+00> : vector<16x256xf32>
    %53 = tpu.matmul %52, %23, %cst_25 {dimension_numbers = #tpu.dot_dimension_numbers<[1], [0], [0], [1], [0, 0, 1, 1], [], []>} : vector<16x4xf32>, vector<4x256xf32>, vector<16x256xf32> -> vector<16x256xf32>
    %54 = arith.addf %51, %53 : vector<16x256xf32>
    %c0_26 = arith.constant 0 : index
    %c24 = arith.constant 24 : index
    %55 = vector.load %arg4[%c0_26, %c24] : memref<16x36xf32, #tpu.memory_space<vmem>>, vector<16x4xf32>
    %cst_27 = arith.constant dense<0.000000e+00> : vector<16x256xf32>
    %56 = tpu.matmul %55, %27, %cst_27 {dimension_numbers = #tpu.dot_dimension_numbers<[1], [0], [0], [1], [0, 0, 1, 1], [], []>} : vector<16x4xf32>, vector<4x256xf32>, vector<16x256xf32> -> vector<16x256xf32>
    %57 = arith.addf %54, %56 : vector<16x256xf32>
    %c0_28 = arith.constant 0 : index
    %c28 = arith.constant 28 : index
    %58 = vector.load %arg4[%c0_28, %c28] : memref<16x36xf32, #tpu.memory_space<vmem>>, vector<16x4xf32>
    %cst_29 = arith.constant dense<0.000000e+00> : vector<16x256xf32>
    %59 = tpu.matmul %58, %31, %cst_29 {dimension_numbers = #tpu.dot_dimension_numbers<[1], [0], [0], [1], [0, 0, 1, 1], [], []>} : vector<16x4xf32>, vector<4x256xf32>, vector<16x256xf32> -> vector<16x256xf32>
    %60 = arith.addf %57, %59 : vector<16x256xf32>
    %c0_30 = arith.constant 0 : index
    %c32 = arith.constant 32 : index
    %61 = vector.load %arg4[%c0_30, %c32] : memref<16x36xf32, #tpu.memory_space<vmem>>, vector<16x4xf32>
    %cst_31 = arith.constant dense<0.000000e+00> : vector<16x256xf32>
    %62 = tpu.matmul %61, %35, %cst_31 {dimension_numbers = #tpu.dot_dimension_numbers<[1], [0], [0], [1], [0, 0, 1, 1], [], []>} : vector<16x4xf32>, vector<4x256xf32>, vector<16x256xf32> -> vector<16x256xf32>
    %63 = arith.addf %60, %62 : vector<16x256xf32>
    %c0_32 = arith.constant 0 : index
    %c0_33 = arith.constant 0 : index
    %64 = vector.load %arg5[%c0_32, %c0_33] : memref<16x1xf32, #tpu.memory_space<vmem>>, vector<16x1xf32>
    %65 = vector.broadcast %64 : vector<16x1xf32> to vector<16x256xf32>
    %66 = arith.addf %63, %65 : vector<16x256xf32>
    %cst_34 = arith.constant 5.000000e-01 : f32
    %67 = vector.broadcast %cst_34 : f32 to vector<16x256xf32>
    %68 = arith.mulf %67, %66 : vector<16x256xf32>
    %cst_35 = arith.constant 4.471500e-02 : f32
    %69 = vector.broadcast %cst_35 : f32 to vector<16x256xf32>
    %70 = arith.mulf %69, %66 : vector<16x256xf32>
    %71 = arith.mulf %70, %66 : vector<16x256xf32>
    %72 = arith.mulf %71, %66 : vector<16x256xf32>
    %73 = arith.addf %66, %72 : vector<16x256xf32>
    %cst_36 = arith.constant 0.797884583 : f32
    %74 = vector.broadcast %cst_36 : f32 to vector<16x256xf32>
    %75 = arith.mulf %74, %73 : vector<16x256xf32>
    %76 = math.tanh %75 : vector<16x256xf32>
    %cst_37 = arith.constant 1.000000e+00 : f32
    %77 = vector.broadcast %cst_37 : f32 to vector<16x256xf32>
    %78 = arith.addf %77, %76 : vector<16x256xf32>
    %79 = arith.mulf %68, %78 : vector<16x256xf32>
    %c17_i32_38 = arith.constant 17 : i32
    %80 = tpu.dynamic_rotate %79 by %c17_i32_38 dim 1 : vector<16x256xf32>, i32 -> vector<16x256xf32>
    %c0_39 = arith.constant 0 : index
    %c0_40 = arith.constant 0 : index
    %81 = vector.load %arg2[%c0_39, %c0_40] : memref<9x256xf32, #tpu.memory_space<vmem>>, vector<1x256xf32>
    %82 = vector.broadcast %81 : vector<1x256xf32> to vector<16x256xf32>
    %83 = arith.mulf %80, %82 : vector<16x256xf32>
    %c16_i32_41 = arith.constant 16 : i32
    %84 = tpu.dynamic_rotate %79 by %c16_i32_41 dim 1 : vector<16x256xf32>, i32 -> vector<16x256xf32>
    %c1_42 = arith.constant 1 : index
    %c0_43 = arith.constant 0 : index
    %85 = vector.load %arg2[%c1_42, %c0_43] : memref<9x256xf32, #tpu.memory_space<vmem>>, vector<1x256xf32>
    %86 = vector.broadcast %85 : vector<1x256xf32> to vector<16x256xf32>
    %87 = arith.mulf %84, %86 : vector<16x256xf32>
    %c15_i32_44 = arith.constant 15 : i32
    %88 = tpu.dynamic_rotate %79 by %c15_i32_44 dim 1 : vector<16x256xf32>, i32 -> vector<16x256xf32>
    %c2_45 = arith.constant 2 : index
    %c0_46 = arith.constant 0 : index
    %89 = vector.load %arg2[%c2_45, %c0_46] : memref<9x256xf32, #tpu.memory_space<vmem>>, vector<1x256xf32>
    %90 = vector.broadcast %89 : vector<1x256xf32> to vector<16x256xf32>
    %91 = arith.mulf %88, %90 : vector<16x256xf32>
    %c1_i32_47 = arith.constant 1 : i32
    %92 = tpu.dynamic_rotate %79 by %c1_i32_47 dim 1 : vector<16x256xf32>, i32 -> vector<16x256xf32>
    %c3_48 = arith.constant 3 : index
    %c0_49 = arith.constant 0 : index
    %93 = vector.load %arg2[%c3_48, %c0_49] : memref<9x256xf32, #tpu.memory_space<vmem>>, vector<1x256xf32>
    %94 = vector.broadcast %93 : vector<1x256xf32> to vector<16x256xf32>
    %95 = arith.mulf %92, %94 : vector<16x256xf32>
    %c4_50 = arith.constant 4 : index
    %c0_51 = arith.constant 0 : index
    %96 = vector.load %arg2[%c4_50, %c0_51] : memref<9x256xf32, #tpu.memory_space<vmem>>, vector<1x256xf32>
    %97 = vector.broadcast %96 : vector<1x256xf32> to vector<16x256xf32>
    %98 = arith.mulf %79, %97 : vector<16x256xf32>
    %c255_i32_52 = arith.constant 255 : i32
    %99 = tpu.dynamic_rotate %79 by %c255_i32_52 dim 1 : vector<16x256xf32>, i32 -> vector<16x256xf32>
    %c5_53 = arith.constant 5 : index
    %c0_54 = arith.constant 0 : index
    %100 = vector.load %arg2[%c5_53, %c0_54] : memref<9x256xf32, #tpu.memory_space<vmem>>, vector<1x256xf32>
    %101 = vector.broadcast %100 : vector<1x256xf32> to vector<16x256xf32>
    %102 = arith.mulf %99, %101 : vector<16x256xf32>
    %c241_i32_55 = arith.constant 241 : i32
    %103 = tpu.dynamic_rotate %79 by %c241_i32_55 dim 1 : vector<16x256xf32>, i32 -> vector<16x256xf32>
    %c6_56 = arith.constant 6 : index
    %c0_57 = arith.constant 0 : index
    %104 = vector.load %arg2[%c6_56, %c0_57] : memref<9x256xf32, #tpu.memory_space<vmem>>, vector<1x256xf32>
    %105 = vector.broadcast %104 : vector<1x256xf32> to vector<16x256xf32>
    %106 = arith.mulf %103, %105 : vector<16x256xf32>
    %c240_i32_58 = arith.constant 240 : i32
    %107 = tpu.dynamic_rotate %79 by %c240_i32_58 dim 1 : vector<16x256xf32>, i32 -> vector<16x256xf32>
    %c7_59 = arith.constant 7 : index
    %c0_60 = arith.constant 0 : index
    %108 = vector.load %arg2[%c7_59, %c0_60] : memref<9x256xf32, #tpu.memory_space<vmem>>, vector<1x256xf32>
    %109 = vector.broadcast %108 : vector<1x256xf32> to vector<16x256xf32>
    %110 = arith.mulf %107, %109 : vector<16x256xf32>
    %c239_i32_61 = arith.constant 239 : i32
    %111 = tpu.dynamic_rotate %79 by %c239_i32_61 dim 1 : vector<16x256xf32>, i32 -> vector<16x256xf32>
    %c8_62 = arith.constant 8 : index
    %c0_63 = arith.constant 0 : index
    %112 = vector.load %arg2[%c8_62, %c0_63] : memref<9x256xf32, #tpu.memory_space<vmem>>, vector<1x256xf32>
    %113 = vector.broadcast %112 : vector<1x256xf32> to vector<16x256xf32>
    %114 = arith.mulf %111, %113 : vector<16x256xf32>
    %115 = tpu.concatenate %83, %87, %91, %95, %98, %102, %106, %110, %114 in 0 : vector<16x256xf32>, vector<16x256xf32>, vector<16x256xf32>, vector<16x256xf32>, vector<16x256xf32>, vector<16x256xf32>, vector<16x256xf32>, vector<16x256xf32>, vector<16x256xf32> -> vector<144x256xf32>
    %c0_64 = arith.constant 0 : index
    %c0_65 = arith.constant 0 : index
    %116 = vector.load %arg6[%c0_64, %c0_65] : memref<16x144xf32, #tpu.memory_space<vmem>>, vector<16x144xf32>
    %cst_66 = arith.constant dense<0.000000e+00> : vector<16x256xf32>
    %117 = tpu.matmul %116, %115, %cst_66 {dimension_numbers = #tpu.dot_dimension_numbers<[1], [0], [0], [1], [0, 0, 1, 1], [], []>} : vector<16x144xf32>, vector<144x256xf32>, vector<16x256xf32> -> vector<16x256xf32>
    %c0_67 = arith.constant 0 : index
    %c0_68 = arith.constant 0 : index
    %118 = vector.load %arg7[%c0_67, %c0_68] : memref<16x1xf32, #tpu.memory_space<vmem>>, vector<16x1xf32>
    %119 = vector.broadcast %118 : vector<16x1xf32> to vector<16x256xf32>
    %120 = arith.addf %117, %119 : vector<16x256xf32>
    %cst_69 = arith.constant 5.000000e-01 : f32
    %121 = vector.broadcast %cst_69 : f32 to vector<16x256xf32>
    %122 = arith.mulf %121, %120 : vector<16x256xf32>
    %cst_70 = arith.constant 4.471500e-02 : f32
    %123 = vector.broadcast %cst_70 : f32 to vector<16x256xf32>
    %124 = arith.mulf %123, %120 : vector<16x256xf32>
    %125 = arith.mulf %124, %120 : vector<16x256xf32>
    %126 = arith.mulf %125, %120 : vector<16x256xf32>
    %127 = arith.addf %120, %126 : vector<16x256xf32>
    %cst_71 = arith.constant 0.797884583 : f32
    %128 = vector.broadcast %cst_71 : f32 to vector<16x256xf32>
    %129 = arith.mulf %128, %127 : vector<16x256xf32>
    %130 = math.tanh %129 : vector<16x256xf32>
    %cst_72 = arith.constant 1.000000e+00 : f32
    %131 = vector.broadcast %cst_72 : f32 to vector<16x256xf32>
    %132 = arith.addf %131, %130 : vector<16x256xf32>
    %133 = arith.mulf %122, %132 : vector<16x256xf32>
    %c17_i32_73 = arith.constant 17 : i32
    %134 = tpu.dynamic_rotate %133 by %c17_i32_73 dim 1 : vector<16x256xf32>, i32 -> vector<16x256xf32>
    %c0_74 = arith.constant 0 : index
    %c0_75 = arith.constant 0 : index
    %135 = vector.load %arg2[%c0_74, %c0_75] : memref<9x256xf32, #tpu.memory_space<vmem>>, vector<1x256xf32>
    %136 = vector.broadcast %135 : vector<1x256xf32> to vector<16x256xf32>
    %137 = arith.mulf %134, %136 : vector<16x256xf32>
    %c16_i32_76 = arith.constant 16 : i32
    %138 = tpu.dynamic_rotate %133 by %c16_i32_76 dim 1 : vector<16x256xf32>, i32 -> vector<16x256xf32>
    %c1_77 = arith.constant 1 : index
    %c0_78 = arith.constant 0 : index
    %139 = vector.load %arg2[%c1_77, %c0_78] : memref<9x256xf32, #tpu.memory_space<vmem>>, vector<1x256xf32>
    %140 = vector.broadcast %139 : vector<1x256xf32> to vector<16x256xf32>
    %141 = arith.mulf %138, %140 : vector<16x256xf32>
    %c15_i32_79 = arith.constant 15 : i32
    %142 = tpu.dynamic_rotate %133 by %c15_i32_79 dim 1 : vector<16x256xf32>, i32 -> vector<16x256xf32>
    %c2_80 = arith.constant 2 : index
    %c0_81 = arith.constant 0 : index
    %143 = vector.load %arg2[%c2_80, %c0_81] : memref<9x256xf32, #tpu.memory_space<vmem>>, vector<1x256xf32>
    %144 = vector.broadcast %143 : vector<1x256xf32> to vector<16x256xf32>
    %145 = arith.mulf %142, %144 : vector<16x256xf32>
    %c1_i32_82 = arith.constant 1 : i32
    %146 = tpu.dynamic_rotate %133 by %c1_i32_82 dim 1 : vector<16x256xf32>, i32 -> vector<16x256xf32>
    %c3_83 = arith.constant 3 : index
    %c0_84 = arith.constant 0 : index
    %147 = vector.load %arg2[%c3_83, %c0_84] : memref<9x256xf32, #tpu.memory_space<vmem>>, vector<1x256xf32>
    %148 = vector.broadcast %147 : vector<1x256xf32> to vector<16x256xf32>
    %149 = arith.mulf %146, %148 : vector<16x256xf32>
    %c4_85 = arith.constant 4 : index
    %c0_86 = arith.constant 0 : index
    %150 = vector.load %arg2[%c4_85, %c0_86] : memref<9x256xf32, #tpu.memory_space<vmem>>, vector<1x256xf32>
    %151 = vector.broadcast %150 : vector<1x256xf32> to vector<16x256xf32>
    %152 = arith.mulf %133, %151 : vector<16x256xf32>
    %c255_i32_87 = arith.constant 255 : i32
    %153 = tpu.dynamic_rotate %133 by %c255_i32_87 dim 1 : vector<16x256xf32>, i32 -> vector<16x256xf32>
    %c5_88 = arith.constant 5 : index
    %c0_89 = arith.constant 0 : index
    %154 = vector.load %arg2[%c5_88, %c0_89] : memref<9x256xf32, #tpu.memory_space<vmem>>, vector<1x256xf32>
    %155 = vector.broadcast %154 : vector<1x256xf32> to vector<16x256xf32>
    %156 = arith.mulf %153, %155 : vector<16x256xf32>
    %c241_i32_90 = arith.constant 241 : i32
    %157 = tpu.dynamic_rotate %133 by %c241_i32_90 dim 1 : vector<16x256xf32>, i32 -> vector<16x256xf32>
    %c6_91 = arith.constant 6 : index
    %c0_92 = arith.constant 0 : index
    %158 = vector.load %arg2[%c6_91, %c0_92] : memref<9x256xf32, #tpu.memory_space<vmem>>, vector<1x256xf32>
    %159 = vector.broadcast %158 : vector<1x256xf32> to vector<16x256xf32>
    %160 = arith.mulf %157, %159 : vector<16x256xf32>
    %c240_i32_93 = arith.constant 240 : i32
    %161 = tpu.dynamic_rotate %133 by %c240_i32_93 dim 1 : vector<16x256xf32>, i32 -> vector<16x256xf32>
    %c7_94 = arith.constant 7 : index
    %c0_95 = arith.constant 0 : index
    %162 = vector.load %arg2[%c7_94, %c0_95] : memref<9x256xf32, #tpu.memory_space<vmem>>, vector<1x256xf32>
    %163 = vector.broadcast %162 : vector<1x256xf32> to vector<16x256xf32>
    %164 = arith.mulf %161, %163 : vector<16x256xf32>
    %c239_i32_96 = arith.constant 239 : i32
    %165 = tpu.dynamic_rotate %133 by %c239_i32_96 dim 1 : vector<16x256xf32>, i32 -> vector<16x256xf32>
    %c8_97 = arith.constant 8 : index
    %c0_98 = arith.constant 0 : index
    %166 = vector.load %arg2[%c8_97, %c0_98] : memref<9x256xf32, #tpu.memory_space<vmem>>, vector<1x256xf32>
    %167 = vector.broadcast %166 : vector<1x256xf32> to vector<16x256xf32>
    %168 = arith.mulf %165, %167 : vector<16x256xf32>
    %169 = tpu.concatenate %137, %141, %145, %149, %152, %156, %160, %164, %168 in 0 : vector<16x256xf32>, vector<16x256xf32>, vector<16x256xf32>, vector<16x256xf32>, vector<16x256xf32>, vector<16x256xf32>, vector<16x256xf32>, vector<16x256xf32>, vector<16x256xf32> -> vector<144x256xf32>
    %c0_99 = arith.constant 0 : index
    %c0_100 = arith.constant 0 : index
    %170 = vector.load %arg8[%c0_99, %c0_100] : memref<16x144xf32, #tpu.memory_space<vmem>>, vector<16x144xf32>
    %cst_101 = arith.constant dense<0.000000e+00> : vector<16x256xf32>
    %171 = tpu.matmul %170, %169, %cst_101 {dimension_numbers = #tpu.dot_dimension_numbers<[1], [0], [0], [1], [0, 0, 1, 1], [], []>} : vector<16x144xf32>, vector<144x256xf32>, vector<16x256xf32> -> vector<16x256xf32>
    %c0_102 = arith.constant 0 : index
    %c0_103 = arith.constant 0 : index
    %172 = vector.load %arg3[%c0_102, %c0_103] : memref<256x64xf32, #tpu.memory_space<vmem>>, vector<256x64xf32>
    %cst_104 = arith.constant dense<0.000000e+00> : vector<16x64xf32>
    %173 = tpu.matmul %171, %172, %cst_104 {dimension_numbers = #tpu.dot_dimension_numbers<[1], [0], [0], [1], [0, 0, 1, 1], [], []>} : vector<16x256xf32>, vector<256x64xf32>, vector<16x64xf32> -> vector<16x64xf32>
    %c0_105 = arith.constant 0 : index
    %c0_106 = arith.constant 0 : index
    %174 = vector.load %arg9[%c0_105, %c0_106] : memref<16x1xf32, #tpu.memory_space<vmem>>, vector<16x1xf32>
    %175 = vector.broadcast %174 : vector<16x1xf32> to vector<16x64xf32>
    %176 = arith.addf %173, %175 : vector<16x64xf32>
    %cst_107 = arith.constant 5.000000e-01 : f32
    %177 = vector.broadcast %cst_107 : f32 to vector<16x64xf32>
    %178 = arith.mulf %177, %176 : vector<16x64xf32>
    %cst_108 = arith.constant 4.471500e-02 : f32
    %179 = vector.broadcast %cst_108 : f32 to vector<16x64xf32>
    %180 = arith.mulf %179, %176 : vector<16x64xf32>
    %181 = arith.mulf %180, %176 : vector<16x64xf32>
    %182 = arith.mulf %181, %176 : vector<16x64xf32>
    %183 = arith.addf %176, %182 : vector<16x64xf32>
    %cst_109 = arith.constant 0.797884583 : f32
    %184 = vector.broadcast %cst_109 : f32 to vector<16x64xf32>
    %185 = arith.mulf %184, %183 : vector<16x64xf32>
    %186 = math.tanh %185 : vector<16x64xf32>
    %cst_110 = arith.constant 1.000000e+00 : f32
    %187 = vector.broadcast %cst_110 : f32 to vector<16x64xf32>
    %188 = arith.addf %187, %186 : vector<16x64xf32>
    %189 = arith.mulf %178, %188 : vector<16x64xf32>
    %c0_111 = arith.constant 0 : index
    %c0_112 = arith.constant 0 : index
    %c0_113 = arith.constant 0 : index
    %190 = vector.load %arg10[%c0_111, %c0_112, %c0_113] : memref<2x256x16xf32, #tpu.memory_space<vmem>>, vector<1x256x16xf32>
    %191 = vector.shape_cast %190 : vector<1x256x16xf32> to vector<256x16xf32>
    %cst_114 = arith.constant 0.000000e+00 : f32
    %192 = vector.broadcast %cst_114 : f32 to vector<2x16xf32>
    %193 = vector.extract_strided_slice %189 {offsets = [0, 0], sizes = [2, 64], strides = [1, 1]} : vector<16x64xf32> to vector<2x64xf32>
    %194 = vector.extract_strided_slice %191 {offsets = [0, 0], sizes = [64, 16], strides = [1, 1]} : vector<256x16xf32> to vector<64x16xf32>
    %cst_115 = arith.constant dense<0.000000e+00> : vector<2x16xf32>
    %195 = tpu.matmul %193, %194, %cst_115 {dimension_numbers = #tpu.dot_dimension_numbers<[1], [0], [0], [1], [0, 0, 1, 1], [], []>} : vector<2x64xf32>, vector<64x16xf32>, vector<2x16xf32> -> vector<2x16xf32>
    %196 = arith.addf %192, %195 : vector<2x16xf32>
    %197 = vector.extract_strided_slice %189 {offsets = [2, 0], sizes = [2, 64], strides = [1, 1]} : vector<16x64xf32> to vector<2x64xf32>
    %198 = vector.extract_strided_slice %191 {offsets = [64, 0], sizes = [64, 16], strides = [1, 1]} : vector<256x16xf32> to vector<64x16xf32>
    %cst_116 = arith.constant dense<0.000000e+00> : vector<2x16xf32>
    %199 = tpu.matmul %197, %198, %cst_116 {dimension_numbers = #tpu.dot_dimension_numbers<[1], [0], [0], [1], [0, 0, 1, 1], [], []>} : vector<2x64xf32>, vector<64x16xf32>, vector<2x16xf32> -> vector<2x16xf32>
    %200 = arith.addf %196, %199 : vector<2x16xf32>
    %201 = vector.extract_strided_slice %189 {offsets = [4, 0], sizes = [2, 64], strides = [1, 1]} : vector<16x64xf32> to vector<2x64xf32>
    %202 = vector.extract_strided_slice %191 {offsets = [128, 0], sizes = [64, 16], strides = [1, 1]} : vector<256x16xf32> to vector<64x16xf32>
    %cst_117 = arith.constant dense<0.000000e+00> : vector<2x16xf32>
    %203 = tpu.matmul %201, %202, %cst_117 {dimension_numbers = #tpu.dot_dimension_numbers<[1], [0], [0], [1], [0, 0, 1, 1], [], []>} : vector<2x64xf32>, vector<64x16xf32>, vector<2x16xf32> -> vector<2x16xf32>
    %204 = arith.addf %200, %203 : vector<2x16xf32>
    %205 = vector.extract_strided_slice %189 {offsets = [6, 0], sizes = [2, 64], strides = [1, 1]} : vector<16x64xf32> to vector<2x64xf32>
    %206 = vector.extract_strided_slice %191 {offsets = [192, 0], sizes = [64, 16], strides = [1, 1]} : vector<256x16xf32> to vector<64x16xf32>
    %cst_118 = arith.constant dense<0.000000e+00> : vector<2x16xf32>
    %207 = tpu.matmul %205, %206, %cst_118 {dimension_numbers = #tpu.dot_dimension_numbers<[1], [0], [0], [1], [0, 0, 1, 1], [], []>} : vector<2x64xf32>, vector<64x16xf32>, vector<2x16xf32> -> vector<2x16xf32>
    %208 = arith.addf %204, %207 : vector<2x16xf32>
    %c0_119 = arith.constant 0 : index
    %c0_120 = arith.constant 0 : index
    %c0_121 = arith.constant 0 : index
    %209 = vector.load %arg11[%c0_119, %c0_120, %c0_121] : memref<2x1x16xf32, #tpu.memory_space<vmem>>, vector<1x1x16xf32>
    %210 = vector.shape_cast %209 : vector<1x1x16xf32> to vector<1x16xf32>
    %211 = vector.broadcast %210 : vector<1x16xf32> to vector<2x16xf32>
    %212 = arith.addf %208, %211 : vector<2x16xf32>
    %cst_122 = arith.constant dense<0.000000e+00> : vector<2xf32>
    %213 = vector.multi_reduction <add>, %212, %cst_122 [1] : vector<2x16xf32> to vector<2xf32>
    %214 = vector.shape_cast %213 : vector<2xf32> to vector<2x1xf32>
    %cst_123 = arith.constant 1.600000e+01 : f32
    %215 = vector.broadcast %cst_123 : f32 to vector<2x1xf32>
    %216 = arith.divf %214, %215 : vector<2x1xf32>
    %217 = vector.broadcast %216 : vector<2x1xf32> to vector<2x16xf32>
    %218 = arith.subf %212, %217 : vector<2x16xf32>
    %219 = arith.mulf %218, %218 : vector<2x16xf32>
    %cst_124 = arith.constant dense<0.000000e+00> : vector<2xf32>
    %220 = vector.multi_reduction <add>, %219, %cst_124 [1] : vector<2x16xf32> to vector<2xf32>
    %221 = vector.shape_cast %220 : vector<2xf32> to vector<2x1xf32>
    %cst_125 = arith.constant 1.600000e+01 : f32
    %222 = vector.broadcast %cst_125 : f32 to vector<2x1xf32>
    %223 = arith.divf %221, %222 : vector<2x1xf32>
    %224 = vector.broadcast %216 : vector<2x1xf32> to vector<2x16xf32>
    %225 = arith.subf %212, %224 : vector<2x16xf32>
    %cst_126 = arith.constant 9.99999974E-6 : f32
    %226 = vector.broadcast %cst_126 : f32 to vector<2x1xf32>
    %227 = arith.addf %223, %226 : vector<2x1xf32>
    %228 = math.rsqrt %227 : vector<2x1xf32>
    %229 = vector.broadcast %228 : vector<2x1xf32> to vector<2x16xf32>
    %230 = arith.mulf %225, %229 : vector<2x16xf32>
    %c0_127 = arith.constant 0 : index
    %c0_128 = arith.constant 0 : index
    %c0_129 = arith.constant 0 : index
    %231 = vector.load %arg12[%c0_127, %c0_128, %c0_129] : memref<2x1x16xf32, #tpu.memory_space<vmem>>, vector<1x1x16xf32>
    %232 = vector.shape_cast %231 : vector<1x1x16xf32> to vector<1x16xf32>
    %233 = vector.broadcast %232 : vector<1x16xf32> to vector<2x16xf32>
    %234 = arith.mulf %230, %233 : vector<2x16xf32>
    %c0_130 = arith.constant 0 : index
    %c0_131 = arith.constant 0 : index
    %c0_132 = arith.constant 0 : index
    %235 = vector.load %arg13[%c0_130, %c0_131, %c0_132] : memref<2x1x16xf32, #tpu.memory_space<vmem>>, vector<1x1x16xf32>
    %236 = vector.shape_cast %235 : vector<1x1x16xf32> to vector<1x16xf32>
    %237 = vector.broadcast %236 : vector<1x16xf32> to vector<2x16xf32>
    %238 = arith.addf %234, %237 : vector<2x16xf32>
    %cst_133 = arith.constant 5.000000e-01 : f32
    %239 = vector.broadcast %cst_133 : f32 to vector<2x16xf32>
    %240 = arith.mulf %239, %238 : vector<2x16xf32>
    %cst_134 = arith.constant 4.471500e-02 : f32
    %241 = vector.broadcast %cst_134 : f32 to vector<2x16xf32>
    %242 = arith.mulf %241, %238 : vector<2x16xf32>
    %243 = arith.mulf %242, %238 : vector<2x16xf32>
    %244 = arith.mulf %243, %238 : vector<2x16xf32>
    %245 = arith.addf %238, %244 : vector<2x16xf32>
    %cst_135 = arith.constant 0.797884583 : f32
    %246 = vector.broadcast %cst_135 : f32 to vector<2x16xf32>
    %247 = arith.mulf %246, %245 : vector<2x16xf32>
    %248 = math.tanh %247 : vector<2x16xf32>
    %cst_136 = arith.constant 1.000000e+00 : f32
    %249 = vector.broadcast %cst_136 : f32 to vector<2x16xf32>
    %250 = arith.addf %249, %248 : vector<2x16xf32>
    %251 = arith.mulf %240, %250 : vector<2x16xf32>
    %c0_137 = arith.constant 0 : index
    %c0_138 = arith.constant 0 : index
    %c0_139 = arith.constant 0 : index
    %252 = vector.load %arg14[%c0_137, %c0_138, %c0_139] : memref<2x16x8xf32, #tpu.memory_space<vmem>>, vector<1x16x8xf32>
    %253 = vector.shape_cast %252 : vector<1x16x8xf32> to vector<16x8xf32>
    %cst_140 = arith.constant dense<0.000000e+00> : vector<2x8xf32>
    %254 = tpu.matmul %251, %253, %cst_140 {dimension_numbers = #tpu.dot_dimension_numbers<[1], [0], [0], [1], [0, 0, 1, 1], [], []>} : vector<2x16xf32>, vector<16x8xf32>, vector<2x8xf32> -> vector<2x8xf32>
    %c0_141 = arith.constant 0 : index
    %c0_142 = arith.constant 0 : index
    %c0_143 = arith.constant 0 : index
    %255 = vector.load %arg15[%c0_141, %c0_142, %c0_143] : memref<2x1x8xf32, #tpu.memory_space<vmem>>, vector<1x1x8xf32>
    %256 = vector.shape_cast %255 : vector<1x1x8xf32> to vector<1x8xf32>
    %257 = vector.broadcast %256 : vector<1x8xf32> to vector<2x8xf32>
    %258 = arith.addf %254, %257 : vector<2x8xf32>
    %cst_144 = arith.constant 5.000000e-01 : f32
    %259 = vector.broadcast %cst_144 : f32 to vector<2x8xf32>
    %260 = arith.mulf %259, %258 : vector<2x8xf32>
    %cst_145 = arith.constant 4.471500e-02 : f32
    %261 = vector.broadcast %cst_145 : f32 to vector<2x8xf32>
    %262 = arith.mulf %261, %258 : vector<2x8xf32>
    %263 = arith.mulf %262, %258 : vector<2x8xf32>
    %264 = arith.mulf %263, %258 : vector<2x8xf32>
    %265 = arith.addf %258, %264 : vector<2x8xf32>
    %cst_146 = arith.constant 0.797884583 : f32
    %266 = vector.broadcast %cst_146 : f32 to vector<2x8xf32>
    %267 = arith.mulf %266, %265 : vector<2x8xf32>
    %268 = math.tanh %267 : vector<2x8xf32>
    %cst_147 = arith.constant 1.000000e+00 : f32
    %269 = vector.broadcast %cst_147 : f32 to vector<2x8xf32>
    %270 = arith.addf %269, %268 : vector<2x8xf32>
    %271 = arith.mulf %260, %270 : vector<2x8xf32>
    %c1_148 = arith.constant 1 : index
    %c0_149 = arith.constant 0 : index
    %c0_150 = arith.constant 0 : index
    %272 = vector.load %arg10[%c1_148, %c0_149, %c0_150] : memref<2x256x16xf32, #tpu.memory_space<vmem>>, vector<1x256x16xf32>
    %273 = vector.shape_cast %272 : vector<1x256x16xf32> to vector<256x16xf32>
    %cst_151 = arith.constant 0.000000e+00 : f32
    %274 = vector.broadcast %cst_151 : f32 to vector<2x16xf32>
    %275 = vector.extract_strided_slice %189 {offsets = [8, 0], sizes = [2, 64], strides = [1, 1]} : vector<16x64xf32> to vector<2x64xf32>
    %276 = vector.extract_strided_slice %273 {offsets = [0, 0], sizes = [64, 16], strides = [1, 1]} : vector<256x16xf32> to vector<64x16xf32>
    %cst_152 = arith.constant dense<0.000000e+00> : vector<2x16xf32>
    %277 = tpu.matmul %275, %276, %cst_152 {dimension_numbers = #tpu.dot_dimension_numbers<[1], [0], [0], [1], [0, 0, 1, 1], [], []>} : vector<2x64xf32>, vector<64x16xf32>, vector<2x16xf32> -> vector<2x16xf32>
    %278 = arith.addf %274, %277 : vector<2x16xf32>
    %279 = vector.extract_strided_slice %189 {offsets = [10, 0], sizes = [2, 64], strides = [1, 1]} : vector<16x64xf32> to vector<2x64xf32>
    %280 = vector.extract_strided_slice %273 {offsets = [64, 0], sizes = [64, 16], strides = [1, 1]} : vector<256x16xf32> to vector<64x16xf32>
    %cst_153 = arith.constant dense<0.000000e+00> : vector<2x16xf32>
    %281 = tpu.matmul %279, %280, %cst_153 {dimension_numbers = #tpu.dot_dimension_numbers<[1], [0], [0], [1], [0, 0, 1, 1], [], []>} : vector<2x64xf32>, vector<64x16xf32>, vector<2x16xf32> -> vector<2x16xf32>
    %282 = arith.addf %278, %281 : vector<2x16xf32>
    %283 = vector.extract_strided_slice %189 {offsets = [12, 0], sizes = [2, 64], strides = [1, 1]} : vector<16x64xf32> to vector<2x64xf32>
    %284 = vector.extract_strided_slice %273 {offsets = [128, 0], sizes = [64, 16], strides = [1, 1]} : vector<256x16xf32> to vector<64x16xf32>
    %cst_154 = arith.constant dense<0.000000e+00> : vector<2x16xf32>
    %285 = tpu.matmul %283, %284, %cst_154 {dimension_numbers = #tpu.dot_dimension_numbers<[1], [0], [0], [1], [0, 0, 1, 1], [], []>} : vector<2x64xf32>, vector<64x16xf32>, vector<2x16xf32> -> vector<2x16xf32>
    %286 = arith.addf %282, %285 : vector<2x16xf32>
    %287 = vector.extract_strided_slice %189 {offsets = [14, 0], sizes = [2, 64], strides = [1, 1]} : vector<16x64xf32> to vector<2x64xf32>
    %288 = vector.extract_strided_slice %273 {offsets = [192, 0], sizes = [64, 16], strides = [1, 1]} : vector<256x16xf32> to vector<64x16xf32>
    %cst_155 = arith.constant dense<0.000000e+00> : vector<2x16xf32>
    %289 = tpu.matmul %287, %288, %cst_155 {dimension_numbers = #tpu.dot_dimension_numbers<[1], [0], [0], [1], [0, 0, 1, 1], [], []>} : vector<2x64xf32>, vector<64x16xf32>, vector<2x16xf32> -> vector<2x16xf32>
    %290 = arith.addf %286, %289 : vector<2x16xf32>
    %c1_156 = arith.constant 1 : index
    %c0_157 = arith.constant 0 : index
    %c0_158 = arith.constant 0 : index
    %291 = vector.load %arg11[%c1_156, %c0_157, %c0_158] : memref<2x1x16xf32, #tpu.memory_space<vmem>>, vector<1x1x16xf32>
    %292 = vector.shape_cast %291 : vector<1x1x16xf32> to vector<1x16xf32>
    %293 = vector.broadcast %292 : vector<1x16xf32> to vector<2x16xf32>
    %294 = arith.addf %290, %293 : vector<2x16xf32>
    %cst_159 = arith.constant dense<0.000000e+00> : vector<2xf32>
    %295 = vector.multi_reduction <add>, %294, %cst_159 [1] : vector<2x16xf32> to vector<2xf32>
    %296 = vector.shape_cast %295 : vector<2xf32> to vector<2x1xf32>
    %cst_160 = arith.constant 1.600000e+01 : f32
    %297 = vector.broadcast %cst_160 : f32 to vector<2x1xf32>
    %298 = arith.divf %296, %297 : vector<2x1xf32>
    %299 = vector.broadcast %298 : vector<2x1xf32> to vector<2x16xf32>
    %300 = arith.subf %294, %299 : vector<2x16xf32>
    %301 = arith.mulf %300, %300 : vector<2x16xf32>
    %cst_161 = arith.constant dense<0.000000e+00> : vector<2xf32>
    %302 = vector.multi_reduction <add>, %301, %cst_161 [1] : vector<2x16xf32> to vector<2xf32>
    %303 = vector.shape_cast %302 : vector<2xf32> to vector<2x1xf32>
    %cst_162 = arith.constant 1.600000e+01 : f32
    %304 = vector.broadcast %cst_162 : f32 to vector<2x1xf32>
    %305 = arith.divf %303, %304 : vector<2x1xf32>
    %306 = vector.broadcast %298 : vector<2x1xf32> to vector<2x16xf32>
    %307 = arith.subf %294, %306 : vector<2x16xf32>
    %cst_163 = arith.constant 9.99999974E-6 : f32
    %308 = vector.broadcast %cst_163 : f32 to vector<2x1xf32>
    %309 = arith.addf %305, %308 : vector<2x1xf32>
    %310 = math.rsqrt %309 : vector<2x1xf32>
    %311 = vector.broadcast %310 : vector<2x1xf32> to vector<2x16xf32>
    %312 = arith.mulf %307, %311 : vector<2x16xf32>
    %c1_164 = arith.constant 1 : index
    %c0_165 = arith.constant 0 : index
    %c0_166 = arith.constant 0 : index
    %313 = vector.load %arg12[%c1_164, %c0_165, %c0_166] : memref<2x1x16xf32, #tpu.memory_space<vmem>>, vector<1x1x16xf32>
    %314 = vector.shape_cast %313 : vector<1x1x16xf32> to vector<1x16xf32>
    %315 = vector.broadcast %314 : vector<1x16xf32> to vector<2x16xf32>
    %316 = arith.mulf %312, %315 : vector<2x16xf32>
    %c1_167 = arith.constant 1 : index
    %c0_168 = arith.constant 0 : index
    %c0_169 = arith.constant 0 : index
    %317 = vector.load %arg13[%c1_167, %c0_168, %c0_169] : memref<2x1x16xf32, #tpu.memory_space<vmem>>, vector<1x1x16xf32>
    %318 = vector.shape_cast %317 : vector<1x1x16xf32> to vector<1x16xf32>
    %319 = vector.broadcast %318 : vector<1x16xf32> to vector<2x16xf32>
    %320 = arith.addf %316, %319 : vector<2x16xf32>
    %cst_170 = arith.constant 5.000000e-01 : f32
    %321 = vector.broadcast %cst_170 : f32 to vector<2x16xf32>
    %322 = arith.mulf %321, %320 : vector<2x16xf32>
    %cst_171 = arith.constant 4.471500e-02 : f32
    %323 = vector.broadcast %cst_171 : f32 to vector<2x16xf32>
    %324 = arith.mulf %323, %320 : vector<2x16xf32>
    %325 = arith.mulf %324, %320 : vector<2x16xf32>
    %326 = arith.mulf %325, %320 : vector<2x16xf32>
    %327 = arith.addf %320, %326 : vector<2x16xf32>
    %cst_172 = arith.constant 0.797884583 : f32
    %328 = vector.broadcast %cst_172 : f32 to vector<2x16xf32>
    %329 = arith.mulf %328, %327 : vector<2x16xf32>
    %330 = math.tanh %329 : vector<2x16xf32>
    %cst_173 = arith.constant 1.000000e+00 : f32
    %331 = vector.broadcast %cst_173 : f32 to vector<2x16xf32>
    %332 = arith.addf %331, %330 : vector<2x16xf32>
    %333 = arith.mulf %322, %332 : vector<2x16xf32>
    %c1_174 = arith.constant 1 : index
    %c0_175 = arith.constant 0 : index
    %c0_176 = arith.constant 0 : index
    %334 = vector.load %arg14[%c1_174, %c0_175, %c0_176] : memref<2x16x8xf32, #tpu.memory_space<vmem>>, vector<1x16x8xf32>
    %335 = vector.shape_cast %334 : vector<1x16x8xf32> to vector<16x8xf32>
    %cst_177 = arith.constant dense<0.000000e+00> : vector<2x8xf32>
    %336 = tpu.matmul %333, %335, %cst_177 {dimension_numbers = #tpu.dot_dimension_numbers<[1], [0], [0], [1], [0, 0, 1, 1], [], []>} : vector<2x16xf32>, vector<16x8xf32>, vector<2x8xf32> -> vector<2x8xf32>
    %c1_178 = arith.constant 1 : index
    %c0_179 = arith.constant 0 : index
    %c0_180 = arith.constant 0 : index
    %337 = vector.load %arg15[%c1_178, %c0_179, %c0_180] : memref<2x1x8xf32, #tpu.memory_space<vmem>>, vector<1x1x8xf32>
    %338 = vector.shape_cast %337 : vector<1x1x8xf32> to vector<1x8xf32>
    %339 = vector.broadcast %338 : vector<1x8xf32> to vector<2x8xf32>
    %340 = arith.addf %336, %339 : vector<2x8xf32>
    %cst_181 = arith.constant 5.000000e-01 : f32
    %341 = vector.broadcast %cst_181 : f32 to vector<2x8xf32>
    %342 = arith.mulf %341, %340 : vector<2x8xf32>
    %cst_182 = arith.constant 4.471500e-02 : f32
    %343 = vector.broadcast %cst_182 : f32 to vector<2x8xf32>
    %344 = arith.mulf %343, %340 : vector<2x8xf32>
    %345 = arith.mulf %344, %340 : vector<2x8xf32>
    %346 = arith.mulf %345, %340 : vector<2x8xf32>
    %347 = arith.addf %340, %346 : vector<2x8xf32>
    %cst_183 = arith.constant 0.797884583 : f32
    %348 = vector.broadcast %cst_183 : f32 to vector<2x8xf32>
    %349 = arith.mulf %348, %347 : vector<2x8xf32>
    %350 = math.tanh %349 : vector<2x8xf32>
    %cst_184 = arith.constant 1.000000e+00 : f32
    %351 = vector.broadcast %cst_184 : f32 to vector<2x8xf32>
    %352 = arith.addf %351, %350 : vector<2x8xf32>
    %353 = arith.mulf %342, %352 : vector<2x8xf32>
    %c0_185 = arith.constant 0 : index
    %c0_186 = arith.constant 0 : index
    %354 = vector.load %arg0[%c0_185, %c0_186] : memref<2x8xf32, #tpu.memory_space<vmem>>, vector<2x8xf32>
    %c0_187 = arith.constant 0 : index
    %c0_188 = arith.constant 0 : index
    %355 = vector.load %arg16[%c0_187, %c0_188] : memref<8x8xf32, #tpu.memory_space<vmem>>, vector<8x8xf32>
    %cst_189 = arith.constant dense<0.000000e+00> : vector<2x8xf32>
    %356 = tpu.matmul %354, %355, %cst_189 {dimension_numbers = #tpu.dot_dimension_numbers<[1], [0], [0], [1], [0, 0, 1, 1], [], []>} : vector<2x8xf32>, vector<8x8xf32>, vector<2x8xf32> -> vector<2x8xf32>
    %c0_190 = arith.constant 0 : index
    %c0_191 = arith.constant 0 : index
    %357 = vector.load %arg17[%c0_190, %c0_191] : memref<1x8xf32, #tpu.memory_space<vmem>>, vector<1x8xf32>
    %358 = vector.broadcast %357 : vector<1x8xf32> to vector<2x8xf32>
    %359 = arith.addf %356, %358 : vector<2x8xf32>
    %cst_192 = arith.constant dense<0.000000e+00> : vector<2xf32>
    %360 = vector.multi_reduction <add>, %359, %cst_192 [1] : vector<2x8xf32> to vector<2xf32>
    %361 = vector.shape_cast %360 : vector<2xf32> to vector<2x1xf32>
    %cst_193 = arith.constant 8.000000e+00 : f32
    %362 = vector.broadcast %cst_193 : f32 to vector<2x1xf32>
    %363 = arith.divf %361, %362 : vector<2x1xf32>
    %364 = vector.broadcast %363 : vector<2x1xf32> to vector<2x8xf32>
    %365 = arith.subf %359, %364 : vector<2x8xf32>
    %366 = arith.mulf %365, %365 : vector<2x8xf32>
    %cst_194 = arith.constant dense<0.000000e+00> : vector<2xf32>
    %367 = vector.multi_reduction <add>, %366, %cst_194 [1] : vector<2x8xf32> to vector<2xf32>
    %368 = vector.shape_cast %367 : vector<2xf32> to vector<2x1xf32>
    %cst_195 = arith.constant 8.000000e+00 : f32
    %369 = vector.broadcast %cst_195 : f32 to vector<2x1xf32>
    %370 = arith.divf %368, %369 : vector<2x1xf32>
    %371 = vector.broadcast %363 : vector<2x1xf32> to vector<2x8xf32>
    %372 = arith.subf %359, %371 : vector<2x8xf32>
    %cst_196 = arith.constant 9.99999974E-6 : f32
    %373 = vector.broadcast %cst_196 : f32 to vector<2x1xf32>
    %374 = arith.addf %370, %373 : vector<2x1xf32>
    %375 = math.rsqrt %374 : vector<2x1xf32>
    %376 = vector.broadcast %375 : vector<2x1xf32> to vector<2x8xf32>
    %377 = arith.mulf %372, %376 : vector<2x8xf32>
    %c0_197 = arith.constant 0 : index
    %c0_198 = arith.constant 0 : index
    %378 = vector.load %arg18[%c0_197, %c0_198] : memref<1x8xf32, #tpu.memory_space<vmem>>, vector<1x8xf32>
    %379 = vector.broadcast %378 : vector<1x8xf32> to vector<2x8xf32>
    %380 = arith.mulf %377, %379 : vector<2x8xf32>
    %c0_199 = arith.constant 0 : index
    %c0_200 = arith.constant 0 : index
    %381 = vector.load %arg19[%c0_199, %c0_200] : memref<1x8xf32, #tpu.memory_space<vmem>>, vector<1x8xf32>
    %382 = vector.broadcast %381 : vector<1x8xf32> to vector<2x8xf32>
    %383 = arith.addf %380, %382 : vector<2x8xf32>
    %cst_201 = arith.constant 5.000000e-01 : f32
    %384 = vector.broadcast %cst_201 : f32 to vector<2x8xf32>
    %385 = arith.mulf %384, %383 : vector<2x8xf32>
    %cst_202 = arith.constant 4.471500e-02 : f32
    %386 = vector.broadcast %cst_202 : f32 to vector<2x8xf32>
    %387 = arith.mulf %386, %383 : vector<2x8xf32>
    %388 = arith.mulf %387, %383 : vector<2x8xf32>
    %389 = arith.mulf %388, %383 : vector<2x8xf32>
    %390 = arith.addf %383, %389 : vector<2x8xf32>
    %cst_203 = arith.constant 0.797884583 : f32
    %391 = vector.broadcast %cst_203 : f32 to vector<2x8xf32>
    %392 = arith.mulf %391, %390 : vector<2x8xf32>
    %393 = math.tanh %392 : vector<2x8xf32>
    %cst_204 = arith.constant 1.000000e+00 : f32
    %394 = vector.broadcast %cst_204 : f32 to vector<2x8xf32>
    %395 = arith.addf %394, %393 : vector<2x8xf32>
    %396 = arith.mulf %385, %395 : vector<2x8xf32>
    %c0_205 = arith.constant 0 : index
    %c0_206 = arith.constant 0 : index
    %397 = vector.load %arg20[%c0_205, %c0_206] : memref<8x8xf32, #tpu.memory_space<vmem>>, vector<8x8xf32>
    %cst_207 = arith.constant dense<0.000000e+00> : vector<2x8xf32>
    %398 = tpu.matmul %396, %397, %cst_207 {dimension_numbers = #tpu.dot_dimension_numbers<[1], [0], [0], [1], [0, 0, 1, 1], [], []>} : vector<2x8xf32>, vector<8x8xf32>, vector<2x8xf32> -> vector<2x8xf32>
    %c0_208 = arith.constant 0 : index
    %c0_209 = arith.constant 0 : index
    %399 = vector.load %arg21[%c0_208, %c0_209] : memref<1x8xf32, #tpu.memory_space<vmem>>, vector<1x8xf32>
    %400 = vector.broadcast %399 : vector<1x8xf32> to vector<2x8xf32>
    %401 = arith.addf %398, %400 : vector<2x8xf32>
    %cst_210 = arith.constant dense<0.000000e+00> : vector<2xf32>
    %402 = vector.multi_reduction <add>, %401, %cst_210 [1] : vector<2x8xf32> to vector<2xf32>
    %403 = vector.shape_cast %402 : vector<2xf32> to vector<2x1xf32>
    %cst_211 = arith.constant 8.000000e+00 : f32
    %404 = vector.broadcast %cst_211 : f32 to vector<2x1xf32>
    %405 = arith.divf %403, %404 : vector<2x1xf32>
    %406 = vector.broadcast %405 : vector<2x1xf32> to vector<2x8xf32>
    %407 = arith.subf %401, %406 : vector<2x8xf32>
    %408 = arith.mulf %407, %407 : vector<2x8xf32>
    %cst_212 = arith.constant dense<0.000000e+00> : vector<2xf32>
    %409 = vector.multi_reduction <add>, %408, %cst_212 [1] : vector<2x8xf32> to vector<2xf32>
    %410 = vector.shape_cast %409 : vector<2xf32> to vector<2x1xf32>
    %cst_213 = arith.constant 8.000000e+00 : f32
    %411 = vector.broadcast %cst_213 : f32 to vector<2x1xf32>
    %412 = arith.divf %410, %411 : vector<2x1xf32>
    %413 = vector.broadcast %405 : vector<2x1xf32> to vector<2x8xf32>
    %414 = arith.subf %401, %413 : vector<2x8xf32>
    %cst_214 = arith.constant 9.99999974E-6 : f32
    %415 = vector.broadcast %cst_214 : f32 to vector<2x1xf32>
    %416 = arith.addf %412, %415 : vector<2x1xf32>
    %417 = math.rsqrt %416 : vector<2x1xf32>
    %418 = vector.broadcast %417 : vector<2x1xf32> to vector<2x8xf32>
    %419 = arith.mulf %414, %418 : vector<2x8xf32>
    %c0_215 = arith.constant 0 : index
    %c0_216 = arith.constant 0 : index
    %420 = vector.load %arg22[%c0_215, %c0_216] : memref<1x8xf32, #tpu.memory_space<vmem>>, vector<1x8xf32>
    %421 = vector.broadcast %420 : vector<1x8xf32> to vector<2x8xf32>
    %422 = arith.mulf %419, %421 : vector<2x8xf32>
    %c0_217 = arith.constant 0 : index
    %c0_218 = arith.constant 0 : index
    %423 = vector.load %arg23[%c0_217, %c0_218] : memref<1x8xf32, #tpu.memory_space<vmem>>, vector<1x8xf32>
    %424 = vector.broadcast %423 : vector<1x8xf32> to vector<2x8xf32>
    %425 = arith.addf %422, %424 : vector<2x8xf32>
    %cst_219 = arith.constant 5.000000e-01 : f32
    %426 = vector.broadcast %cst_219 : f32 to vector<2x8xf32>
    %427 = arith.mulf %426, %425 : vector<2x8xf32>
    %cst_220 = arith.constant 4.471500e-02 : f32
    %428 = vector.broadcast %cst_220 : f32 to vector<2x8xf32>
    %429 = arith.mulf %428, %425 : vector<2x8xf32>
    %430 = arith.mulf %429, %425 : vector<2x8xf32>
    %431 = arith.mulf %430, %425 : vector<2x8xf32>
    %432 = arith.addf %425, %431 : vector<2x8xf32>
    %cst_221 = arith.constant 0.797884583 : f32
    %433 = vector.broadcast %cst_221 : f32 to vector<2x8xf32>
    %434 = arith.mulf %433, %432 : vector<2x8xf32>
    %435 = math.tanh %434 : vector<2x8xf32>
    %cst_222 = arith.constant 1.000000e+00 : f32
    %436 = vector.broadcast %cst_222 : f32 to vector<2x8xf32>
    %437 = arith.addf %436, %435 : vector<2x8xf32>
    %438 = arith.mulf %427, %437 : vector<2x8xf32>
    %c0_223 = arith.constant 0 : index
    %c0_224 = arith.constant 0 : index
    %439 = vector.load %arg24[%c0_223, %c0_224] : memref<8x8xf32, #tpu.memory_space<vmem>>, vector<8x8xf32>
    %cst_225 = arith.constant dense<0.000000e+00> : vector<2x8xf32>
    %440 = tpu.matmul %438, %439, %cst_225 {dimension_numbers = #tpu.dot_dimension_numbers<[1], [0], [0], [1], [0, 0, 1, 1], [], []>} : vector<2x8xf32>, vector<8x8xf32>, vector<2x8xf32> -> vector<2x8xf32>
    %c0_226 = arith.constant 0 : index
    %c0_227 = arith.constant 0 : index
    %441 = vector.load %arg25[%c0_226, %c0_227] : memref<1x8xf32, #tpu.memory_space<vmem>>, vector<1x8xf32>
    %442 = vector.broadcast %441 : vector<1x8xf32> to vector<2x8xf32>
    %443 = arith.addf %440, %442 : vector<2x8xf32>
    %cst_228 = arith.constant 5.000000e-01 : f32
    %444 = vector.broadcast %cst_228 : f32 to vector<2x8xf32>
    %445 = arith.mulf %444, %443 : vector<2x8xf32>
    %cst_229 = arith.constant 4.471500e-02 : f32
    %446 = vector.broadcast %cst_229 : f32 to vector<2x8xf32>
    %447 = arith.mulf %446, %443 : vector<2x8xf32>
    %448 = arith.mulf %447, %443 : vector<2x8xf32>
    %449 = arith.mulf %448, %443 : vector<2x8xf32>
    %450 = arith.addf %443, %449 : vector<2x8xf32>
    %cst_230 = arith.constant 0.797884583 : f32
    %451 = vector.broadcast %cst_230 : f32 to vector<2x8xf32>
    %452 = arith.mulf %451, %450 : vector<2x8xf32>
    %453 = math.tanh %452 : vector<2x8xf32>
    %cst_231 = arith.constant 1.000000e+00 : f32
    %454 = vector.broadcast %cst_231 : f32 to vector<2x8xf32>
    %455 = arith.addf %454, %453 : vector<2x8xf32>
    %456 = arith.mulf %445, %455 : vector<2x8xf32>
    %c0_232 = arith.constant 0 : index
    %c0_233 = arith.constant 0 : index
    %457 = vector.load %arg26[%c0_232, %c0_233] : memref<24x16xf32, #tpu.memory_space<vmem>>, vector<8x16xf32>
    %cst_234 = arith.constant dense<0.000000e+00> : vector<2x16xf32>
    %458 = tpu.matmul %456, %457, %cst_234 {dimension_numbers = #tpu.dot_dimension_numbers<[1], [0], [0], [1], [0, 0, 1, 1], [], []>} : vector<2x8xf32>, vector<8x16xf32>, vector<2x16xf32> -> vector<2x16xf32>
    %c8_235 = arith.constant 8 : index
    %c0_236 = arith.constant 0 : index
    %459 = vector.load %arg26[%c8_235, %c0_236] : memref<24x16xf32, #tpu.memory_space<vmem>>, vector<8x16xf32>
    %cst_237 = arith.constant dense<0.000000e+00> : vector<2x16xf32>
    %460 = tpu.matmul %271, %459, %cst_237 {dimension_numbers = #tpu.dot_dimension_numbers<[1], [0], [0], [1], [0, 0, 1, 1], [], []>} : vector<2x8xf32>, vector<8x16xf32>, vector<2x16xf32> -> vector<2x16xf32>
    %461 = arith.addf %458, %460 : vector<2x16xf32>
    %c16_238 = arith.constant 16 : index
    %c0_239 = arith.constant 0 : index
    %462 = vector.load %arg26[%c16_238, %c0_239] : memref<24x16xf32, #tpu.memory_space<vmem>>, vector<8x16xf32>
    %cst_240 = arith.constant dense<0.000000e+00> : vector<2x16xf32>
    %463 = tpu.matmul %353, %462, %cst_240 {dimension_numbers = #tpu.dot_dimension_numbers<[1], [0], [0], [1], [0, 0, 1, 1], [], []>} : vector<2x8xf32>, vector<8x16xf32>, vector<2x16xf32> -> vector<2x16xf32>
    %464 = arith.addf %461, %463 : vector<2x16xf32>
    %c0_241 = arith.constant 0 : index
    %c0_242 = arith.constant 0 : index
    %465 = vector.load %arg27[%c0_241, %c0_242] : memref<1x16xf32, #tpu.memory_space<vmem>>, vector<1x16xf32>
    %466 = vector.broadcast %465 : vector<1x16xf32> to vector<2x16xf32>
    %467 = arith.addf %464, %466 : vector<2x16xf32>
    %cst_243 = arith.constant 5.000000e-01 : f32
    %468 = vector.broadcast %cst_243 : f32 to vector<2x16xf32>
    %469 = arith.mulf %468, %467 : vector<2x16xf32>
    %cst_244 = arith.constant 4.471500e-02 : f32
    %470 = vector.broadcast %cst_244 : f32 to vector<2x16xf32>
    %471 = arith.mulf %470, %467 : vector<2x16xf32>
    %472 = arith.mulf %471, %467 : vector<2x16xf32>
    %473 = arith.mulf %472, %467 : vector<2x16xf32>
    %474 = arith.addf %467, %473 : vector<2x16xf32>
    %cst_245 = arith.constant 0.797884583 : f32
    %475 = vector.broadcast %cst_245 : f32 to vector<2x16xf32>
    %476 = arith.mulf %475, %474 : vector<2x16xf32>
    %477 = math.tanh %476 : vector<2x16xf32>
    %cst_246 = arith.constant 1.000000e+00 : f32
    %478 = vector.broadcast %cst_246 : f32 to vector<2x16xf32>
    %479 = arith.addf %478, %477 : vector<2x16xf32>
    %480 = arith.mulf %469, %479 : vector<2x16xf32>
    %c0_247 = arith.constant 0 : index
    %c0_248 = arith.constant 0 : index
    %481 = vector.load %arg28[%c0_247, %c0_248] : memref<16x16xf32, #tpu.memory_space<vmem>>, vector<16x16xf32>
    %cst_249 = arith.constant dense<0.000000e+00> : vector<2x16xf32>
    %482 = tpu.matmul %480, %481, %cst_249 {dimension_numbers = #tpu.dot_dimension_numbers<[1], [0], [0], [1], [0, 0, 1, 1], [], []>} : vector<2x16xf32>, vector<16x16xf32>, vector<2x16xf32> -> vector<2x16xf32>
    %c0_250 = arith.constant 0 : index
    %c0_251 = arith.constant 0 : index
    %483 = vector.load %arg29[%c0_250, %c0_251] : memref<1x16xf32, #tpu.memory_space<vmem>>, vector<1x16xf32>
    %484 = vector.broadcast %483 : vector<1x16xf32> to vector<2x16xf32>
    %485 = arith.addf %482, %484 : vector<2x16xf32>
    %cst_252 = arith.constant 5.000000e-01 : f32
    %486 = vector.broadcast %cst_252 : f32 to vector<2x16xf32>
    %487 = arith.mulf %486, %485 : vector<2x16xf32>
    %cst_253 = arith.constant 4.471500e-02 : f32
    %488 = vector.broadcast %cst_253 : f32 to vector<2x16xf32>
    %489 = arith.mulf %488, %485 : vector<2x16xf32>
    %490 = arith.mulf %489, %485 : vector<2x16xf32>
    %491 = arith.mulf %490, %485 : vector<2x16xf32>
    %492 = arith.addf %485, %491 : vector<2x16xf32>
    %cst_254 = arith.constant 0.797884583 : f32
    %493 = vector.broadcast %cst_254 : f32 to vector<2x16xf32>
    %494 = arith.mulf %493, %492 : vector<2x16xf32>
    %495 = math.tanh %494 : vector<2x16xf32>
    %cst_255 = arith.constant 1.000000e+00 : f32
    %496 = vector.broadcast %cst_255 : f32 to vector<2x16xf32>
    %497 = arith.addf %496, %495 : vector<2x16xf32>
    %498 = arith.mulf %487, %497 : vector<2x16xf32>
    %c0_256 = arith.constant 0 : index
    %c0_257 = arith.constant 0 : index
    %499 = vector.load %arg30[%c0_256, %c0_257] : memref<16x4xf32, #tpu.memory_space<vmem>>, vector<16x4xf32>
    %cst_258 = arith.constant dense<0.000000e+00> : vector<2x4xf32>
    %500 = tpu.matmul %498, %499, %cst_258 {dimension_numbers = #tpu.dot_dimension_numbers<[1], [0], [0], [1], [0, 0, 1, 1], [], []>} : vector<2x16xf32>, vector<16x4xf32>, vector<2x4xf32> -> vector<2x4xf32>
    %c0_259 = arith.constant 0 : index
    %c0_260 = arith.constant 0 : index
    %501 = vector.load %arg31[%c0_259, %c0_260] : memref<1x4xf32, #tpu.memory_space<vmem>>, vector<1x4xf32>
    %502 = vector.broadcast %501 : vector<1x4xf32> to vector<2x4xf32>
    %503 = arith.addf %500, %502 : vector<2x4xf32>
    %c0_261 = arith.constant 0 : index
    %c0_262 = arith.constant 0 : index
    %504 = vector.load %arg32[%c0_261, %c0_262] : memref<2x4xf32, #tpu.memory_space<vmem>>, vector<2x4xf32>
    tpu.vector_store %arg32[%c0_261, %c0_262], %503 {strides = array<i32>} : memref<2x4xf32, #tpu.memory_space<vmem>>, vector<2x4xf32>,
    return
  }
}

</mosaic_0001>

<bundles_post_ra>
// kernel: hybrid_forward.1
= control target key start
LH: loop header
LB: loop body
LE: loop exit
PB: predicated region body
PF: predicated region fallthrough
CT: control target
= control target key end

     0   :  { %s3537_s6 = smov 1   ;;  %s3538_s10 = smov 2   ;;  %s4615_s0 = inlined_call_operand.smem [shape: u32[33], index: -1, kind: input, shape index: {}] }
   0x1   :  { %s3621_s5 = sld [smem:[%s4615_s0]]   ;;  %s3539_s14 = smov 3  }
   0x2   :  { %s3626_s9 = sld [smem:[%s4615_s0 + %s3537_s6]]   ;;  %s3540_s18 = smov 4  }
   0x3   :  { %s3631_s13 = sld [smem:[%s4615_s0 + %s3538_s10]]   ;;  %s3541_s22 = smov 5  }
   0x4   :  { %s3636_s17 = sld [smem:[%s4615_s0 + %s3539_s14]]   ;;  %s3542_s26 = smov 6  }
   0x5   :  { %s3641_s21 = sld [smem:[%s4615_s0 + %s3540_s18]]   ;;  %s3543_s30 = smov 7  }
   0x6   :  { %s3646_s25 = sld [smem:[%s4615_s0 + %s3541_s22]]   ;;  %s3544_s4 = smov 8  }
   0x7   :  { %s3651_s29 = sld [smem:[%s4615_s0 + %s3542_s26]]   ;;  %s3545_s10 = smov 9  }
   0x8   :  { %4627 = sst [smem:[#allocation51_spill]] %s3626_s9  ;;  %s3546_s15 = smov 10  }
   0x9   :  { %s3656_s3 = sld [smem:[%s4615_s0 + %s3543_s30]]   ;;  %s3547_s20 = smov 11  }
   0xa   :  { %s3661_s8 = sld [smem:[%s4615_s0 + %s3544_s4]]   ;;  %s3548_s26 = smov 12  }
   0xb   :  { %s3666_s14 = sld [smem:[%s4615_s0 + %s3545_s10]]   ;;  %s3549_s1 = smov 13  }
   0xc   :  { %s3671_s19 = sld [smem:[%s4615_s0 + %s3546_s15]]   ;;  %s3550_s7 = smov 14  }
   0xd   :  { %s3676_s24 = sld [smem:[%s4615_s0 + %s3547_s20]]   ;;  %s3551_s15 = smov 15  }
   0xe   :  { %s3681_s30 = sld [smem:[%s4615_s0 + %s3548_s26]]   ;;  %s3552_s22 = smov 16  }
   0xf   :  { %s3686_s6 = sld [smem:[%s4615_s0 + %s3549_s1]]   ;;  %s3553_s28 = smov 17  }
  0x10   :  { %4628 = sst [smem:[#allocation52_spill]] %s3661_s8 }
  0x11   :  { %s3691_s12 = sld [smem:[%s4615_s0 + %s3550_s7]]   ;;  %s3554_s7 = smov 18  }
  0x12   :  { %4629 = sst [smem:[#allocation53_spill]] %s3671_s19 }
  0x13   :  { %s3696_s20 = sld [smem:[%s4615_s0 + %s3551_s15]]   ;;  %s3555_s15 = smov 19  }
  0x14   :  { %4630 = sst [smem:[#allocation54_spill]] %s3681_s30 }
  0x15   :  { %s3701_s27 = sld [smem:[%s4615_s0 + %s3552_s22]]   ;;  %s3556_s22 = smov 20  }
  0x16   :  { %s3706_s4 = sld [smem:[%s4615_s0 + %s3553_s28]]   ;;  %s3557_s28 = smov 21  }
  0x17   :  { %4631 = sst [smem:[#allocation55_spill]] %s3691_s12 }
  0x18   :  { %s3711_s12 = sld [smem:[%s4615_s0 + %s3554_s7]]   ;;  %s3558_s7 = smov 22  }
  0x19   :  { %4632 = sst [smem:[#allocation56_spill]] %s3696_s20 }
  0x1a   :  { %s3716_s8 = sld [smem:[%s4615_s0 + %s3555_s15]]   ;;  %s3559_s15 = smov 23  }
  0x1b   :  { %s3721_s9 = sld [smem:[%s4615_s0 + %s3556_s22]]   ;;  %s3560_s22 = smov 24  }
  0x1c   :  { %4633 = sst [smem:[#allocation57_spill]] %s3706_s4 }
  0x1d   :  { %s3726_s4 = sld [smem:[%s4615_s0 + %s3557_s28]]   ;;  %s3561_s28 = smov 25  }
  0x1e   :  { %s3731_s20 = sld [smem:[%s4615_s0 + %s3558_s7]]   ;;  %s3562_s7 = smov 26  }
  0x1f   :  { %s3741_s30 = sld [smem:[%s4615_s0 + %s3560_s22]]   ;;  %s3564_s22 = smov 28  }
  0x20   :  { %4634 = sst [smem:[#allocation58_spill]] %s3716_s8 }
  0x21   :  { %s3736_s8 = sld [smem:[%s4615_s0 + %s3559_s15]]   ;;  %s3563_s15 = smov 27  }
  0x22   :  { %s3751_s19 = sld [smem:[%s4615_s0 + %s3562_s7]]   ;;  %s3566_s7 = smov 30  }
  0x23   :  { %4635 = sst [smem:[#allocation59_spill]] %s3726_s4 }
  0x24   :  { %s3746_s4 = sld [smem:[%s4615_s0 + %s3561_s28]]   ;;  %s3565_s28 = smov 29  }
  0x25   :  { %4637 = sst [smem:[#allocation61_spill]] %s3741_s30 }
  0x26   :  { %s3761_s30 = sld [smem:[%s4615_s0 + %s3564_s22]]   ;;  %s3568_s22 = smov 32  }
  0x27   :  { %4636 = sst [smem:[#allocation60_spill]] %s3736_s8 }
  0x28   :  { %4639 = sst [smem:[#allocation63_spill]] %s3751_s19 }
  0x29   :  { %s3756_s8 = sld [smem:[%s4615_s0 + %s3563_s15]]   ;;  %s3567_s15 = smov 31  }
  0x2a   :  { %4638 = sst [smem:[#allocation62_spill]] %s3746_s4 }
  0x2b   :  { %s3766_s4 = sld [smem:[%s4615_s0 + %s3565_s28]]  }
  0x2c   :  { %4641 = sst [smem:[#allocation65_spill]] %s3761_s30 }
  0x2d   :  { %s3771_s19 = sld [smem:[%s4615_s0 + %s3566_s7]]  }
  0x2e   :  { %s3781_s30 = sld [smem:[%s4615_s0 + %s3568_s22]]  }
  0x2f   :  { %4640 = sst [smem:[#allocation64_spill]] %s3756_s8 }
  0x30   :  { %s3776_s8 = sld [smem:[%s4615_s0 + %s3567_s15]]  }
  0x31   :  { %70 = vsyncpa [#allocation3], 0 }
  0x32   :  { %71 = vsyncpa [#allocation6], 0 }
  0x33   :  { %72 = vsyncpa [#allocation9], 0 }
  0x34   :  { %73 = vsyncpa [#allocation12], 0 }
  0x35   :  { %74 = vsyncpa [#allocation15], 0 }
  0x36   :  { %75 = vsyncpa [#allocation18], 0 }
  0x37   :  { %76 = vsyncpa [#allocation21], 0 }
  0x38   :  { %77 = vsyncpa [#allocation24], 0 }
  0x39   :  { %78 = vsyncpa [#allocation27], 0 }
  0x3a   :  { %79 = vsyncpa [#allocation30], 0 }
  0x3b   :  { %80 = vsyncpa [#allocation33], 0 }
  0x3c   :  { %81 = vsyncpa [#allocation36], 0  ;;  %s100_s28 = sshll.u32 %s3631_s13, 4  ;;  %s101_s28 = int_to_ptr.hbm [resolvable:$true] %s100_s28 }
  0x3d   :  { %82 = vsyncpa [#allocation4], 0  ;;  %s3569_s0 = smov [#allocation5]   ;;  %s2959_s2 = sshra.s32 %s101_s28, 4  ;;  %s2960_s2 = int_to_ptr.hbm [resolvable:$true] %s2959_s2 }
  0x3e   :  { %s102_s1 = sshll.u32 %s3569_s0, 4  ;;  %s2961_s7 = scalar_lea.hbm %s2960_s2, 32  ;;  %s103_s1 = int_to_ptr.vmem [resolvable:$true] %s102_s1 }
  0x3f   :  { %p2962_p0 = scmp.ne.s32.totalorder %s2960_s2, %s2961_s7  ;;  %s2963_s10 = scalar_lea.hbm %s3631_s13, 32 }
  0x40   :  { %p2964_p1 = scmp.lt.s32.totalorder %s2960_s2, %s3631_s13  ;;  %p2965_p2 = scmp.lt.s32.totalorder %s2963_s10, %s2961_s7 }
  0x42   :  { %p2966_p3 = por %p2965_p2, %p2964_p1 }
  0x44   :  { %p2967_p4 = pnand %p2966_p3, %p2962_p0 }
  0x46   :  { %2970 = shalt.err (!%p2967_p4)
}
  0x47   :  { %s3570_s11 = smov 256   ;;  %s3571_s15 = smov 16  }
  0x48   :  { %108 = dma.hbm_to_vmem [thread:$0]  %s101_s28, 512, %s103_s1, [#allocation6], %s3570_s11, %s3570_s11, %s3571_s15  }
  0x49   :  { %s126_s16 = sshll.u32 %s3641_s21, 4  ;;  %s3572_s18 = smov [#allocation8]   ;;  %s127_s16 = int_to_ptr.hbm [resolvable:$true] %s126_s16 }
  0x4a   :  { %s128_s22 = sshll.u32 %s3572_s18, 4  ;;  %s152_s23 = sshll.u32 %s3651_s29, 4  ;;  %s129_s22 = int_to_ptr.vmem [resolvable:$true] %s128_s22  ;;  %s3791_s23 = int_to_ptr.hbm [resolvable:$true] %s152_s23 }
  0x4b   :  { %s2983_s13 = sshra.s32 %s127_s16, 4  ;;  %s2987_s0 = scalar_lea.hbm %s3641_s21, 16  ;;  %s2984_s13 = int_to_ptr.hbm [resolvable:$true] %s2983_s13 }
  0x4c   :  { %s2985_s26 = scalar_lea.hbm %s2984_s13, 16  ;;  %p2988_p6 = scmp.lt.s32.totalorder %s2984_s13, %s3641_s21 }
  0x4d   :  { %p2986_p5 = scmp.ne.s32.totalorder %s2984_s13, %s2985_s26  ;;  %p2989_p7 = scmp.lt.s32.totalorder %s2987_s0, %s2985_s26 }
  0x4f   :  { %p2990_p8 = por %p2989_p7, %p2988_p6 }
  0x51   :  { %p2991_p9 = pnand %p2990_p8, %p2986_p5 }
  0x53   :  { %2994 = shalt.err (!%p2991_p9)
}
  0x54   :  { %s3573_s2 = smov 128   ;;  %s3574_s28 = smov 8  }
  0x55   :  { %134 = dma.hbm_to_vmem [thread:$0]  %s127_s16, 256, %s129_s22, [#allocation9], %s3573_s2, %s3573_s2, %s3574_s28  }
  0x56   :  { %s180_s1 = sshll.u32 %s3666_s14, 4  ;;  %s3575_s7 = smov [#allocation11]   ;;  %s3799_s1 = int_to_ptr.hbm [resolvable:$true] %s180_s1 }
  0x57   :  { %s154_s10 = sshll.u32 %s3575_s7, 4  ;;  %s3007_s21 = sshra.s32 %s3791_s23, 4  ;;  %s155_s10 = int_to_ptr.vmem [resolvable:$true] %s154_s10  ;;  %s3008_s21 = int_to_ptr.hbm [resolvable:$true] %s3007_s21 }
  0x58   :  { %s3009_s18 = scalar_lea.hbm %s3008_s21, 32  ;;  %s3011_s13 = scalar_lea.hbm %s3651_s29, 32 }
  0x59   :  { %p3010_p10 = scmp.ne.s32.totalorder %s3008_s21, %s3009_s18  ;;  %p3012_p11 = scmp.lt.s32.totalorder %s3008_s21, %s3651_s29 }
  0x5a   :  { %p3013_p12 = scmp.lt.s32.totalorder %s3011_s13, %s3009_s18 }
  0x5c   :  { %p3014_p13 = por %p3013_p12, %p3012_p11 }
  0x5e   :  { %p3015_p0 = pnand %p3014_p13, %p3010_p10 }
  0x60   :  { %3018 = shalt.err (!%p3015_p0)
}
  0x61   :  { %160 = dma.hbm_to_vmem [thread:$0]  %s3791_s23, 512, %s155_s10, [#allocation12], %s3570_s11, %s3570_s11, %s3571_s15  }
  0x62   :  { %s3576_s16 = smov [#allocation14]   ;;  %s206_s26 = sshll.u32 %s3676_s24, 4  ;;  %s3809_s26 = int_to_ptr.hbm [resolvable:$true] %s206_s26 }
  0x63   :  { %s182_s22 = sshll.u32 %s3576_s16, 4  ;;  %s3031_s29 = sshra.s32 %s3799_s1, 4  ;;  %s183_s22 = int_to_ptr.vmem [resolvable:$true] %s182_s22  ;;  %s3032_s29 = int_to_ptr.hbm [resolvable:$true] %s3031_s29 }
  0x64   :  { %s3033_s0 = scalar_lea.hbm %s3032_s29, 16  ;;  %s3035_s7 = scalar_lea.hbm %s3666_s14, 16 }
  0x65   :  { %p3034_p1 = scmp.ne.s32.totalorder %s3032_s29, %s3033_s0  ;;  %p3036_p2 = scmp.lt.s32.totalorder %s3032_s29, %s3666_s14 }
  0x66   :  { %p3037_p3 = scmp.lt.s32.totalorder %s3035_s7, %s3033_s0 }
  0x68   :  { %p3038_p4 = por %p3037_p3, %p3036_p2 }
  0x6a   :  { %p3039_p5 = pnand %p3038_p4, %p3034_p1 }
  0x6c   :  { %3042 = shalt.err (!%p3039_p5)
}
  0x6d   :  { %188 = dma.hbm_to_vmem [thread:$0]  %s3799_s1, 256, %s183_s22, [#allocation15], %s3573_s2, %s3573_s2, %s3574_s28  }
  0x6e   :  { %s3577_s11 = smov [#allocation17]   ;;  %s232_s10 = sshll.u32 %s3686_s6, 4  ;;  %s3819_s10 = int_to_ptr.hbm [resolvable:$true] %s232_s10 }
  0x6f   :  { %s208_s23 = sshll.u32 %s3577_s11, 4  ;;  %s3055_s14 = sshra.s32 %s3809_s26, 4  ;;  %s209_s23 = int_to_ptr.vmem [resolvable:$true] %s208_s23  ;;  %s3056_s14 = int_to_ptr.hbm [resolvable:$true] %s3055_s14 }
  0x70   :  { %s3057_s21 = scalar_lea.hbm %s3056_s14, 2  ;;  %s3059_s18 = scalar_lea.hbm %s3676_s24, 2 }
  0x71   :  { %p3058_p6 = scmp.ne.s32.totalorder %s3056_s14, %s3057_s21  ;;  %p3060_p7 = scmp.lt.s32.totalorder %s3056_s14, %s3676_s24 }
  0x72   :  { %p3061_p8 = scmp.lt.s32.totalorder %s3059_s18, %s3057_s21 }
  0x74   :  { %p3062_p9 = por %p3061_p8, %p3060_p7 }
  0x76   :  { %p3063_p10 = pnand %p3062_p9, %p3058_p6 }
  0x78   :  { %3066 = shalt.err (!%p3063_p10)
}
  0x79   :  { %s3578_s13 = smov 1   ;;  %s261_s1 = sshll.u32 %s3701_s27, 4  ;;  %s262_s1 = int_to_ptr.hbm [resolvable:$true] %s261_s1 }
  0x7a   :  { %214 = dma.hbm_to_vmem [thread:$0]  %s3809_s26, 32, %s209_s23, [#allocation18], %s3571_s15, %s3571_s15, %s3578_s13  }
  0x7b   :  { %s3579_s16 = smov [#allocation20]   ;;  %s3079_s24 = sshra.s32 %s3819_s10, 4  ;;  %s3080_s24 = int_to_ptr.hbm [resolvable:$true] %s3079_s24 }
  0x7c   :  { %s234_s22 = sshll.u32 %s3579_s16, 4  ;;  %s3081_s29 = scalar_lea.hbm %s3080_s24, 2  ;;  %s235_s22 = int_to_ptr.vmem [resolvable:$true] %s234_s22 }
  0x7d   :  { %p3082_p11 = scmp.ne.s32.totalorder %s3080_s24, %s3081_s29  ;;  %s3083_s0 = scalar_lea.hbm %s3686_s6, 2 }
  0x7e   :  { %p3084_p12 = scmp.lt.s32.totalorder %s3080_s24, %s3686_s6  ;;  %p3085_p13 = scmp.lt.s32.totalorder %s3083_s0, %s3081_s29 }
  0x80   :  { %p3086_p0 = por %p3085_p13, %p3084_p12 }
  0x82   :  { %p3087_p1 = pnand %p3086_p0, %p3082_p11 }
  0x84   :  { %3090 = shalt.err (!%p3087_p1)
}
  0x85   :  { %240 = dma.hbm_to_vmem [thread:$0]  %s3819_s10, 32, %s235_s22, [#allocation21], %s3571_s15, %s3571_s15, %s3578_s13  }
  0x86   :  { %s3580_s26 = smov [#allocation23]   ;;  %s283_s11 = sshll.u32 %s3711_s12, 4  ;;  %s284_s11 = int_to_ptr.hbm [resolvable:$true] %s283_s11 }
  0x87   :  { %s263_s7 = sshll.u32 %s3580_s26, 4  ;;  %s3103_s23 = sshra.s32 %s262_s1, 4  ;;  %s264_s7 = int_to_ptr.vmem [resolvable:$true] %s263_s7  ;;  %s3104_s23 = int_to_ptr.hbm [resolvable:$true] %s3103_s23 }
  0x88   :  { %s3105_s6 = scalar_lea.hbm %s3104_s23, 8  ;;  %s3107_s14 = scalar_lea.hbm %s3701_s27, 8 }
  0x89   :  { %p3106_p2 = scmp.ne.s32.totalorder %s3104_s23, %s3105_s6  ;;  %p3108_p3 = scmp.lt.s32.totalorder %s3104_s23, %s3701_s27 }
  0x8a   :  { %p3109_p4 = scmp.lt.s32.totalorder %s3107_s14, %s3105_s6 }
  0x8c   :  { %p3110_p5 = por %p3109_p4, %p3108_p3 }
  0x8e   :  { %p3111_p6 = pnand %p3110_p5, %p3106_p2 }
  0x90   :  { %3114 = shalt.err (!%p3111_p6)
}
  0x91   :  { %266 = dma.hbm_to_vmem [thread:$0]  %s262_s1, 128, %s264_s7, [#allocation24]  }
  0x92   :  { %s305_s10 = sshll.u32 %s3721_s9, 4  ;;  %s3581_s21 = smov [#allocation26]   ;;  %s306_s10 = int_to_ptr.hbm [resolvable:$true] %s305_s10 }
  0x93   :  { %s285_s18 = sshll.u32 %s3581_s21, 4  ;;  %s3127_s16 = sshra.s32 %s284_s11, 4  ;;  %s286_s18 = int_to_ptr.vmem [resolvable:$true] %s285_s18  ;;  %s3128_s16 = int_to_ptr.hbm [resolvable:$true] %s3127_s16 }
  0x94   :  { %s3129_s22 = scalar_lea.hbm %s3128_s16, 1  ;;  %s3131_s24 = scalar_lea.hbm %s3711_s12, 1 }
  0x95   :  { %p3130_p7 = scmp.ne.s32.totalorder %s3128_s16, %s3129_s22  ;;  %p3132_p8 = scmp.lt.s32.totalorder %s3128_s16, %s3711_s12 }
  0x96   :  { %p3133_p9 = scmp.lt.s32.totalorder %s3131_s24, %s3129_s22 }
  0x98   :  { %p3134_p10 = por %p3133_p9, %p3132_p8 }
  0x9a   :  { %p3135_p11 = pnand %p3134_p10, %p3130_p7 }
  0x9c   :  { %3138 = shalt.err (!%p3135_p11)
}
  0x9d   :  { %288 = dma.hbm_to_vmem [thread:$0]  %s284_s11, 16, %s286_s18, [#allocation27]  }
  0x9e   :  { %s3582_s27 = smov [#allocation29]   ;;  %s327_s29 = sshll.u32 %s3731_s20, 4  ;;  %s328_s29 = int_to_ptr.hbm [resolvable:$true] %s327_s29 }
  0x9f   :  { %s307_s1 = sshll.u32 %s3582_s27, 4  ;;  %s3151_s0 = sshra.s32 %s306_s10, 4  ;;  %s308_s1 = int_to_ptr.vmem [resolvable:$true] %s307_s1  ;;  %s3152_s0 = int_to_ptr.hbm [resolvable:$true] %s3151_s0 }
  0xa0   :  { %s3153_s26 = scalar_lea.hbm %s3152_s0, 8  ;;  %s3155_s7 = scalar_lea.hbm %s3721_s9, 8 }
  0xa1   :  { %p3154_p12 = scmp.ne.s32.totalorder %s3152_s0, %s3153_s26  ;;  %p3156_p13 = scmp.lt.s32.totalorder %s3152_s0, %s3721_s9 }
  0xa2   :  { %p3157_p0 = scmp.lt.s32.totalorder %s3155_s7, %s3153_s26 }
  0xa4   :  { %p3158_p1 = por %p3157_p0, %p3156_p13 }
  0xa6   :  { %p3159_p2 = pnand %p3158_p1, %p3154_p12 }
  0xa8   :  { %3162 = shalt.err (!%p3159_p2)
}
  0xa9   :  { %310 = dma.hbm_to_vmem [thread:$0]  %s306_s10, 128, %s308_s1, [#allocation30]  }
  0xaa   :  { %s88_s12 = sshll.u32 %s3621_s5, 4  ;;  %s3583_s11 = smov [#allocation32]   ;;  %s89_s12 = int_to_ptr.hbm [resolvable:$true] %s88_s12 }
  0xab   :  { %s329_s23 = sshll.u32 %s3583_s11, 4  ;;  %s3175_s6 = sshra.s32 %s328_s29, 4  ;;  %s330_s23 = int_to_ptr.vmem [resolvable:$true] %s329_s23  ;;  %s3176_s6 = int_to_ptr.hbm [resolvable:$true] %s3175_s6 }
  0xac   :  { %s3177_s14 = scalar_lea.hbm %s3176_s6, 1  ;;  %s3179_s21 = scalar_lea.hbm %s3731_s20, 1 }
  0xad   :  { %p3178_p3 = scmp.ne.s32.totalorder %s3176_s6, %s3177_s14  ;;  %p3180_p4 = scmp.lt.s32.totalorder %s3176_s6, %s3731_s20 }
  0xae   :  { %p3181_p5 = scmp.lt.s32.totalorder %s3179_s21, %s3177_s14 }
  0xb0   :  { %p3182_p6 = por %p3181_p5, %p3180_p4 }
  0xb2   :  { %p3183_p7 = pnand %p3182_p6, %p3178_p3 }
  0xb4   :  { %3186 = shalt.err (!%p3183_p7)
}
  0xb5   :  { %332 = dma.hbm_to_vmem [thread:$0]  %s328_s29, 16, %s330_s23, [#allocation33]  }
  0xb6   :  { %s3584_s9 = smov [#allocation2]   ;;  %s113_s18 = sshll.u32 %s3636_s17, 4  ;;  %s3849_s18 = int_to_ptr.hbm [resolvable:$true] %s113_s18 }
  0xb7   :  { %s90_s10 = sshll.u32 %s3584_s9, 4  ;;  %s3199_s16 = sshra.s32 %s89_s12, 4  ;;  %s91_s10 = int_to_ptr.vmem [resolvable:$true] %s90_s10  ;;  %s3200_s16 = int_to_ptr.hbm [resolvable:$true] %s3199_s16 }
  0xb8   :  { %s3201_s22 = scalar_lea.hbm %s3200_s16, 2  ;;  %s3203_s24 = scalar_lea.hbm %s3621_s5, 2 }
  0xb9   :  { %p3202_p8 = scmp.ne.s32.totalorder %s3200_s16, %s3201_s22  ;;  %p3204_p9 = scmp.lt.s32.totalorder %s3200_s16, %s3621_s5 }
  0xba   :  { %p3205_p10 = scmp.lt.s32.totalorder %s3203_s24, %s3201_s22 }
  0xbc   :  { %p3206_p11 = por %p3205_p10, %p3204_p9 }
  0xbe   :  { %p3207_p12 = pnand %p3206_p11, %p3202_p8 }
  0xc0   :  { %3210 = shalt.err (!%p3207_p12)
}
  0xc1   :  { %93 = dma.hbm_to_vmem [thread:$0]  %s89_s12, 32, %s91_s10, [#allocation3]  }
  0xc2   :  { %s139_s20 = sshll.u32 %s3646_s25, 4  ;;  %s3585_s27 = smov [#allocation7]   ;;  %s3854_s20 = int_to_ptr.hbm [resolvable:$true] %s139_s20 }
  0xc3   :  { %s115_s1 = sshll.u32 %s3585_s27, 4  ;;  %s3223_s29 = sshra.s32 %s3849_s18, 4  ;;  %s116_s1 = int_to_ptr.vmem [resolvable:$true] %s115_s1  ;;  %s3224_s29 = int_to_ptr.hbm [resolvable:$true] %s3223_s29 }
  0xc4   :  { %s3225_s0 = scalar_lea.hbm %s3224_s29, 256  ;;  %s3227_s5 = scalar_lea.hbm %s3636_s17, 256 }
  0xc5   :  { %p3226_p13 = scmp.ne.s32.totalorder %s3224_s29, %s3225_s0  ;;  %p3228_p0 = scmp.lt.s32.totalorder %s3224_s29, %s3636_s17 }
  0xc6   :  { %p3229_p1 = scmp.lt.s32.totalorder %s3227_s5, %s3225_s0 }
  0xc8   :  { %p3230_p2 = por %p3229_p1, %p3228_p0 }
  0xca   :  { %p3231_p3 = pnand %p3230_p2, %p3226_p13 }
  0xcc   :  { %3234 = shalt.err (!%p3231_p3)
}
  0xcd   :  { %121 = dma.hbm_to_vmem [thread:$0]  %s3849_s18, 4096, %s116_s1, [#allocation6], %s3573_s2, %s3573_s2, %s3574_s28  }
  0xce   :  { %s3586_s26 = smov [#allocation10]   ;;  %s165_s12 = sshll.u32 %s3656_s3, 4  ;;  %s3864_s12 = int_to_ptr.hbm [resolvable:$true] %s165_s12 }
  0xcf   :  { %s141_s7 = sshll.u32 %s3586_s26, 4  ;;  %s3247_s17 = sshra.s32 %s3854_s20, 4  ;;  %s142_s7 = int_to_ptr.vmem [resolvable:$true] %s141_s7  ;;  %s3248_s17 = int_to_ptr.hbm [resolvable:$true] %s3247_s17 }
  0xd0   :  { %s3249_s11 = scalar_lea.hbm %s3248_s17, 16  ;;  %s3251_s23 = scalar_lea.hbm %s3646_s25, 16 }
  0xd1   :  { %p3250_p4 = scmp.ne.s32.totalorder %s3248_s17, %s3249_s11  ;;  %p3252_p5 = scmp.lt.s32.totalorder %s3248_s17, %s3646_s25 }
  0xd2   :  { %p3253_p6 = scmp.lt.s32.totalorder %s3251_s23, %s3249_s11 }
  0xd4   :  { %p3254_p7 = por %p3253_p6, %p3252_p5 }
  0xd6   :  { %p3255_p8 = pnand %p3254_p7, %p3250_p4 }
  0xd8   :  { %3258 = shalt.err (!%p3255_p8)
}
  0xd9   :  { %s4642_s6 = sld [smem:[#allocation53_spill]]  ;;  %s3587_s21 = smov [#allocation13]  }
  0xda   :  { %147 = dma.hbm_to_vmem [thread:$0]  %s3854_s20, 256, %s142_s7, [#allocation9], %s3573_s2, %s3573_s2, %s3574_s28  }
  0xdb   :  { %s167_s9 = sshll.u32 %s3587_s21, 4  ;;  %s3271_s25 = sshra.s32 %s3864_s12, 4  ;;  %s168_s9 = int_to_ptr.vmem [resolvable:$true] %s167_s9  ;;  %s3272_s25 = int_to_ptr.hbm [resolvable:$true] %s3271_s25 }
  0xdc   :  { %s3273_s10 = scalar_lea.hbm %s3272_s25, 16  ;;  %s3275_s18 = scalar_lea.hbm %s3656_s3, 16 }
  0xdd   :  { %p3274_p9 = scmp.ne.s32.totalorder %s3272_s25, %s3273_s10  ;;  %p3276_p10 = scmp.lt.s32.totalorder %s3272_s25, %s3656_s3 }
  0xde   :  { %p3277_p11 = scmp.lt.s32.totalorder %s3275_s18, %s3273_s10 }
  0xdf   :  { %s193_s14 = sshll.u32 %s4642_s6, 4  ;;  %s3874_s14 = int_to_ptr.hbm [resolvable:$true] %s193_s14 }
  0xe0   :  { %p3278_p12 = por %p3277_p11, %p3276_p10 }
  0xe2   :  { %p3279_p13 = pnand %p3278_p12, %p3274_p9 }
  0xe4   :  { %3282 = shalt.err (!%p3279_p13)
}
  0xe5   :  { %s4643_s16 = sld [smem:[#allocation54_spill]]  ;;  %s3588_s22 = smov [#allocation16]  }
  0xe6   :  { %173 = dma.hbm_to_vmem [thread:$0]  %s3864_s12, 256, %s168_s9, [#allocation12], %s3573_s2, %s3573_s2, %s3574_s28  }
  0xe7   :  { %s195_s24 = sshll.u32 %s3588_s22, 4  ;;  %s3295_s3 = sshra.s32 %s3874_s14, 4  ;;  %s196_s24 = int_to_ptr.vmem [resolvable:$true] %s195_s24  ;;  %s3296_s3 = int_to_ptr.hbm [resolvable:$true] %s3295_s3 }
  0xe8   :  { %s3297_s27 = scalar_lea.hbm %s3296_s3, 512  ;;  %s3299_s1 = scalar_lea.hbm %s4642_s6, 512 }
  0xe9   :  { %p3298_p0 = scmp.ne.s32.totalorder %s3296_s3, %s3297_s27  ;;  %p3300_p1 = scmp.lt.s32.totalorder %s3296_s3, %s4642_s6 }
  0xea   :  { %p3301_p2 = scmp.lt.s32.totalorder %s3299_s1, %s3297_s27 }
  0xeb   :  { %s219_s20 = sshll.u32 %s4643_s16, 4  ;;  %s3884_s20 = int_to_ptr.hbm [resolvable:$true] %s219_s20 }
  0xec   :  { %p3302_p3 = por %p3301_p2, %p3300_p1 }
  0xee   :  { %p3303_p4 = pnand %p3302_p3, %p3298_p0 }
  0xf0   :  { %3306 = shalt.err (!%p3303_p4)
}
  0xf1   :  { %s4644_s29 = sld [smem:[#allocation56_spill]]  ;;  %s3589_s5 = smov [#allocation19]  }
  0xf2   :  { %201 = dma.hbm_to_vmem [thread:$0]  %s3874_s14, 8192, %s196_s24, [#allocation15], %s3573_s2, %s3573_s2, %s3574_s28  }
  0xf3   :  { %s221_s26 = sshll.u32 %s3589_s5, 4  ;;  %s3319_s7 = sshra.s32 %s3884_s20, 4  ;;  %s222_s26 = int_to_ptr.vmem [resolvable:$true] %s221_s26  ;;  %s3320_s7 = int_to_ptr.hbm [resolvable:$true] %s3319_s7 }
  0xf4   :  { %s3321_s12 = scalar_lea.hbm %s3320_s7, 2  ;;  %s3323_s17 = scalar_lea.hbm %s4643_s16, 2 }
  0xf5   :  { %p3322_p5 = scmp.ne.s32.totalorder %s3320_s7, %s3321_s12  ;;  %p3324_p6 = scmp.lt.s32.totalorder %s3320_s7, %s4643_s16 }
  0xf6   :  { %p3325_p7 = scmp.lt.s32.totalorder %s3323_s17, %s3321_s12 }
  0xf7   :  { %s247_s0 = sshll.u32 %s4644_s29, 4  ;;  %s3894_s0 = int_to_ptr.hbm [resolvable:$true] %s247_s0 }
  0xf8   :  { %p3326_p8 = por %p3325_p7, %p3324_p6 }
  0xfa   :  { %p3327_p9 = pnand %p3326_p8, %p3322_p5 }
  0xfc   :  { %3330 = shalt.err (!%p3327_p9)
}
  0xfd   :  { %s4645_s11 = sld [smem:[#allocation57_spill]]  ;;  %s3590_s23 = smov [#allocation22]  }
  0xfe   :  { %227 = dma.hbm_to_vmem [thread:$0]  %s3884_s20, 32, %s222_s26, [#allocation18], %s3571_s15, %s3571_s15, %s3578_s13  }
  0xff   :  { %s249_s6 = sshll.u32 %s3590_s23, 4  ;;  %s3343_s21 = sshra.s32 %s3894_s0, 4  ;;  %s250_s6 = int_to_ptr.vmem [resolvable:$true] %s249_s6  ;;  %s3344_s21 = int_to_ptr.hbm [resolvable:$true] %s3343_s21 }
 0x100   :  { %s3345_s9 = scalar_lea.hbm %s3344_s21, 2  ;;  %s3347_s25 = scalar_lea.hbm %s4644_s29, 2 }
 0x101   :  { %p3346_p10 = scmp.ne.s32.totalorder %s3344_s21, %s3345_s9  ;;  %p3348_p11 = scmp.lt.s32.totalorder %s3344_s21, %s4644_s29 }
 0x102   :  { %p3349_p12 = scmp.lt.s32.totalorder %s3347_s25, %s3345_s9 }
 0x103   :  { %s272_s14 = sshll.u32 %s4645_s11, 4  ;;  %s273_s14 = int_to_ptr.hbm [resolvable:$true] %s272_s14 }
 0x104   :  { %p3350_p13 = por %p3349_p12, %p3348_p11 }
 0x106   :  { %p3351_p0 = pnand %p3350_p13, %p3346_p10 }
 0x108   :  { %3354 = shalt.err (!%p3351_p0)
}
 0x109   :  { %s4646_s10 = sld [smem:[#allocation58_spill]]  ;;  %s3591_s16 = smov [#allocation25]  }
 0x10a   :  { %255 = dma.hbm_to_vmem [thread:$0]  %s3894_s0, 32, %s250_s6, [#allocation21], %s3571_s15, %s3571_s15, %s3578_s13  }
 0x10b   :  { %s274_s22 = sshll.u32 %s3591_s16, 4  ;;  %s3367_s24 = sshra.s32 %s273_s14, 4  ;;  %s275_s22 = int_to_ptr.vmem [resolvable:$true] %s274_s22  ;;  %s3368_s24 = int_to_ptr.hbm [resolvable:$true] %s3367_s24 }
 0x10c   :  { %s3369_s20 = scalar_lea.hbm %s3368_s24, 1  ;;  %s3371_s3 = scalar_lea.hbm %s4645_s11, 1 }
 0x10d   :  { %p3370_p1 = scmp.ne.s32.totalorder %s3368_s24, %s3369_s20  ;;  %p3372_p2 = scmp.lt.s32.totalorder %s3368_s24, %s4645_s11 }
 0x10e   :  { %p3373_p3 = scmp.lt.s32.totalorder %s3371_s3, %s3369_s20 }
 0x10f   :  { %s294_s18 = sshll.u32 %s4646_s10, 4  ;;  %s295_s18 = int_to_ptr.hbm [resolvable:$true] %s294_s18 }
 0x110   :  { %p3374_p4 = por %p3373_p3, %p3372_p2 }
 0x112   :  { %p3375_p5 = pnand %p3374_p4, %p3370_p1 }
 0x114   :  { %3378 = shalt.err (!%p3375_p5)
}
 0x115   :  { %277 = dma.hbm_to_vmem [thread:$0]  %s273_s14, 16, %s275_s22, [#allocation24]  }
 0x116   :  { %s4647_s27 = sld [smem:[#allocation59_spill]]  ;;  %s3592_s1 = smov [#allocation28]  }
 0x117   :  { %s296_s29 = sshll.u32 %s3592_s1, 4  ;;  %s3391_s5 = sshra.s32 %s295_s18, 4  ;;  %s297_s29 = int_to_ptr.vmem [resolvable:$true] %s296_s29  ;;  %s3392_s5 = int_to_ptr.hbm [resolvable:$true] %s3391_s5 }
 0x118   :  { %s3393_s26 = scalar_lea.hbm %s3392_s5, 1  ;;  %s3395_s7 = scalar_lea.hbm %s4646_s10, 1 }
 0x119   :  { %p3394_p6 = scmp.ne.s32.totalorder %s3392_s5, %s3393_s26  ;;  %p3396_p7 = scmp.lt.s32.totalorder %s3392_s5, %s4646_s10 }
 0x11a   :  { %p3397_p8 = scmp.lt.s32.totalorder %s3395_s7, %s3393_s26 }
 0x11c   :  { %s316_s0 = sshll.u32 %s4647_s27, 4  ;;  %p3398_p9 = por %p3397_p8, %p3396_p7  ;;  %s317_s0 = int_to_ptr.hbm [resolvable:$true] %s316_s0 }
 0x11e   :  { %p3399_p10 = pnand %p3398_p9, %p3394_p6 }
 0x120   :  { %3402 = shalt.err (!%p3399_p10)
}
 0x121   :  { %299 = dma.hbm_to_vmem [thread:$0]  %s295_s18, 16, %s297_s29, [#allocation27]  }
 0x122   :  { %s4648_s12 = sld [smem:[#allocation61_spill]]  ;;  %s3593_s11 = smov [#allocation31]  }
 0x123   :  { %s318_s23 = sshll.u32 %s3593_s11, 4  ;;  %s3415_s6 = sshra.s32 %s317_s0, 4  ;;  %s319_s23 = int_to_ptr.vmem [resolvable:$true] %s318_s23  ;;  %s3416_s6 = int_to_ptr.hbm [resolvable:$true] %s3415_s6 }
 0x124   :  { %s3417_s14 = scalar_lea.hbm %s3416_s6, 1  ;;  %s3419_s21 = scalar_lea.hbm %s4647_s27, 1 }
 0x125   :  { %p3418_p11 = scmp.ne.s32.totalorder %s3416_s6, %s3417_s14  ;;  %p3420_p12 = scmp.lt.s32.totalorder %s3416_s6, %s4647_s27 }
 0x126   :  { %p3421_p13 = scmp.lt.s32.totalorder %s3419_s21, %s3417_s14 }
 0x128   :  { %s340_s17 = sshll.u32 %s4648_s12, 4  ;;  %p3422_p0 = por %p3421_p13, %p3420_p12  ;;  %s341_s17 = int_to_ptr.hbm [resolvable:$true] %s340_s17 }
 0x12a   :  { %p3423_p1 = pnand %p3422_p0, %p3418_p11 }
 0x12c   :  { %3426 = shalt.err (!%p3423_p1)
}
 0x12d   :  { %321 = dma.hbm_to_vmem [thread:$0]  %s317_s0, 16, %s319_s23, [#allocation30]  }
 0x12e   :  { %s4649_s9 = sld [smem:[#allocation65_spill]]  ;;  %s3594_s25 = smov [#allocation34]  }
 0x12f   :  { %s342_s10 = sshll.u32 %s3594_s25, 4  ;;  %s3439_s16 = sshra.s32 %s341_s17, 4  ;;  %s343_s10 = int_to_ptr.vmem [resolvable:$true] %s342_s10  ;;  %s3440_s16 = int_to_ptr.hbm [resolvable:$true] %s3439_s16 }
 0x130   :  { %s3441_s22 = scalar_lea.hbm %s3440_s16, 8  ;;  %s3443_s24 = scalar_lea.hbm %s4648_s12, 8 }
 0x131   :  { %p3442_p2 = scmp.ne.s32.totalorder %s3440_s16, %s3441_s22  ;;  %p3444_p3 = scmp.lt.s32.totalorder %s3440_s16, %s4648_s12 }
 0x132   :  { %p3445_p4 = scmp.lt.s32.totalorder %s3443_s24, %s3441_s22 }
 0x134   :  { %s356_s18 = sshll.u32 %s4649_s9, 4  ;;  %p3446_p5 = por %p3445_p4, %p3444_p3  ;;  %s357_s18 = int_to_ptr.hbm [resolvable:$true] %s356_s18 }
 0x136   :  { %p3447_p6 = pnand %p3446_p5, %p3442_p2 }
 0x138   :  { %3450 = shalt.err (!%p3447_p6)
}
 0x139   :  { %345 = dma.hbm_to_vmem [thread:$0]  %s341_s17, 128, %s343_s10, [#allocation33]  }
 0x13a   :  { %s3595_s20 = smov [#allocation35]   ;;  %s3463_s27 = sshra.s32 %s357_s18, 4  ;;  %s3464_s27 = int_to_ptr.hbm [resolvable:$true] %s3463_s27 }
 0x13b   :  { %s358_s3 = sshll.u32 %s3595_s20, 4  ;;  %s3465_s1 = scalar_lea.hbm %s3464_s27, 16  ;;  %s359_s3 = int_to_ptr.vmem [resolvable:$true] %s358_s3 }
 0x13c   :  { %p3466_p7 = scmp.ne.s32.totalorder %s3464_s27, %s3465_s1  ;;  %s3467_s29 = scalar_lea.hbm %s4649_s9, 16 }
 0x13d   :  { %p3468_p8 = scmp.lt.s32.totalorder %s3464_s27, %s4649_s9  ;;  %p3469_p9 = scmp.lt.s32.totalorder %s3467_s29, %s3465_s1 }
 0x13f   :  { %p3470_p10 = por %p3469_p9, %p3468_p8 }
 0x141   :  { %p3471_p11 = pnand %p3470_p10, %p3466_p7 }
 0x143   :  { %3474 = shalt.err (!%p3471_p11)
}
 0x144   :  { %364 = dma.hbm_to_vmem [thread:$0]  %s357_s18, 256, %s359_s3, [#allocation36], %s3573_s2, %s3573_s2, %s3574_s28  }
 0x145   :  { %3511 = dma.done.wait [#allocation3], 32  }
 0x146   :  { %3512 = vsyncadd [#allocation3], 4294967264 }
 0x147   :  { %3513 = dma.done.wait [#allocation6], 4608  }
 0x148   :  { %3514 = vsyncadd [#allocation6], 4294962688 }
 0x149   :  { %3515 = dma.done.wait [#allocation9], 512  }
 0x14a   :  { %3516 = vsyncadd [#allocation9], 4294966784 }
 0x14b   :  { %3517 = dma.done.wait [#allocation12], 768  }
 0x14c   :  { %3518 = vsyncadd [#allocation12], 4294966528 }
 0x14d   :  { %3519 = dma.done.wait [#allocation15], 8448  }
 0x14e   :  { %3520 = vsyncadd [#allocation15], 4294958848 }
 0x14f   :  { %3521 = dma.done.wait [#allocation18], 64  }
 0x150   :  { %3522 = vsyncadd [#allocation18], 4294967232 }
 0x151   :  { %3523 = dma.done.wait [#allocation21], 64  }
 0x152   :  { %3524 = vsyncadd [#allocation21], 4294967232 }
 0x153   :  { %3525 = dma.done.wait [#allocation24], 144  }
 0x154   :  { %3526 = vsyncadd [#allocation24], 4294967152 }
 0x155   :  { %3527 = dma.done.wait [#allocation27], 32  }
 0x156   :  { %3528 = vsyncadd [#allocation27], 4294967264 }
 0x157   :  { %3529 = dma.done.wait [#allocation30], 144  }
 0x158   :  { %3530 = vsyncadd [#allocation30], 4294967152 }
 0x159   :  { %3531 = dma.done.wait [#allocation33], 144  }
 0x15a   :  { %3532 = vsyncadd [#allocation33], 4294967152 }
 0x15b   :  { %3533 = dma.done.wait [#allocation36], 256  }
 0x15c   :  { %3534 = vsyncadd [#allocation36], 4294967040  ;;  %s4650_s2 = sld [smem:[#allocation51_spill]]  ;;  %v3928_v0 = vld [vmem:[#allocation8] sm:$0xff]  ;;  %s3596_s28 = smov 124   ;;  %v3932_v2 = vld [vmem:[#allocation8 + $0x8] sm:$0xff]  ;;  %v470_v26 = vlaneseq }
 0x15d   :  { %644 = vrot.lane.b32.xlu1 %v3928_v0, %s3596_s28  ;;  %646 = vrot.lane.b32.xlu2 %v3932_v2, %s3596_s28  ;;  %s3597_s0 = smov 17   ;;  %s3598_s5 = smov 116   ;;  %v547_v13 = vld [vmem:[#allocation5 + $0x4] ss:$8 sm:$0x3]  ;;  %vm552_vm0 = vcmask 1043456  }
 0x15e   :  { %s3599_s26 = smov 120   ;;  %s3600_s7 = smov 15   ;;  %v3953_v16 = vperm.slane %v547_v13, 1  ;;  %v3956_v17 = vperm.slane %v547_v13, 0  ;;  %v3974_v28 = vand.u32 127, %v470_v26  ;;  %vm648_vm2 = vcmask 31744  }
 0x15f   :  { %s3601_s12 = smov 112   ;;  %s3602_s17 = smov 104   ;;  %v475_v29 = vld [vmem:[#allocation5] ss:$8 sm:$0x3]  ;;  %vm1417_vm10 = vcmask 130048  }
 0x160   :  { %s3603_s11 = smov 127   ;;  %s3604_s23 = smov 113   ;;  %v551_v18 = vrot.slane %v3953_v16, 4  ;;  %vm472_vm1 = vcmp.lt.s32.totalorder %v3974_v28, 17  ;;  %v3977_v31 = vperm.slane %v475_v29, 0  ;;  %v3979_v32 = vperm.slane %v475_v29, 1 }
 0x161   :  { %s3605_s6 = smov 108   ;;  %s3606_s14 = smov 100   ;;  %v496_v41 = vld [vmem:[#allocation5 + $0x1] ss:$8 sm:$0x3]  ;;  %vm492_vm3 = vcmp.lt.s32.totalorder %v3974_v28, 16 }
 0x162   :  { %v459_v1 = vld [vmem:[%s4650_s2] sm:$0xff]  ;;  %v553_v21 = vsel %vm552_vm0, %v3956_v17, %v551_v18  ;;  %s3607_s21 = smov 111   ;;  %s3608_s9 = smov 96   ;;  %v4000_v42 = vperm.slane %v496_v41, 0  ;;  %v4002_v43 = vperm.slane %v496_v41, 1  ;;  %vm513_vm4 = vcmp.lt.s32.totalorder %v3974_v28, 15 }
 0x163   :  { %461 = vst [vmem:[#allocation1] ss:$2 sm:$0xff] %v459_v1  ;;  %v555_v22 = vmul.f32 %v553_v21, %v459_v1  ;;  %v517_v53 = vld [vmem:[#allocation5 + $0x2] ss:$8 sm:$0x3]  ;;  %vm534_vm5 = vcmp.lt.s32.totalorder %v3974_v28, 1 }
 0x164   :  { %v4017_v55 = vperm.slane %v517_v53, 0  ;;  %v4019_v56 = vperm.slane %v517_v53, 1  ;;  %v538_v63 = vld [vmem:[#allocation5 + $0x3] ss:$8 sm:$0x3]  ;;  %vm586_vm6 = vcmp.lt.s32.totalorder %v3974_v28, 113 }
 0x165   :  { %vm565_vm7 = vcmp.lt.s32.totalorder %v3974_v28, 127  ;;  %vm607_vm8 = vcmp.lt.s32.totalorder %v3974_v28, 112  ;;  %vm628_vm9 = vcmp.lt.s32.totalorder %v3974_v28, 111  ;;  %v1799_v28 = vld [vmem:[#allocation7 + $0x68] sm:$0xff]  ;;  %vm1928_vm11 = vcmask 523264   ;;  %s4653_s25 = sld [smem:[#allocation63_spill]] }
 0x166   :  { %vm2026_vm12 = vcmask 123904   ;;  %s4654_s10 = sld [smem:[#allocation60_spill]]  ;;  %s2677_s22 = sshll.u32 %s3781_s30, 4  ;;  %s2678_s22 = int_to_ptr.hbm [resolvable:$true] %s2677_s22 }
 0x167   :  { %s4655_s18 = sld [smem:[#allocation62_spill]]  ;;  %s3499_s24 = sshra.s32 %s2678_s22, 4  ;;  %s3500_s24 = int_to_ptr.hbm [resolvable:$true] %s3499_s24 }
 0x168   :  { %s4656_s16 = sld [smem:[#allocation64_spill]]  ;;  %s3501_s20 = scalar_lea.hbm %s3500_s24, 2 }
 0x169   :  { %p3502_p12 = scmp.ne.s32.totalorder %s3500_s24, %s3501_s20  ;;  %s3503_s3 = scalar_lea.hbm %s3781_s30, 2 }
 0x16a   :  { %v462_v3 = vld.sshfl [vmem:[#allocation1] sm:$0xff pattern:$0x75316420]  ;;  %v463_v4 = vld.sshfl [vmem:[#allocation1 + $0x8] sm:$0xff pattern:$0x75316420]  ;;  %p3504_p13 = scmp.lt.s32.totalorder %s3500_s24, %s3781_s30  ;;  %p3505_p0 = scmp.lt.s32.totalorder %s3503_s3, %s3501_s20 }
 0x16b   :  { %483 = vst [vmem:[#allocation1] ss:$2 sm:$0xff] %v459_v1  ;;  %466 = vrot.lane.b32.xlu1 %v462_v3, %s3597_s0  ;;  %468 = vrot.lane.b32.xlu2 %v463_v4, %s3597_s0  ;;  %v4034_v3 = vperm.slane %v538_v63, 0  ;;  %v4036_v4 = vperm.slane %v538_v63, 1 }
 0x16c   :  { %p3506_p1 = por %p3505_p0, %p3504_p13 }
 0x16e   :  { %p3507_p2 = pnand %p3506_p1, %p3502_p12 }
 0x172   :  { %v484_v5 = vld.sshfl [vmem:[#allocation1] sm:$0xff pattern:$0x75316420]  ;;  %v485_v6 = vld.sshfl [vmem:[#allocation1 + $0x8] sm:$0xff pattern:$0x75316420] }
 0x173   :  { %488 = vrot.lane.b32.xlu0 %v484_v5, %s3571_s15  ;;  %504 = vst [vmem:[#allocation1] ss:$2 sm:$0xff] %v459_v1  ;;  %827 = vrot.lane.b32.xlu1 %v3932_v2, %s3598_s5 }
 0x174   :  { %761 = vrot.lane.b32.xlu2 %v3928_v0, %s3599_s26 }
 0x17a   :  { %v506_v7 = vld.sshfl [vmem:[#allocation1 + $0x8] sm:$0xff pattern:$0x75316420]  ;;  %v505_v8 = vld.sshfl [vmem:[#allocation1] sm:$0xff pattern:$0x75316420] }
 0x17b   :  { %490 = vrot.lane.b32.xlu0 %v485_v6, %s3571_s15  ;;  %511 = vrot.lane.b32.xlu1 %v506_v7, %s3600_s7  ;;  %525 = vst [vmem:[#allocation1] ss:$2 sm:$0xff] %v459_v1 }
 0x17c   :  { %763 = vrot.lane.b32.xlu2 %v3932_v2, %s3599_s26 }
 0x182   :  { %v527_v9 = vld.sshfl [vmem:[#allocation1 + $0x8] sm:$0xff pattern:$0x75316420]  ;;  %v526_v10 = vld.sshfl [vmem:[#allocation1] sm:$0xff pattern:$0x75316420] }
 0x183   :  { %825 = vrot.lane.b32.xlu0 %v3928_v0, %s3598_s5  ;;  %532 = vrot.lane.b32.xlu1 %v527_v9, %s3578_s13  ;;  %556 = vst [vmem:[#allocation1] ss:$2 sm:$0xff] %v459_v1 }
 0x184   :  { %889 = vrot.lane.b32.xlu2 %v3928_v0, %s3601_s12 }
 0x18a   :  { %v558_v11 = vld.sshfl [vmem:[#allocation1 + $0x8] sm:$0xff pattern:$0x75316420]  ;;  %v557_v12 = vld.sshfl [vmem:[#allocation1] sm:$0xff pattern:$0x75316420] }
 0x18b   :  { %509 = vrot.lane.b32.xlu0 %v505_v8, %s3600_s7  ;;  %1023 = vrot.lane.b32.xlu1 %v3928_v0, %s3602_s17  ;;  %577 = vst [vmem:[#allocation1] ss:$2 sm:$0xff] %v459_v1 }
 0x18c   :  { %891 = vrot.lane.b32.xlu2 %v3932_v2, %s3601_s12 }
 0x192   :  { %v578_v14 = vld.sshfl [vmem:[#allocation1] sm:$0xff pattern:$0x75316420]  ;;  %v579_v15 = vld.sshfl [vmem:[#allocation1 + $0x8] sm:$0xff pattern:$0x75316420] }
 0x193   :  { %530 = vrot.lane.b32.xlu0 %v526_v10, %s3578_s13  ;;  %563 = vrot.lane.b32.xlu1 %v558_v11, %s3603_s11  ;;  %598 = vst [vmem:[#allocation1] ss:$2 sm:$0xff] %v459_v1  ;;  %v590_v11 = vld [vmem:[#allocation5 + $0x6] ss:$8 sm:$0x3] }
 0x194   :  { %584 = vrot.lane.b32.xlu2 %v579_v15, %s3604_s23  ;;  %v4055_v13 = vperm.slane %v590_v11, 1 }
 0x19a   :  { %v599_v19 = vld.sshfl [vmem:[#allocation1] sm:$0xff pattern:$0x75316420]  ;;  %v600_v20 = vld.sshfl [vmem:[#allocation1 + $0x8] sm:$0xff pattern:$0x75316420] }
 0x19b   :  { %959 = vrot.lane.b32.xlu0 %v3928_v0, %s3605_s6  ;;  %582 = vrot.lane.b32.xlu1 %v578_v14, %s3604_s23  ;;  %619 = vst [vmem:[#allocation1] ss:$2 sm:$0xff] %v459_v1 }
 0x19c   :  { %603 = vrot.lane.b32.xlu2 %v599_v19, %s3601_s12 }
 0x1a2   :  { %v621_v23 = vld.sshfl [vmem:[#allocation1 + $0x8] sm:$0xff pattern:$0x75316420]  ;;  %v620_v24 = vld.sshfl [vmem:[#allocation1] sm:$0xff pattern:$0x75316420] }
 0x1a3   :  { %561 = vrot.lane.b32.xlu0 %v557_v12, %s3603_s11  ;;  %1025 = vrot.lane.b32.xlu1 %v3932_v2, %s3602_s17  ;;  %894 = vst [vmem:[#allocation1] ss:$2 sm:$0xff] %v555_v22  ;;  %v4053_v12 = vperm.slane %v590_v11, 0 }
 0x1a4   :  { %1087 = vrot.lane.b32.xlu2 %v3928_v0, %s3606_s14 }
 0x1aa   :  { %v896_v1 = vld.sshfl [vmem:[#allocation1 + $0x8] sm:$0xff pattern:$0x75316420] }
 0x1ab   :  { %961 = vrot.lane.b32.xlu0 %v3932_v2, %s3605_s6  ;;  %626 = vrot.lane.b32.xlu1 %v621_v23, %s3607_s21  ;;  %v569_v23 = vld [vmem:[#allocation5 + $0x5] ss:$8 sm:$0x3] }
 0x1ac   :  { %1089 = vrot.lane.b32.xlu2 %v3932_v2, %s3606_s14 }
 0x1b3   :  { %605 = vrot.lane.b32.xlu0 %v600_v20, %s3601_s12  ;;  %1153 = vrot.lane.b32.xlu1 %v3932_v2, %s3608_s9 }
 0x1b7   :  { %v647_v25 = vpop.permute.xlu2 %646 }
 0x1bb   :  { %624 = vrot.lane.b32.xlu0 %v620_v24, %s3607_s21  ;;  %v4072_v24 = vperm.slane %v569_v23, 0 }
 0x1c3   :  { %1151 = vrot.lane.b32.xlu0 %v3928_v0, %s3608_s9 }
 0x1c5   :  { %v469_v30 = vpop.permute.xlu2 %468 }
 0x1ce   :  { %v762_v38 = vpop.permute.xlu2 %761 }
 0x1cf   :  { %v645_v27 = vpop.permute.xlu1 %644 }
 0x1d6   :  { %v764_v48 = vpop.permute.xlu2 %763 }
 0x1dd   :  { %v467_v33 = vpop.permute.xlu1 %466 }
 0x1de   :  { %v473_v34 = vsel %vm472_vm1, %v467_v33, %v469_v30  ;;  %v474_v35 = vsel %vm472_vm1, %v469_v30, %v467_v33  ;;  %v890_v54 = vpop.permute.xlu2 %889 }
 0x1df   :  { %v481_v36 = vmul.f32 %v3977_v31, %v474_v35  ;;  %v482_v37 = vmul.f32 %v3979_v32, %v473_v34 }
 0x1e1   :  { %2736 = vmatpush.msk.msra.mxu2 %vm552_vm0, %v481_v36  ;;  %2739 = vmatpush.msk.msra.mxu3 %vm552_vm0, %v482_v37  ;;  %v1215_v36 = vld [vmem:[#allocation10] sm:$0xff]  ;;  %v1216_v37 = vld [vmem:[#allocation10 + $0x8] sm:$0xff] }
 0x1e2   :  { %2737 = vmatmul.msk.f32.vlgmr.msra.gmra.mxu2 %vm648_vm2, %v3928_v0  ;;  %2740 = vmatmul.msk.f32.vlgmr.msra.gmra.mxu3 %vm648_vm2, %v3928_v0  ;;  %v895_v0 = vld.sshfl [vmem:[#allocation1] sm:$0xff pattern:$0x75316420] }
 0x1e5   :  { %v489_v39 = vpop.permute.xlu0 %488  ;;  %v3993_v40 = vpop.permute.xlu1 %827 }
 0x1ea   :  { %2738 = vmatmul.msk.f32.gmra.mxu2 %vm648_vm2, %v3932_v2  ;;  %2741 = vmatmul.msk.f32.gmra.mxu3 %vm648_vm2, %v3932_v2  ;;  %v892_v2 = vpop.permute.xlu2 %891 }
 0x1ed   :  { %v491_v44 = vpop.permute.xlu0 %490  ;;  %v512_v45 = vpop.permute.xlu1 %511 }
 0x1ee   :  { %v493_v46 = vsel %vm492_vm3, %v489_v39, %v491_v44  ;;  %v494_v47 = vsel %vm492_vm3, %v491_v44, %v489_v39  ;;  %v611_v39 = vld [vmem:[#allocation5 + $0x7] ss:$8 sm:$0x3] }
 0x1ef   :  { %v502_v49 = vmul.f32 %v4000_v42, %v494_v47  ;;  %v503_v50 = vmul.f32 %v4002_v43, %v493_v46  ;;  %v4095_v41 = vperm.slane %v611_v39, 0  ;;  %v4097_v44 = vperm.slane %v611_v39, 1 }
 0x1f1   :  { %2730 = vmatpush.msk.msra.mxu0 %vm552_vm0, %v502_v49  ;;  %2733 = vmatpush.msk.msra.mxu1 %vm552_vm0, %v503_v50 }
 0x1f2   :  { %2731 = vmatmul.msk.f32.vlgmr.msra.gmra.mxu0 %vm648_vm2, %v645_v27  ;;  %2734 = vmatmul.msk.f32.vlgmr.msra.gmra.mxu1 %vm648_vm2, %v645_v27  ;;  %v585_v14 = vpop.permute.xlu2 %584 }
 0x1f5   :  { %v826_v51 = vpop.permute.xlu0 %825  ;;  %v533_v52 = vpop.permute.xlu1 %532 }
 0x1fa   :  { %2732 = vmatmul.msk.f32.gmra.mxu0 %vm648_vm2, %v647_v25  ;;  %2735 = vmatmul.msk.f32.gmra.mxu1 %vm648_vm2, %v647_v25  ;;  %v4074_v25 = vperm.slane %v569_v23, 1  ;;  %v604_v34 = vpop.permute.xlu2 %603 }
 0x1fd   :  { %v510_v57 = vpop.permute.xlu0 %509  ;;  %v4021_v58 = vpop.permute.xlu1 %1023 }
 0x1fe   :  { %v514_v59 = vsel %vm513_vm4, %v510_v57, %v512_v45  ;;  %v515_v60 = vsel %vm513_vm4, %v512_v45, %v510_v57 }
 0x1ff   :  { %v523_v61 = vmul.f32 %v4017_v55, %v515_v60  ;;  %v524_v62 = vmul.f32 %v4019_v56, %v514_v59 }
 0x201   :  { %2742 = vmatpush.msk.msrb.mxu0 %vm552_vm0, %v523_v61  ;;  %2745 = vmatpush.msk.msrb.mxu1 %vm552_vm0, %v524_v62 }
 0x202   :  { %2743 = vmatmul.msk.f32.vlgmr.msrb.gmra.mxu0 %vm648_vm2, %v762_v38  ;;  %2746 = vmatmul.msk.f32.vlgmr.msrb.gmra.mxu1 %vm648_vm2, %v762_v38  ;;  %v3609_v38 = vmov 0  }
 0x203   :  { %2754 = vmatpush.msk.msra.mxu0 %vm552_vm0, %v895_v0  ;;  %2757 = vmatpush.msk.msra.mxu1 %vm552_vm0, %v896_v1 }
 0x204   :  { %2889 = vset.pattern.permute.xlu0 %v3609_v38  ;;  %2888 = vset.pattern.permute.xlu2 %v3609_v38 }
 0x205   :  { %v531_v5 = vpop.permute.xlu0 %530  ;;  %v564_v6 = vpop.permute.xlu1 %563  ;;  %1219 = vperm.xlu0 %2889, %v1215_v36   ;;  %1224 = vperm.xlu2 %2888, %v1216_v37  }
 0x206   :  { %v535_v7 = vsel %vm534_vm5, %v531_v5, %v533_v52  ;;  %v536_v8 = vsel %vm534_vm5, %v533_v52, %v531_v5  ;;  %2890 = vset.pattern.permute.xlu1 %v3609_v38 }
 0x207   :  { %v544_v9 = vmul.f32 %v4034_v3, %v536_v8  ;;  %v545_v10 = vmul.f32 %v4036_v4, %v535_v7 }
 0x209   :  { %2748 = vmatpush.msk.msrb.mxu2 %vm552_vm0, %v544_v9  ;;  %2751 = vmatpush.msk.msrb.mxu3 %vm552_vm0, %v545_v10 }
 0x20a   :  { %2744 = vmatmul.msk.f32.gmra.mxu0 %vm648_vm2, %v764_v48  ;;  %2747 = vmatmul.msk.f32.gmra.mxu1 %vm648_vm2, %v764_v48  ;;  %v1088_v48 = vpop.permute.xlu2 %1087 }
 0x20b   :  { %2749 = vmatmul.msk.f32.vlgmr.msrb.gmra.mxu2 %vm648_vm2, %v826_v51  ;;  %2752 = vmatmul.msk.f32.vlgmr.msrb.gmra.mxu3 %vm648_vm2, %v826_v51  ;;  %v632_v51 = vld [vmem:[#allocation5 + $0x10] ss:$8 sm:$0x3] }
 0x20c   :  { %v4112_v53 = vperm.slane %v632_v51, 0 }
 0x20d   :  { %v960_v15 = vpop.permute.xlu0 %959  ;;  %v583_v18 = vpop.permute.xlu1 %582 }
 0x20e   :  { %v587_v19 = vsel %vm586_vm6, %v583_v18, %v585_v14  ;;  %v588_v20 = vsel %vm586_vm6, %v585_v14, %v583_v18 }
 0x20f   :  { %v596_v21 = vmul.f32 %v4053_v12, %v587_v19  ;;  %v597_v22 = vmul.f32 %v4055_v13, %v588_v20 }
 0x211   :  { %2766 = vmatpush.msk.msrb.mxu0 %vm552_vm0, %v596_v21  ;;  %2769 = vmatpush.msk.msrb.mxu1 %vm552_vm0, %v597_v22 }
 0x212   :  { %2755 = vmatmul.msk.f32.vlgmr.msra.gmra.mxu0 %vm648_vm2, %v890_v54  ;;  %2758 = vmatmul.msk.f32.vlgmr.msra.gmra.mxu1 %vm648_vm2, %v890_v54  ;;  %v4114_v54 = vperm.slane %v632_v51, 1  ;;  %v1090_v62 = vpop.permute.xlu2 %1089 }
 0x213   :  { %2750 = vmatmul.msk.f32.gmra.mxu2 %vm648_vm2, %v3993_v40  ;;  %2753 = vmatmul.msk.f32.gmra.mxu3 %vm648_vm2, %v3993_v40 }
 0x215   :  { %v562_v26 = vpop.permute.xlu0 %561  ;;  %v1026_v40 = vpop.permute.xlu1 %1025 }
 0x216   :  { %v566_v27 = vsel %vm565_vm7, %v562_v26, %v564_v6  ;;  %v567_v29 = vsel %vm565_vm7, %v564_v6, %v562_v26 }
 0x217   :  { %v575_v30 = vmul.f32 %v4072_v24, %v566_v27  ;;  %v576_v33 = vmul.f32 %v4074_v25, %v567_v29 }
 0x219   :  { %2760 = vmatpush.msk.msra.mxu2 %vm552_vm0, %v575_v30  ;;  %2763 = vmatpush.msk.msra.mxu3 %vm552_vm0, %v576_v33 }
 0x21a   :  { %2756 = vmatmul.msk.f32.gmra.mxu0 %vm648_vm2, %v892_v2  ;;  %2759 = vmatmul.msk.f32.gmra.mxu1 %vm648_vm2, %v892_v2 }
 0x21b   :  { %2761 = vmatmul.msk.f32.vlgmr.msra.gmra.mxu2 %vm648_vm2, %v960_v15  ;;  %2764 = vmatmul.msk.f32.vlgmr.msra.gmra.mxu3 %vm648_vm2, %v960_v15 }
 0x21d   :  { %v962_v35 = vpop.permute.xlu0 %961  ;;  %v627_v52 = vpop.permute.xlu1 %626 }
 0x222   :  { %2767 = vmatmul.msk.f32.vlgmr.msrb.gmra.mxu0 %vm648_vm2, %v4021_v58  ;;  %2770 = vmatmul.msk.f32.vlgmr.msrb.gmra.mxu1 %vm648_vm2, %v4021_v58 }
 0x223   :  { %2762 = vmatmul.msk.f32.gmra.mxu2 %vm648_vm2, %v962_v35  ;;  %2765 = vmatmul.msk.f32.gmra.mxu3 %vm648_vm2, %v962_v35 }
 0x225   :  { %v606_v45 = vpop.permute.xlu0 %605  ;;  %v1154_v0 = vpop.permute.xlu1 %1153 }
 0x226   :  { %v608_v46 = vsel %vm607_vm8, %v604_v34, %v606_v45  ;;  %v609_v47 = vsel %vm607_vm8, %v606_v45, %v604_v34 }
 0x227   :  { %v617_v49 = vmul.f32 %v4095_v41, %v608_v46  ;;  %v618_v50 = vmul.f32 %v4097_v44, %v609_v47 }
 0x229   :  { %2772 = vmatpush.msk.msrb.mxu2 %vm552_vm0, %v617_v49  ;;  %2775 = vmatpush.msk.msrb.mxu3 %vm552_vm0, %v618_v50 }
 0x22a   :  { %2768 = vmatmul.msk.f32.gmra.mxu0 %vm648_vm2, %v1026_v40  ;;  %2771 = vmatmul.msk.f32.gmra.mxu1 %vm648_vm2, %v1026_v40 }
 0x22b   :  { %2773 = vmatmul.msk.f32.vlgmr.msrb.gmra.mxu2 %vm648_vm2, %v1088_v48  ;;  %2776 = vmatmul.msk.f32.vlgmr.msrb.gmra.mxu3 %vm648_vm2, %v1088_v48 }
 0x22d   :  { %v625_v57 = vpop.permute.xlu0 %624 }
 0x22e   :  { %v629_v58 = vsel %vm628_vm9, %v625_v57, %v627_v52  ;;  %v630_v59 = vsel %vm628_vm9, %v627_v52, %v625_v57 }
 0x22f   :  { %v638_v60 = vmul.f32 %v4112_v53, %v629_v58  ;;  %v639_v61 = vmul.f32 %v4114_v54, %v630_v59 }
 0x231   :  { %2778 = vmatpush.msk.msra.mxu0 %vm552_vm0, %v638_v60  ;;  %2781 = vmatpush.msk.msra.mxu1 %vm552_vm0, %v639_v61 }
 0x233   :  { %2774 = vmatmul.msk.f32.gmra.mxu2 %vm648_vm2, %v1090_v62  ;;  %2777 = vmatmul.msk.f32.gmra.mxu3 %vm648_vm2, %v1090_v62 }
 0x235   :  { %v1152_v63 = vpop.permute.xlu0 %1151 }
 0x236   :  { %2779 = vmatmul.msk.f32.vlgmr.msra.gmra.mxu0 %vm648_vm2, %v1152_v63  ;;  %2782 = vmatmul.msk.f32.vlgmr.msra.gmra.mxu1 %vm648_vm2, %v1152_v63 }
 0x23e   :  { %2780 = vmatmul.msk.f32.gmra.mxu0 %vm648_vm2, %v1154_v0  ;;  %2783 = vmatmul.msk.f32.gmra.mxu1 %vm648_vm2, %v1154_v0  ;;  %vm2359_vm2 = vcmask 58368  }
 0x265   :  { %v755_v1 = vpop.f32.mrf.mxu3  ;;  %v732_v10 = vpop.f32.mrf.mxu2 }
 0x26d   :  { %v758_v6 = vpop.f32.mrf.mxu3  ;;  %v735_v15 = vpop.f32.mrf.mxu2 }
 0x26f   :  { %v676_v2 = vpop.f32.mrf.mxu0  ;;  %v699_v5 = vpop.f32.mrf.mxu1 }
 0x270   :  { %v733_v38 = vadd.f32 %v732_v10, %v676_v2  ;;  %v756_v39 = vadd.f32 %v755_v1, %v699_v5 }
 0x277   :  { %v679_v7 = vpop.f32.mrf.mxu0  ;;  %v702_v8 = vpop.f32.mrf.mxu1 }
 0x278   :  { %v759_v9 = vadd.f32 %v758_v6, %v702_v8  ;;  %v736_v0 = vadd.f32 %v735_v15, %v679_v7  ;;  %v1220_v1 = vpop.permute.xlu0 %1219 }
 0x27f   :  { %v792_v11 = vpop.f32.mrf.mxu0  ;;  %v815_v14 = vpop.f32.mrf.mxu1 }
 0x280   :  { %v821_v40 = vadd.f32 %v792_v11, %v733_v38  ;;  %v822_v45 = vadd.f32 %v815_v14, %v756_v39 }
 0x287   :  { %v795_v18 = vpop.f32.mrf.mxu0  ;;  %v818_v19 = vpop.f32.mrf.mxu1 }
 0x288   :  { %v824_v20 = vadd.f32 %v818_v19, %v759_v9  ;;  %v823_v5 = vadd.f32 %v795_v18, %v736_v0 }
 0x28e   :  { %v856_v21 = vpop.f32.mrf.mxu2  ;;  %v879_v22 = vpop.f32.mrf.mxu3 }
 0x28f   :  { %v922_v23 = vpop.f32.mrf.mxu0  ;;  %v945_v26 = vpop.f32.mrf.mxu1  ;;  %v885_v46 = vadd.f32 %v856_v21, %v821_v40  ;;  %v886_v47 = vadd.f32 %v879_v22, %v822_v45 }
 0x291   :  { %v951_v50 = vadd.f32 %v922_v23, %v885_v46  ;;  %v952_v51 = vadd.f32 %v945_v26, %v886_v47 }
 0x296   :  { %v859_v27 = vpop.f32.mrf.mxu2  ;;  %v882_v29 = vpop.f32.mrf.mxu3 }
 0x297   :  { %v925_v30 = vpop.f32.mrf.mxu0  ;;  %v948_v33 = vpop.f32.mrf.mxu1  ;;  %v887_v14 = vadd.f32 %v859_v27, %v823_v5  ;;  %v888_v7 = vadd.f32 %v882_v29, %v824_v20 }
 0x299   :  { %v953_v26 = vadd.f32 %v925_v30, %v887_v14  ;;  %v1225_v30 = vpop.permute.xlu2 %1224 }
 0x29e   :  { %v990_v34 = vpop.f32.mrf.mxu2  ;;  %v1013_v35 = vpop.f32.mrf.mxu3 }
 0x29f   :  { %v1054_v36 = vpop.f32.mrf.mxu0  ;;  %v1077_v37 = vpop.f32.mrf.mxu1  ;;  %v1019_v58 = vadd.f32 %v990_v34, %v951_v50  ;;  %v1020_v59 = vadd.f32 %v1013_v35, %v952_v51  ;;  %v954_v50 = vadd.f32 %v948_v33, %v888_v7 }
 0x2a1   :  { %v1083_v62 = vadd.f32 %v1054_v36, %v1019_v58  ;;  %v1084_v63 = vadd.f32 %v1077_v37, %v1020_v59 }
 0x2a6   :  { %v993_v48 = vpop.f32.mrf.mxu2  ;;  %v1016_v49 = vpop.f32.mrf.mxu3 }
 0x2a7   :  { %v1057_v52 = vpop.f32.mrf.mxu0  ;;  %v1080_v57 = vpop.f32.mrf.mxu1  ;;  %v1021_v38 = vadd.f32 %v993_v48, %v953_v26  ;;  %v1022_v51 = vadd.f32 %v1016_v49, %v954_v50 }
 0x2a9   :  { %v1085_v18 = vadd.f32 %v1057_v52, %v1021_v38 }
 0x2ae   :  { %v1118_v60 = vpop.f32.mrf.mxu2  ;;  %v1141_v61 = vpop.f32.mrf.mxu3 }
 0x2af   :  { %v1147_v6 = vadd.f32 %v1118_v60, %v1083_v62  ;;  %v1148_v2 = vadd.f32 %v1141_v61, %v1084_v63  ;;  %v1086_v60 = vadd.f32 %v1080_v57, %v1022_v51 }
 0x2b3   :  { %v1182_v8 = vpop.f32.mrf.mxu0  ;;  %v1205_v9 = vpop.f32.mrf.mxu1 }
 0x2b4   :  { %v1211_v10 = vadd.f32 %v1182_v8, %v1147_v6  ;;  %v1212_v11 = vadd.f32 %v1205_v9, %v1148_v2 }
 0x2b6   :  { %v1227_v19 = vadd.f32 %v1220_v1, %v1211_v10  ;;  %v1228_v21 = vadd.f32 %v1220_v1, %v1212_v11  ;;  %v1121_v15 = vpop.f32.mrf.mxu2  ;;  %v1144_v59 = vpop.f32.mrf.mxu3 }
 0x2b7   :  { %v1149_v27 = vadd.f32 %v1121_v15, %v1085_v18  ;;  %v1150_v29 = vadd.f32 %v1144_v59, %v1086_v60  ;;  %v1405_v15 = vld [vmem:[#allocation13] sm:$0xff] }
 0x2b8   :  { %v1235_v22 = vmul.f32 0.044715, %v1227_v19  ;;  %v1236_v23 = vmul.f32 0.044715, %v1228_v21  ;;  %v1231_v63 = vmul.f32 0.5, %v1227_v19  ;;  %v1232_v52 = vmul.f32 0.5, %v1228_v21 }
 0x2ba   :  { %v1239_v34 = vmul.f32 %v1235_v22, %v1227_v19  ;;  %v1240_v35 = vmul.f32 %v1236_v23, %v1228_v21 }
 0x2bb   :  { %v1185_v47 = vpop.f32.mrf.mxu0  ;;  %v1208_v62 = vpop.f32.mrf.mxu1 }
 0x2bc   :  { %v1243_v36 = vmul.f32 %v1239_v34, %v1227_v19  ;;  %v1244_v37 = vmul.f32 %v1240_v35, %v1228_v21  ;;  %v1213_v58 = vadd.f32 %v1185_v47, %v1149_v27  ;;  %v1214_v33 = vadd.f32 %v1208_v62, %v1150_v29 }
 0x2be   :  { %v1247_v39 = vadd.f32 %v1243_v36, %v1227_v19  ;;  %v1248_v40 = vadd.f32 %v1244_v37, %v1228_v21  ;;  %v1229_v48 = vadd.f32 %v1225_v30, %v1213_v58  ;;  %v1230_v49 = vadd.f32 %v1225_v30, %v1214_v33 }
 0x2c0   :  { %v1251_v45 = vmul.f32 0.7978846, %v1247_v39  ;;  %v1252_v46 = vmul.f32 0.7978846, %v1248_v40  ;;  %v1237_v1 = vmul.f32 0.044715, %v1229_v48 }
 0x2c1   :  { %v1238_v8 = vmul.f32 0.044715, %v1230_v49  ;;  %v1233_v34 = vmul.f32 0.5, %v1229_v48  ;;  %v1234_v37 = vmul.f32 0.5, %v1230_v49 }
 0x2c2   :  { %2909 = vtanh.f32 %v1251_v45  ;;  %v1241_v57 = vmul.f32 %v1237_v1, %v1229_v48 }
 0x2c3   :  { %2911 = vtanh.f32 %v1252_v46  ;;  %v1242_v10 = vmul.f32 %v1238_v8, %v1230_v49 }
 0x2c4   :  { %v1245_v9 = vmul.f32 %v1241_v57, %v1229_v48 }
 0x2c5   :  { %v1246_v14 = vmul.f32 %v1242_v10, %v1230_v49 }
 0x2c6   :  { %v1249_v11 = vadd.f32 %v1245_v9, %v1229_v48 }
 0x2c7   :  { %v1250_v21 = vadd.f32 %v1246_v14, %v1230_v49 }
 0x2c8   :  { %v2910_v61 = vpop.eup %2909  ;;  %v1253_v19 = vmul.f32 0.7978846, %v1249_v11 }
 0x2c9   :  { %v2912_v20 = vpop.eup %2911  ;;  %v1259_v0 = vadd.f32 1.0, %v2910_v61  ;;  %v1254_v22 = vmul.f32 0.7978846, %v1250_v21 }
 0x2ca   :  { %v1260_v6 = vadd.f32 1.0, %v2912_v20  ;;  %2913 = vtanh.f32 %v1253_v19 }
 0x2cb   :  { %v4130_v2 = vmul.f32 %v1259_v0, %v1231_v63  ;;  %2915 = vtanh.f32 %v1254_v22 }
 0x2cc   :  { %v4132_v5 = vmul.f32 %v1260_v6, %v1232_v52 }
 0x2cd   :  { %1369 = vrot.lane.b32.xlu1 %v4130_v2, %s3601_s12 }
 0x2ce   :  { %1357 = vrot.lane.b32.xlu0 %v4132_v5, %s3604_s23  ;;  %1373 = vrot.lane.b32.xlu2 %v4132_v5, %s3601_s12 }
 0x2d0   :  { %v2914_v23 = vpop.eup %2913 }
 0x2d1   :  { %v1261_v26 = vadd.f32 1.0, %v2914_v23  ;;  %v2916_v38 = vpop.eup %2915 }
 0x2d2   :  { %v1262_v36 = vadd.f32 1.0, %v2916_v38 }
 0x2d3   :  { %v4158_v35 = vmul.f32 %v1261_v26, %v1233_v34 }
 0x2d4   :  { %v4166_v7 = vmul.f32 %v1262_v36, %v1234_v37 }
 0x2d5   :  { %1341 = vrot.lane.b32.xlu1 %v4132_v5, %s3603_s11 }
 0x2d6   :  { %1337 = vrot.lane.b32.xlu0 %v4130_v2, %s3603_s11  ;;  %1353 = vrot.lane.b32.xlu2 %v4130_v2, %s3604_s23 }
 0x2dd   :  { %1315 = vrot.lane.b32.xlu1 %v4130_v2, %s3578_s13 }
 0x2de   :  { %1303 = vrot.lane.b32.xlu0 %v4132_v5, %s3600_s7  ;;  %1319 = vrot.lane.b32.xlu2 %v4132_v5, %s3578_s13 }
 0x2e5   :  { %1287 = vrot.lane.b32.xlu1 %v4132_v5, %s3571_s15 }
 0x2e6   :  { %1283 = vrot.lane.b32.xlu0 %v4130_v2, %s3571_s15  ;;  %1299 = vrot.lane.b32.xlu2 %v4130_v2, %s3600_s7 }
 0x2ed   :  { %1267 = vrot.lane.b32.xlu1 %v4130_v2, %s3597_s0 }
 0x2ee   :  { %1271 = vrot.lane.b32.xlu2 %v4132_v5, %s3597_s0  ;;  %1355 = vrot.lane.b32.xlu0 %v4158_v35, %s3604_s23 }
 0x2f5   :  { %1371 = vrot.lane.b32.xlu1 %v4158_v35, %s3601_s12 }
 0x2f6   :  { %1375 = vrot.lane.b32.xlu2 %v4166_v7, %s3601_s12  ;;  %1321 = vrot.lane.b32.xlu0 %v4166_v7, %s3578_s13 }
 0x2fd   :  { %1359 = vrot.lane.b32.xlu1 %v4166_v7, %s3604_s23 }
 0x2fe   :  { %1343 = vrot.lane.b32.xlu2 %v4166_v7, %s3603_s11  ;;  %1301 = vrot.lane.b32.xlu0 %v4158_v35, %s3600_s7 }
 0x305   :  { %1339 = vrot.lane.b32.xlu1 %v4158_v35, %s3603_s11 }
 0x306   :  { %1317 = vrot.lane.b32.xlu2 %v4158_v35, %s3578_s13  ;;  %1273 = vrot.lane.b32.xlu0 %v4166_v7, %s3597_s0 }
 0x30d   :  { %1305 = vrot.lane.b32.xlu1 %v4166_v7, %s3600_s7 }
 0x30e   :  { %1289 = vrot.lane.b32.xlu2 %v4166_v7, %s3571_s15  ;;  %1387 = vrot.lane.b32.xlu0 %v4158_v35, %s3607_s21 }
 0x315   :  { %1285 = vrot.lane.b32.xlu1 %v4158_v35, %s3571_s15 }
 0x316   :  { %1269 = vrot.lane.b32.xlu2 %v4158_v35, %s3597_s0  ;;  %1389 = vrot.lane.b32.xlu0 %v4132_v5, %s3607_s21 }
 0x31d   :  { %1391 = vrot.lane.b32.xlu1 %v4166_v7, %s3607_s21 }
 0x31e   :  { %1385 = vrot.lane.b32.xlu2 %v4130_v2, %s3607_s21 }
 0x326   :  { %1409 = vperm.xlu2 %2888, %v1405_v15  }
 0x328   :  { %v1374_v39 = vpop.permute.xlu2 %1373 }
 0x330   :  { %v1354_v40 = vpop.permute.xlu2 %1353 }
 0x338   :  { %v4202_v18 = vpop.permute.xlu2 %1319 }
 0x33f   :  { %v1370_v45 = vpop.permute.xlu1 %1369 }
 0x340   :  { %v1358_v46 = vpop.permute.xlu0 %1357  ;;  %v4204_v27 = vpop.permute.xlu2 %1299  ;;  %v1377_v63 = vsel %vm607_vm8, %v1370_v45, %v1374_v39  ;;  %v1379_v0 = vsel %vm607_vm8, %v1374_v39, %v1370_v45 }
 0x341   :  { %v1381_v57 = vmul.f32 %v1377_v63, %v4095_v41  ;;  %v1382_v8 = vmul.f32 %v1379_v0, %v4097_v44  ;;  %v1361_v10 = vsel %vm586_vm6, %v1354_v40, %v1358_v46  ;;  %v1363_v11 = vsel %vm586_vm6, %v1358_v46, %v1354_v40 }
 0x342   :  { %v1365_v34 = vmul.f32 %v1361_v10, %v4053_v12  ;;  %v1366_v38 = vmul.f32 %v1363_v11, %v4055_v13 }
 0x347   :  { %v1342_v47 = vpop.permute.xlu1 %1341 }
 0x348   :  { %v1338_v50 = vpop.permute.xlu0 %1337  ;;  %v4210_v30 = vpop.permute.xlu2 %1271 }
 0x349   :  { %v1345_v37 = vsel %vm565_vm7, %v1338_v50, %v1342_v47  ;;  %v1347_v15 = vsel %vm565_vm7, %v1342_v47, %v1338_v50  ;;  %v1336_v47 = vmul.f32 %v4166_v7, %v3953_v16  ;;  %v1335_v50 = vmul.f32 %v4158_v35, %v3956_v17 }
 0x34f   :  { %v4206_v51 = vpop.permute.xlu1 %1315 }
 0x350   :  { %v4208_v58 = vpop.permute.xlu0 %1303  ;;  %v1376_v48 = vpop.permute.xlu2 %1375  ;;  %v1323_v35 = vsel %vm534_vm5, %v4206_v51, %v4202_v18  ;;  %v1325_v7 = vsel %vm534_vm5, %v4202_v18, %v4206_v51 }
 0x351   :  { %v1309_v18 = vsel %vm513_vm4, %v4208_v58, %v4204_v27  ;;  %v1307_v51 = vsel %vm513_vm4, %v4204_v27, %v4208_v58 }
 0x357   :  { %v4212_v59 = vpop.permute.xlu1 %1287 }
 0x358   :  { %v4214_v60 = vpop.permute.xlu0 %1283  ;;  %v1344_v20 = vpop.permute.xlu2 %1343 }
 0x35f   :  { %v4216_v61 = vpop.permute.xlu1 %1267 }
 0x360   :  { %v1356_v62 = vpop.permute.xlu0 %1355  ;;  %v1318_v22 = vpop.permute.xlu2 %1317 }
 0x367   :  { %v1372_v29 = vpop.permute.xlu1 %1371 }
 0x368   :  { %v1322_v52 = vpop.permute.xlu0 %1321  ;;  %v1378_v6 = vsel %vm607_vm8, %v1372_v29, %v1376_v48  ;;  %v1380_v33 = vsel %vm607_vm8, %v1376_v48, %v1372_v29  ;;  %v1350_v29 = vmul.f32 %v1347_v15, %v4074_v25  ;;  %v1290_v63 = vpop.permute.xlu2 %1289 }
 0x369   :  { %v1383_v1 = vmul.f32 %v1378_v6, %v4095_v41  ;;  %v1384_v49 = vmul.f32 %v1380_v33, %v4097_v44  ;;  %v1326_v0 = vsel %vm534_vm5, %v1322_v52, %v1318_v22  ;;  %v1333_v33 = vmul.f32 %v4130_v2, %v3956_v17 }
 0x36b   :  { %1424 = vmatpush.msra.mxu2 %v1383_v1  ;;  %1470 = vmatpush.msrb.mxu0 %v1384_v49  ;;  %v1334_v1 = vmul.f32 %v4132_v5, %v3953_v16  ;;  %v1406_v49 = vld [vmem:[#allocation13 + $0x8] sm:$0xff] }
 0x36c   :  { %1414 = vperm.xlu1 %2890, %v1406_v49   ;;  %v1402_v49 = vld [vmem:[#allocation11 + $0x8] sm:$0xff] }
 0x36d   :  { %1425 = vmatpush.msra.mxu2 %v1381_v57  ;;  %1471 = vmatpush.msrb.mxu0 %v1382_v8  ;;  %v1327_v8 = vmul.f32 %v1325_v7, %v4034_v3  ;;  %v1403_v7 = vld [vmem:[#allocation11 + $0x10] sm:$0xff] }
 0x36f   :  { %v1360_v9 = vpop.permute.xlu1 %1359 }
 0x370   :  { %v1302_v14 = vpop.permute.xlu0 %1301  ;;  %v1362_v19 = vsel %vm586_vm6, %v1356_v62, %v1360_v9  ;;  %v1364_v21 = vsel %vm586_vm6, %v1360_v9, %v1356_v62  ;;  %v1349_v62 = vmul.f32 %v1345_v37, %v4072_v24  ;;  %v1328_v9 = vmul.f32 %v1323_v35, %v4036_v4  ;;  %v1270_v11 = vpop.permute.xlu2 %1269 }
 0x371   :  { %v1367_v23 = vmul.f32 %v1362_v19, %v4053_v12  ;;  %v1368_v26 = vmul.f32 %v1364_v21, %v4055_v13  ;;  %v1311_v21 = vmul.f32 %v1309_v18, %v4017_v55 }
 0x373   :  { %1426 = vmatpush.msra.mxu2 %v1367_v23  ;;  %1472 = vmatpush.msrb.mxu0 %v1368_v26  ;;  %v1312_v23 = vmul.f32 %v1307_v51, %v4019_v56  ;;  %v1293_v26 = vsel %vm492_vm3, %v4212_v59, %v4214_v60 }
 0x374   :  { %v1295_v15 = vmul.f32 %v1293_v26, %v4000_v42 }
 0x375   :  { %1427 = vmatpush.msra.mxu2 %v1365_v34  ;;  %1473 = vmatpush.msrb.mxu0 %v1366_v38  ;;  %v1291_v34 = vsel %vm492_vm3, %v4214_v60, %v4212_v59  ;;  %v1277_v59 = vsel %vm472_vm1, %v4210_v30, %v4216_v61  ;;  %v1275_v60 = vsel %vm472_vm1, %v4216_v61, %v4210_v30 }
 0x377   :  { %v1340_v36 = vpop.permute.xlu1 %1339 }
 0x378   :  { %v1346_v39 = vsel %vm565_vm7, %v1340_v36, %v1344_v20  ;;  %v1348_v40 = vsel %vm565_vm7, %v1344_v20, %v1340_v36  ;;  %v1274_v45 = vpop.permute.xlu0 %1273  ;;  %v1324_v20 = vsel %vm534_vm5, %v1318_v22, %v1322_v52  ;;  %v1329_v52 = vmul.f32 %v1326_v0, %v4034_v3 }
 0x379   :  { %v1351_v46 = vmul.f32 %v1346_v39, %v4072_v24  ;;  %v1352_v48 = vmul.f32 %v1348_v40, %v4074_v25  ;;  %v1330_v57 = vmul.f32 %v1324_v20, %v4036_v4  ;;  %v1278_v37 = vsel %vm472_vm1, %v1274_v45, %v1270_v11 }
 0x37a   :  { %v1276_v39 = vsel %vm472_vm1, %v1270_v11, %v1274_v45  ;;  %v1296_v40 = vmul.f32 %v1291_v34, %v4002_v43 }
 0x37b   :  { %1428 = vmatpush.msra.mxu2 %v1351_v46  ;;  %1474 = vmatpush.msrb.mxu0 %v1352_v48  ;;  %v1281_v46 = vmul.f32 %v1278_v37, %v3977_v31  ;;  %v1282_v45 = vmul.f32 %v1276_v39, %v3979_v32 }
 0x37d   :  { %1429 = vmatpush.msra.mxu2 %v1349_v62  ;;  %1475 = vmatpush.msrb.mxu0 %v1350_v29  ;;  %v1279_v62 = vmul.f32 %v1277_v59, %v3977_v31  ;;  %v1386_v29 = vpop.permute.xlu2 %1385 }
 0x37f   :  { %1476 = vmatpush.msrb.mxu0 %v1336_v47  ;;  %v1306_v6 = vpop.permute.xlu1 %1305  ;;  %1430 = vmatpush.msra.mxu2 %v1335_v50  ;;  %v1401_v47 = vld [vmem:[#allocation11] sm:$0xff]  ;;  %v1280_v50 = vmul.f32 %v1275_v60, %v3979_v32 }
 0x380   :  { %v1308_v2 = vsel %vm513_vm4, %v1302_v14, %v1306_v6  ;;  %v1310_v5 = vsel %vm513_vm4, %v1306_v6, %v1302_v14  ;;  %v1388_v10 = vpop.permute.xlu0 %1387 }
 0x381   :  { %1431 = vmatpush.msra.mxu2 %v1333_v33  ;;  %1477 = vmatpush.msrb.mxu0 %v1334_v1  ;;  %v1313_v14 = vmul.f32 %v1310_v5, %v4017_v55  ;;  %v1314_v19 = vmul.f32 %v1308_v2, %v4019_v56 }
 0x383   :  { %1432 = vmatpush.msra.mxu2 %v1329_v52  ;;  %1478 = vmatpush.msrb.mxu0 %v1330_v57  ;;  %v1404_v52 = vld [vmem:[#allocation11 + $0x18] sm:$0xff] }
 0x385   :  { %1433 = vmatpush.msra.mxu2 %v1327_v8  ;;  %1479 = vmatpush.msrb.mxu0 %v1328_v9  ;;  %v1410_v2 = vpop.permute.xlu2 %1409 }
 0x387   :  { %1480 = vmatpush.msrb.mxu0 %v1314_v19  ;;  %v1286_v22 = vpop.permute.xlu1 %1285  ;;  %1434 = vmatpush.msra.mxu2 %v1313_v14 }
 0x388   :  { %v1292_v27 = vsel %vm492_vm3, %v1286_v22, %v1290_v63  ;;  %v1294_v58 = vsel %vm492_vm3, %v1290_v63, %v1286_v22  ;;  %v1390_v48 = vpop.permute.xlu0 %1389 }
 0x389   :  { %v1297_v38 = vmul.f32 %v1294_v58, %v4000_v42  ;;  %v1298_v36 = vmul.f32 %v1292_v27, %v4002_v43  ;;  %1435 = vmatpush.msra.mxu2 %v1311_v21  ;;  %1481 = vmatpush.msrb.mxu0 %v1312_v23  ;;  %v1393_v20 = vsel %vm628_vm9, %v1386_v29, %v1390_v48 }
 0x38a   :  { %v1395_v0 = vsel %vm628_vm9, %v1390_v48, %v1386_v29  ;;  %v1397_v1 = vmul.f32 %v1393_v20, %v4112_v53 }
 0x38b   :  { %1436 = vmatpush.msra.mxu2 %v1297_v38  ;;  %1482 = vmatpush.msrb.mxu0 %v1298_v36  ;;  %v1398_v35 = vmul.f32 %v1395_v0, %v4114_v54 }
 0x38d   :  { %1437 = vmatpush.msra.mxu2 %v1295_v15  ;;  %1483 = vmatpush.msrb.mxu0 %v1296_v40 }
 0x38f   :  { %v1392_v63 = vpop.permute.xlu1 %1391  ;;  %1438 = vmatpush.msra.mxu2 %v1281_v46  ;;  %1484 = vmatpush.msrb.mxu0 %v1282_v45 }
 0x390   :  { %v1394_v30 = vsel %vm628_vm9, %v1388_v10, %v1392_v63  ;;  %v1396_v61 = vsel %vm628_vm9, %v1392_v63, %v1388_v10 }
 0x391   :  { %v1399_v6 = vmul.f32 %v1394_v30, %v4112_v53  ;;  %v1400_v33 = vmul.f32 %v1396_v61, %v4114_v54  ;;  %1439 = vmatpush.msra.mxu2 %v1279_v62  ;;  %1485 = vmatpush.msrb.mxu0 %v1280_v50 }
 0x392   :  { %1440 = vmatmul.f32.vlgmr.msra.gmra.mxu2 %v1401_v47  ;;  %1486 = vmatmul.f32.vlgmr.msrb.gmra.mxu0 %v1401_v47 }
 0x393   :  { %1461 = vmatpush.msra.mxu3 %v1399_v6  ;;  %1507 = vmatpush.msrb.mxu1 %v1400_v33 }
 0x395   :  { %1462 = vmatpush.msra.mxu3 %v1397_v1  ;;  %1508 = vmatpush.msrb.mxu1 %v1398_v35 }
 0x396   :  { %2784 = vmatmul.msk.f32.vlgmr.msra.gmra.mxu3 %vm1417_vm10, %v1402_v49  ;;  %2786 = vmatmul.msk.f32.vlgmr.msrb.gmra.mxu1 %vm1417_vm10, %v1402_v49 }
 0x39a   :  { %1443 = vmatmul.f32.gmra.mxu2 %v1403_v7  ;;  %1489 = vmatmul.f32.gmra.mxu0 %v1403_v7 }
 0x39e   :  { %2785 = vmatmul.msk.f32.gmra.mxu3 %vm1417_vm10, %v1404_v52  ;;  %2787 = vmatmul.msk.f32.gmra.mxu1 %vm1417_vm10, %v1404_v52 }
 0x3de   :  { %v1415_v18 = vpop.permute.xlu1 %1414 }
 0x40f   :  { %v1487_v57 = vpop.f32.mrf.mxu0 }
 0x410   :  { %v1488_v5 = vadd.f32 %v1487_v57, %v1410_v2 }
 0x413   :  { %v1510_v8 = vpop.f32.mrf.mxu1 }
 0x414   :  { %v1511_v9 = vadd.f32 %v1510_v8, %v1488_v5 }
 0x415   :  { %v1441_v10 = vpop.f32.mrf.mxu2 }
 0x416   :  { %v1521_v51 = vmul.f32 0.044715, %v1511_v9  ;;  %v1442_v11 = vadd.f32 %v1441_v10, %v1410_v2  ;;  %v1517_v45 = vmul.f32 0.5, %v1511_v9 }
 0x417   :  { %v1490_v14 = vpop.f32.mrf.mxu0 }
 0x418   :  { %v1525_v19 = vmul.f32 %v1521_v51, %v1511_v9  ;;  %v1491_v22 = vadd.f32 %v1490_v14, %v1415_v18  ;;  %v1818_v14 = vld [vmem:[#allocation14] sm:$0xff] }
 0x419   :  { %v1464_v21 = vpop.f32.mrf.mxu3 }
 0x41a   :  { %v1465_v23 = vadd.f32 %v1464_v21, %v1442_v11  ;;  %v1529_v26 = vmul.f32 %v1525_v19, %v1511_v9  ;;  %v1819_v19 = vld [vmem:[#allocation14 + $0x8] sm:$0xff] }
 0x41b   :  { %v1513_v58 = vpop.f32.mrf.mxu1 }
 0x41c   :  { %v1520_v27 = vmul.f32 0.044715, %v1465_v23  ;;  %v1533_v34 = vadd.f32 %v1529_v26, %v1511_v9  ;;  %v1514_v38 = vadd.f32 %v1513_v58, %v1491_v22  ;;  %v1516_v6 = vmul.f32 0.5, %v1465_v23 }
 0x41d   :  { %v1444_v46 = vpop.f32.mrf.mxu2 }
 0x41e   :  { %v1524_v36 = vmul.f32 %v1520_v27, %v1465_v23  ;;  %v1537_v37 = vmul.f32 0.7978846, %v1533_v34  ;;  %v1523_v39 = vmul.f32 0.044715, %v1514_v38  ;;  %v1445_v29 = vadd.f32 %v1444_v46, %v1415_v18 }
 0x41f   :  { %v1519_v2 = vmul.f32 0.5, %v1514_v38 }
 0x420   :  { %v1528_v15 = vmul.f32 %v1524_v36, %v1465_v23  ;;  %2917 = vtanh.f32 %v1537_v37  ;;  %v1527_v60 = vmul.f32 %v1523_v39, %v1514_v38 }
 0x421   :  { %v1467_v50 = vpop.f32.mrf.mxu3 }
 0x422   :  { %v1532_v40 = vadd.f32 %v1528_v15, %v1465_v23  ;;  %v1531_v63 = vmul.f32 %v1527_v60, %v1514_v38  ;;  %v1468_v61 = vadd.f32 %v1467_v50, %v1445_v29 }
 0x424   :  { %v1536_v59 = vmul.f32 0.7978846, %v1532_v40  ;;  %v1535_v30 = vadd.f32 %v1531_v63, %v1514_v38  ;;  %v1522_v1 = vmul.f32 0.044715, %v1468_v61  ;;  %v1518_v51 = vmul.f32 0.5, %v1468_v61 }
 0x426   :  { %2919 = vtanh.f32 %v1536_v59  ;;  %v2918_v48 = vpop.eup %2917  ;;  %v1539_v33 = vmul.f32 0.7978846, %v1535_v30  ;;  %v1526_v35 = vmul.f32 %v1522_v1, %v1468_v61 }
 0x427   :  { %v1545_v62 = vadd.f32 1.0, %v2918_v48 }
 0x428   :  { %2921 = vtanh.f32 %v1539_v33  ;;  %v1530_v7 = vmul.f32 %v1526_v35, %v1468_v61 }
 0x429   :  { %v4342_v47 = vmul.f32 %v1545_v62, %v1517_v45 }
 0x42a   :  { %v1534_v57 = vadd.f32 %v1530_v7, %v1468_v61 }
 0x42b   :  { %1624 = vrot.lane.b32.xlu2 %v4342_v47, %s3603_s11  ;;  %1640 = vrot.lane.b32.xlu1 %v4342_v47, %s3604_s23 }
 0x42c   :  { %v2920_v20 = vpop.eup %2919  ;;  %1656 = vrot.lane.b32.xlu0 %v4342_v47, %s3601_s12  ;;  %v1538_v8 = vmul.f32 0.7978846, %v1534_v57 }
 0x42d   :  { %v1544_v0 = vadd.f32 1.0, %v2920_v20 }
 0x42e   :  { %v2922_v52 = vpop.eup %2921  ;;  %2923 = vtanh.f32 %v1538_v8 }
 0x42f   :  { %v4350_v49 = vmul.f32 %v1544_v0, %v1516_v6  ;;  %v1547_v5 = vadd.f32 1.0, %v2922_v52 }
 0x431   :  { %v4364_v9 = vmul.f32 %v1547_v5, %v1519_v2 }
 0x433   :  { %1588 = vrot.lane.b32.xlu1 %v4342_v47, %s3600_s7  ;;  %1652 = vrot.lane.b32.xlu2 %v4350_v49, %s3601_s12 }
 0x434   :  { %1604 = vrot.lane.b32.xlu0 %v4342_v47, %s3578_s13  ;;  %v2924_v10 = vpop.eup %2923 }
 0x435   :  { %v1546_v18 = vadd.f32 1.0, %v2924_v10 }
 0x437   :  { %v4378_v11 = vmul.f32 %v1546_v18, %v1518_v51 }
 0x43b   :  { %1620 = vrot.lane.b32.xlu1 %v4350_v49, %s3603_s11  ;;  %1600 = vrot.lane.b32.xlu2 %v4350_v49, %s3578_s13 }
 0x43c   :  { %1636 = vrot.lane.b32.xlu0 %v4350_v49, %s3604_s23 }
 0x443   :  { %1658 = vrot.lane.b32.xlu1 %v4364_v9, %s3601_s12  ;;  %1642 = vrot.lane.b32.xlu2 %v4364_v9, %s3604_s23 }
 0x444   :  { %1584 = vrot.lane.b32.xlu0 %v4350_v49, %s3600_s7 }
 0x44b   :  { %1606 = vrot.lane.b32.xlu1 %v4364_v9, %s3578_s13  ;;  %1590 = vrot.lane.b32.xlu2 %v4364_v9, %s3600_s7 }
 0x44c   :  { %1626 = vrot.lane.b32.xlu0 %v4364_v9, %s3603_s11 }
 0x453   :  { %1568 = vrot.lane.b32.xlu1 %v4350_v49, %s3571_s15  ;;  %1622 = vrot.lane.b32.xlu2 %v4378_v11, %s3603_s11 }
 0x454   :  { %1654 = vrot.lane.b32.xlu0 %v4378_v11, %s3601_s12 }
 0x45b   :  { %1638 = vrot.lane.b32.xlu1 %v4378_v11, %s3604_s23  ;;  %1572 = vrot.lane.b32.xlu2 %v4342_v47, %s3571_s15 }
 0x45c   :  { %1574 = vrot.lane.b32.xlu0 %v4364_v9, %s3571_s15 }
 0x463   :  { %1558 = vrot.lane.b32.xlu1 %v4364_v9, %s3597_s0  ;;  %1570 = vrot.lane.b32.xlu2 %v4378_v11, %s3571_s15  ;;  %s4651_s15 = sld [smem:[#allocation52_spill]] }
 0x464   :  { %1602 = vrot.lane.b32.xlu0 %v4378_v11, %s3578_s13  ;;  %s4652_s13 = sld [smem:[#allocation55_spill]] }
 0x46b   :  { %1586 = vrot.lane.b32.xlu1 %v4378_v11, %s3600_s7  ;;  %1552 = vrot.lane.b32.xlu2 %v4350_v49, %s3597_s0 }
 0x46c   :  { %1556 = vrot.lane.b32.xlu0 %v4342_v47, %s3597_s0 }
 0x473   :  { %1670 = vrot.lane.b32.xlu1 %v4378_v11, %s3607_s21  ;;  %1674 = vrot.lane.b32.xlu2 %v4364_v9, %s3607_s21 }
 0x474   :  { %1554 = vrot.lane.b32.xlu0 %v4378_v11, %s3597_s0 }
 0x47b   :  { %1672 = vrot.lane.b32.xlu1 %v4342_v47, %s3607_s21  ;;  %1822 = vperm.xlu2 %2888, %v1818_v14  }
 0x47c   :  { %1668 = vrot.lane.b32.xlu0 %v4350_v49, %s3607_s21 }
 0x483   :  { %1827 = vperm.xlu2 %2888, %v1819_v19  }
 0x485   :  { %v1625_v21 = vpop.permute.xlu2 %1624 }
 0x48d   :  { %v1653_v22 = vpop.permute.xlu2 %1652 }
 0x495   :  { %v4414_v27 = vpop.permute.xlu2 %1600 }
 0x49d   :  { %v1641_v23 = vpop.permute.xlu1 %1640  ;;  %v1643_v38 = vpop.permute.xlu2 %1642 }
 0x49e   :  { %v1657_v26 = vpop.permute.xlu0 %1656 }
 0x49f   :  { %v1660_v62 = vsel %vm607_vm8, %v1653_v22, %v1657_v26  ;;  %v1662_v29 = vsel %vm607_vm8, %v1657_v26, %v1653_v22 }
 0x4a0   :  { %v1664_v0 = vmul.f32 %v1660_v62, %v4095_v41  ;;  %v1665_v6 = vmul.f32 %v1662_v29, %v4097_v44 }
 0x4a5   :  { %v4416_v58 = vpop.permute.xlu1 %1588  ;;  %v4420_v15 = vpop.permute.xlu2 %1590 }
 0x4a6   :  { %v4418_v34 = vpop.permute.xlu0 %1604 }
 0x4ad   :  { %v1621_v36 = vpop.permute.xlu1 %1620  ;;  %v1623_v59 = vpop.permute.xlu2 %1622 }
 0x4ae   :  { %v1637_v37 = vpop.permute.xlu0 %1636  ;;  %v1628_v51 = vsel %vm565_vm7, %v1621_v36, %v1625_v21  ;;  %v1630_v14 = vsel %vm565_vm7, %v1625_v21, %v1621_v36  ;;  %v1619_v21 = vmul.f32 %v4364_v9, %v3953_v16  ;;  %v1608_v9 = vsel %vm534_vm5, %v4414_v27, %v4418_v34 }
 0x4af   :  { %v1644_v1 = vsel %vm586_vm6, %v1637_v37, %v1641_v23  ;;  %v1646_v35 = vsel %vm586_vm6, %v1641_v23, %v1637_v37  ;;  %v1632_v23 = vmul.f32 %v1628_v51, %v4072_v24  ;;  %v1617_v37 = vmul.f32 %v4342_v47, %v3953_v16 }
 0x4b0   :  { %v1648_v8 = vmul.f32 %v1644_v1, %v4053_v12  ;;  %v1649_v10 = vmul.f32 %v1646_v35, %v4055_v13  ;;  %v1613_v47 = vmul.f32 %v1608_v9, %v4036_v4  ;;  %v1809_v9 = vld [vmem:[#allocation7 + $0xb8] sm:$0xff] }
 0x4b5   :  { %v1659_v39 = vpop.permute.xlu1 %1658  ;;  %v4430_v63 = vpop.permute.xlu2 %1572 }
 0x4b6   :  { %v4422_v40 = vpop.permute.xlu0 %1584 }
 0x4bd   :  { %v1607_v60 = vpop.permute.xlu1 %1606  ;;  %v1571_v18 = vpop.permute.xlu2 %1570 }
 0x4be   :  { %v1627_v46 = vpop.permute.xlu0 %1626 }
 0x4bf   :  { %v1629_v2 = vsel %vm565_vm7, %v1623_v59, %v1627_v46  ;;  %v1631_v5 = vsel %vm565_vm7, %v1627_v46, %v1623_v59 }
 0x4c0   :  { %v1634_v19 = vmul.f32 %v1629_v2, %v4072_v24  ;;  %v1635_v22 = vmul.f32 %v1631_v5, %v4074_v25  ;;  %v1684_v2 = vld [vmem:[%s4651_s15] sm:$0xff] }
 0x4c1   :  { %v1817_v5 = vld [vmem:[#allocation7 + $0xf8] sm:$0xff] }
 0x4c5   :  { %v4424_v48 = vpop.permute.xlu1 %1568 }
 0x4c6   :  { %v1655_v45 = vpop.permute.xlu0 %1654 }
 0x4c7   :  { %v1661_v50 = vsel %vm607_vm8, %v1655_v45, %v1659_v39  ;;  %v1663_v20 = vsel %vm607_vm8, %v1659_v39, %v1655_v45  ;;  %v1553_v39 = vpop.permute.xlu2 %1552 }
 0x4c8   :  { %v1666_v30 = vmul.f32 %v1661_v50, %v4095_v41  ;;  %v1667_v61 = vmul.f32 %v1663_v20, %v4097_v44 }
 0x4ca   :  { %1694 = vmatpush.msrb.mxu3 %v1666_v30  ;;  %1740 = vmatpush.msrb.mxu2 %v1667_v61 }
 0x4cc   :  { %1695 = vmatpush.msrb.mxu3 %v1664_v0  ;;  %1741 = vmatpush.msrb.mxu2 %v1665_v6 }
 0x4cd   :  { %v1639_v33 = vpop.permute.xlu1 %1638 }
 0x4ce   :  { %v1645_v7 = vsel %vm586_vm6, %v1639_v33, %v1643_v38  ;;  %v1647_v52 = vsel %vm586_vm6, %v1643_v38, %v1639_v33  ;;  %v1575_v41 = vpop.permute.xlu0 %1574  ;;  %v1618_v38 = vmul.f32 %v4378_v11, %v3956_v17  ;;  %v1610_v11 = vsel %vm534_vm5, %v4418_v34, %v4414_v27 }
 0x4cf   :  { %v1650_v44 = vmul.f32 %v1645_v7, %v4053_v12  ;;  %v1651_v57 = vmul.f32 %v1647_v52, %v4055_v13  ;;  %v1633_v12 = vmul.f32 %v1630_v14, %v4074_v25  ;;  %v1616_v25 = vmul.f32 %v4350_v49, %v3956_v17  ;;  %v1675_v61 = vpop.permute.xlu2 %1674 }
 0x4d0   :  { %v1612_v17 = vmul.f32 %v1610_v11, %v4034_v3  ;;  %v1594_v49 = vsel %vm513_vm4, %v4416_v58, %v4422_v40  ;;  %v1579_v62 = vsel %vm492_vm3, %v1575_v41, %v1571_v18  ;;  %v1795_v11 = vld [vmem:[#allocation7 + $0x48] sm:$0xff] }
 0x4d1   :  { %1696 = vmatpush.msrb.mxu3 %v1650_v44  ;;  %1742 = vmatpush.msrb.mxu2 %v1651_v57  ;;  %v1596_v29 = vmul.f32 %v1594_v49, %v4017_v55  ;;  %v1582_v20 = vmul.f32 %v1579_v62, %v4000_v42  ;;  %v1791_v49 = vld [vmem:[#allocation7 + $0x28] sm:$0xff] }
 0x4d2   :  { %v1803_v62 = vld [vmem:[#allocation7 + $0x88] sm:$0xff] }
 0x4d3   :  { %1697 = vmatpush.msrb.mxu3 %v1648_v8  ;;  %1743 = vmatpush.msrb.mxu2 %v1649_v10  ;;  %v1816_v10 = vld [vmem:[#allocation7 + $0xf0] sm:$0xff] }
 0x4d5   :  { %v1559_v13 = vpop.permute.xlu1 %1558  ;;  %1698 = vmatpush.msrb.mxu3 %v1634_v19  ;;  %1744 = vmatpush.msrb.mxu2 %v1635_v22  ;;  %v1685_v19 = vld [vmem:[%s4651_s15 + $0x8] sm:$0xff] }
 0x4d6   :  { %v1603_v26 = vpop.permute.xlu0 %1602  ;;  %v1801_v22 = vld [vmem:[#allocation7 + $0x78] sm:$0xff] }
 0x4d7   :  { %1699 = vmatpush.msrb.mxu3 %v1632_v23  ;;  %1745 = vmatpush.msrb.mxu2 %v1633_v12  ;;  %v1609_v36 = vsel %vm534_vm5, %v1603_v26, %v1607_v60  ;;  %v1611_v24 = vsel %vm534_vm5, %v1607_v60, %v1603_v26  ;;  %v1815_v23 = vld [vmem:[#allocation7 + $0xe8] sm:$0xff]  ;;  %v1814_v26 = vld [vmem:[#allocation7 + $0xe0] sm:$0xff] }
 0x4d8   :  { %v1614_v59 = vmul.f32 %v1611_v24, %v4034_v3  ;;  %v1615_v60 = vmul.f32 %v1609_v36, %v4036_v4  ;;  %v1592_v3 = vsel %vm513_vm4, %v4422_v40, %v4416_v58  ;;  %v1576_v58 = vsel %vm492_vm3, %v4424_v48, %v4430_v63  ;;  %v1686_v12 = vld [vmem:[%s4651_s15 + $0x10] sm:$0xff]  ;;  %v1797_v36 = vld [vmem:[#allocation7 + $0x58] sm:$0xff] }
 0x4d9   :  { %1700 = vmatpush.msrb.mxu3 %v1618_v38  ;;  %1746 = vmatpush.msrb.mxu2 %v1619_v21  ;;  %v1597_v50 = vmul.f32 %v1592_v3, %v4019_v56  ;;  %v1578_v40 = vsel %vm492_vm3, %v4430_v63, %v4424_v48  ;;  %v1812_v38 = vld [vmem:[#allocation7 + $0xd0] sm:$0xff]  ;;  %v1811_v24 = vld [vmem:[#allocation7 + $0xc8] sm:$0xff]  ;;  %v1789_v3 = vld [vmem:[#allocation7 + $0x18] sm:$0xff] }
 0x4da   :  { %v1580_v30 = vmul.f32 %v1578_v40, %v4000_v42  ;;  %v1687_v21 = vld [vmem:[%s4651_s15 + $0x18] sm:$0xff] }
 0x4db   :  { %1701 = vmatpush.msrb.mxu3 %v1616_v25  ;;  %1747 = vmatpush.msrb.mxu2 %v1617_v37  ;;  %v1796_v25 = vld [vmem:[#allocation7 + $0x50] sm:$0xff]  ;;  %v1810_v37 = vld [vmem:[#allocation7 + $0xc0] sm:$0xff] }
 0x4dd   :  { %v1587_v16 = vpop.permute.xlu1 %1586  ;;  %1748 = vmatpush.msrb.mxu2 %v1615_v60  ;;  %1702 = vmatpush.msrb.mxu3 %v1614_v59  ;;  %v1808_v59 = vld [vmem:[#allocation7 + $0xb0] sm:$0xff]  ;;  %v1793_v60 = vld [vmem:[#allocation7 + $0x38] sm:$0xff] }
 0x4de   :  { %v1593_v27 = vsel %vm513_vm4, %v1587_v16, %v4420_v15  ;;  %v1595_v34 = vsel %vm513_vm4, %v4420_v15, %v1587_v16  ;;  %v1557_v46 = vpop.permute.xlu0 %1556  ;;  %v1577_v15 = vsel %vm492_vm3, %v1571_v18, %v1575_v41  ;;  %v1792_v16 = vld [vmem:[#allocation7 + $0x30] sm:$0xff] }
 0x4df   :  { %v1598_v4 = vmul.f32 %v1595_v34, %v4017_v55  ;;  %v1599_v45 = vmul.f32 %v1593_v27, %v4019_v56  ;;  %1703 = vmatpush.msrb.mxu3 %v1612_v17  ;;  %1749 = vmatpush.msrb.mxu2 %v1613_v47  ;;  %v1583_v55 = vmul.f32 %v1577_v15, %v4002_v43  ;;  %v1807_v17 = vld [vmem:[#allocation7 + $0xa8] sm:$0xff]  ;;  %v1806_v47 = vld [vmem:[#allocation7 + $0xa0] sm:$0xff]  ;;  %v1805_v27 = vld [vmem:[#allocation7 + $0x98] sm:$0xff] }
 0x4e0   :  { %v1581_v56 = vmul.f32 %v1576_v58, %v4002_v43  ;;  %v1560_v6 = vsel %vm472_vm1, %v1553_v39, %v1557_v46  ;;  %v1562_v48 = vsel %vm472_vm1, %v1557_v46, %v1553_v39  ;;  %v1794_v39 = vld [vmem:[#allocation7 + $0x40] sm:$0xff]  ;;  %v1804_v46 = vld [vmem:[#allocation7 + $0x90] sm:$0xff] }
 0x4e1   :  { %1704 = vmatpush.msrb.mxu3 %v1598_v4  ;;  %1750 = vmatpush.msrb.mxu2 %v1599_v45  ;;  %v1564_v44 = vmul.f32 %v1562_v48, %v3977_v31  ;;  %v1565_v57 = vmul.f32 %v1560_v6, %v3979_v32  ;;  %v1790_v34 = vld [vmem:[#allocation7 + $0x20] sm:$0xff]  ;;  %v1788_v4 = vld [vmem:[#allocation7 + $0x10] sm:$0xff]  ;;  %v1787_v45 = vld [vmem:[#allocation7 + $0x8] sm:$0xff] }
 0x4e2   :  { %v1802_v15 = vld [vmem:[#allocation7 + $0x80] sm:$0xff] }
 0x4e3   :  { %1705 = vmatpush.msrb.mxu3 %v1596_v29  ;;  %1751 = vmatpush.msrb.mxu2 %v1597_v50  ;;  %v1786_v29 = vld [vmem:[#allocation7] sm:$0xff] }
 0x4e5   :  { %v1671_v0 = vpop.permute.xlu1 %1670  ;;  %1706 = vmatpush.msrb.mxu3 %v1582_v20  ;;  %1752 = vmatpush.msrb.mxu2 %v1583_v55 }
 0x4e6   :  { %v1677_v63 = vsel %vm628_vm9, %v1671_v0, %v1675_v61  ;;  %v1679_v33 = vsel %vm628_vm9, %v1675_v61, %v1671_v0  ;;  %v1555_v1 = vpop.permute.xlu0 %1554 }
 0x4e7   :  { %v1682_v42 = vmul.f32 %v1677_v63, %v4112_v53  ;;  %v1683_v43 = vmul.f32 %v1679_v33, %v4114_v54  ;;  %v1561_v35 = vsel %vm472_vm1, %v1555_v1, %v1559_v13  ;;  %v1563_v7 = vsel %vm472_vm1, %v1559_v13, %v1555_v1  ;;  %1707 = vmatpush.msrb.mxu3 %v1580_v30  ;;  %v1800_v13 = vld [vmem:[#allocation7 + $0x70] sm:$0xff]  ;;  %v1909_v33 = vld [vmem:[#allocation16 + $0x78] sm:$0xff] }
 0x4e8   :  { %v1566_v52 = vmul.f32 %v1563_v7, %v3977_v31  ;;  %v1567_v41 = vmul.f32 %v1561_v35, %v3979_v32  ;;  %1753 = vmatpush.msrb.mxu2 %v1581_v56  ;;  %v1908_v1 = vld [vmem:[#allocation16 + $0x70] sm:$0xff]  ;;  %v1925_v35 = vld [vmem:[#allocation16 + $0xf8] sm:$0xff]  ;;  %vm2335_vm1 = vcmask 64512  }
 0x4e9   :  { %1731 = vmatpush.msra.mxu1 %v1682_v42  ;;  %1777 = vmatpush.msra.mxu0 %v1683_v43  ;;  %v1907_v42 = vld [vmem:[#allocation16 + $0x68] sm:$0xff]  ;;  %v1906_v43 = vld [vmem:[#allocation16 + $0x60] sm:$0xff]  ;;  %v1905_v7 = vld [vmem:[#allocation16 + $0x58] sm:$0xff] }
 0x4ea   :  { %1708 = vmatpush.msrb.mxu3 %v1566_v52  ;;  %1754 = vmatpush.msrb.mxu2 %v1567_v41  ;;  %v1924_v52 = vld [vmem:[#allocation16 + $0xf0] sm:$0xff] }
 0x4eb   :  { %v1904_v41 = vld [vmem:[#allocation16 + $0x50] sm:$0xff] }
 0x4ec   :  { %1709 = vmatpush.msrb.mxu3 %v1564_v44  ;;  %1755 = vmatpush.msrb.mxu2 %v1565_v57  ;;  %v1923_v44 = vld [vmem:[#allocation16 + $0xe8] sm:$0xff] }
 0x4ed   :  { %1710 = vmatmul.f32.vlgmr.msrb.gmra.mxu3 %v1684_v2  ;;  %1756 = vmatmul.f32.vlgmr.msrb.gmra.mxu2 %v1684_v2  ;;  %v1673_v8 = vpop.permute.xlu1 %1672  ;;  %v1903_v57 = vld [vmem:[#allocation16 + $0x48] sm:$0xff]  ;;  %v1901_v2 = vld [vmem:[#allocation16 + $0x38] sm:$0xff] }
 0x4ee   :  { %v1669_v18 = vpop.permute.xlu0 %1668  ;;  %1853 = vmatpush.msra.mxu3 %v1817_v5  ;;  %1961 = vmatpush.msra.mxu2 %v1901_v2  ;;  %v1922_v5 = vld [vmem:[#allocation16 + $0xe0] sm:$0xff]  ;;  %v2137_v2 = vld [vmem:[#allocation16 + $0x1b8] sm:$0xff] }
 0x4ef   :  { %v1676_v51 = vsel %vm628_vm9, %v1669_v18, %v1673_v8  ;;  %v1678_v31 = vsel %vm628_vm9, %v1673_v8, %v1669_v18  ;;  %v1902_v8 = vld [vmem:[#allocation16 + $0x40] sm:$0xff]  ;;  %v1917_v18 = vld [vmem:[#allocation16 + $0xb8] sm:$0xff] }
 0x4f0   :  { %v1680_v32 = vmul.f32 %v1676_v51, %v4112_v53  ;;  %v1681_v14 = vmul.f32 %v1678_v31, %v4114_v54  ;;  %1854 = vmatpush.msra.mxu3 %v1816_v10  ;;  %v1813_v53 = vld [vmem:[#allocation7 + $0xd8] sm:$0xff]  ;;  %v1798_v54 = vld [vmem:[#allocation7 + $0x60] sm:$0xff]  ;;  %v1900_v10 = vld [vmem:[#allocation16 + $0x30] sm:$0xff] }
 0x4f1   :  { %1962 = vmatpush.msra.mxu2 %v1900_v10  ;;  %v1921_v51 = vld [vmem:[#allocation16 + $0xd8] sm:$0xff]  ;;  %v1899_v31 = vld [vmem:[#allocation16 + $0x28] sm:$0xff] }
 0x4f2   :  { %1732 = vmatpush.msra.mxu1 %v1680_v32  ;;  %1778 = vmatpush.msra.mxu0 %v1681_v14  ;;  %v1916_v32 = vld [vmem:[#allocation16 + $0xb0] sm:$0xff] }
 0x4f3   :  { %2788 = vmatmul.msk.f32.vlgmr.msra.gmra.mxu1 %vm1417_vm10, %v1685_v19  ;;  %2790 = vmatmul.msk.f32.vlgmr.msra.gmra.mxu0 %vm1417_vm10, %v1685_v19  ;;  %v1920_v14 = vld [vmem:[#allocation16 + $0xd0] sm:$0xff]  ;;  %v1898_v19 = vld [vmem:[#allocation16 + $0x20] sm:$0xff] }
 0x4f4   :  { %1830 = vmatpush.msrb.mxu1 %v1801_v22  ;;  %1855 = vmatpush.msra.mxu3 %v1815_v23  ;;  %v1915_v22 = vld [vmem:[#allocation16 + $0xa8] sm:$0xff] }
 0x4f5   :  { %1713 = vmatmul.f32.gmra.mxu3 %v1686_v12  ;;  %1759 = vmatmul.f32.gmra.mxu2 %v1686_v12  ;;  %v1919_v23 = vld [vmem:[#allocation16 + $0xc8] sm:$0xff]  ;;  %v1897_v12 = vld [vmem:[#allocation16 + $0x18] sm:$0xff] }
 0x4f6   :  { %1831 = vmatpush.msrb.mxu1 %v1800_v13  ;;  %1856 = vmatpush.msra.mxu3 %v1814_v26  ;;  %v1914_v13 = vld [vmem:[#allocation16 + $0xa0] sm:$0xff] }
 0x4f7   :  { %1939 = vmatpush.msrb.mxu0 %v1909_v33  ;;  %1963 = vmatpush.msra.mxu2 %v1899_v31  ;;  %v1918_v26 = vld [vmem:[#allocation16 + $0xc0] sm:$0xff] }
 0x4f8   :  { %1832 = vmatpush.msrb.mxu1 %v1799_v28  ;;  %1857 = vmatpush.msra.mxu3 %v1813_v53  ;;  %v1896_v28 = vld [vmem:[#allocation16 + $0x10] sm:$0xff]  ;;  %v2129_v53 = vld [vmem:[#allocation16 + $0x178] sm:$0xff] }
 0x4f9   :  { %1940 = vmatpush.msrb.mxu0 %v1908_v1  ;;  %1964 = vmatpush.msra.mxu2 %v1898_v19 }
 0x4fa   :  { %1833 = vmatpush.msrb.mxu1 %v1798_v54  ;;  %1858 = vmatpush.msra.mxu3 %v1812_v38  ;;  %v2145_v54 = vld [vmem:[#allocation16 + $0x1f8] sm:$0xff] }
 0x4fb   :  { %2789 = vmatmul.msk.f32.gmra.mxu1 %vm1417_vm10, %v1687_v21  ;;  %2791 = vmatmul.msk.f32.gmra.mxu0 %vm1417_vm10, %v1687_v21  ;;  %v1913_v38 = vld [vmem:[#allocation16 + $0x98] sm:$0xff]  ;;  %v1895_v21 = vld [vmem:[#allocation16 + $0x8] sm:$0xff] }
 0x4fc   :  { %1834 = vmatpush.msrb.mxu1 %v1797_v36  ;;  %1859 = vmatpush.msra.mxu3 %v1811_v24  ;;  %v2128_v36 = vld [vmem:[#allocation16 + $0x170] sm:$0xff] }
 0x4fd   :  { %1941 = vmatpush.msrb.mxu0 %v1907_v42  ;;  %1965 = vmatpush.msra.mxu2 %v1897_v12  ;;  %v2144_v24 = vld [vmem:[#allocation16 + $0x1f0] sm:$0xff] }
 0x4fe   :  { %1835 = vmatpush.msrb.mxu1 %v1796_v25  ;;  %1860 = vmatpush.msra.mxu3 %v1810_v37  ;;  %v1912_v25 = vld [vmem:[#allocation16 + $0x90] sm:$0xff]  ;;  %v1894_v37 = vld [vmem:[#allocation16] sm:$0xff] }
 0x4ff   :  { %1942 = vmatpush.msrb.mxu0 %v1906_v43  ;;  %1966 = vmatpush.msra.mxu2 %v1896_v28  ;;  %v2132_v12 = vld [vmem:[#allocation16 + $0x190] sm:$0xff] }
 0x500   :  { %1836 = vmatpush.msrb.mxu1 %v1795_v11  ;;  %1861 = vmatpush.msra.mxu3 %v1809_v9  ;;  %v2127_v11 = vld [vmem:[#allocation16 + $0x168] sm:$0xff] }
 0x501   :  { %1943 = vmatpush.msrb.mxu0 %v1905_v7  ;;  %1967 = vmatpush.msra.mxu2 %v1895_v21  ;;  %v2143_v9 = vld [vmem:[#allocation16 + $0x1e8] sm:$0xff] }
 0x502   :  { %1837 = vmatpush.msrb.mxu1 %v1794_v39  ;;  %1862 = vmatpush.msra.mxu3 %v1808_v59  ;;  %v1911_v39 = vld [vmem:[#allocation16 + $0x88] sm:$0xff]  ;;  %v2126_v59 = vld [vmem:[#allocation16 + $0x160] sm:$0xff] }
 0x503   :  { %1944 = vmatpush.msrb.mxu0 %v1904_v41  ;;  %1968 = vmatpush.msra.mxu2 %v1894_v37 }
 0x504   :  { %1838 = vmatpush.msrb.mxu1 %v1793_v60  ;;  %1863 = vmatpush.msra.mxu3 %v1807_v17  ;;  %v2142_v60 = vld [vmem:[#allocation16 + $0x1e0] sm:$0xff] }
 0x505   :  { %1945 = vmatpush.msrb.mxu0 %v1903_v57  ;;  %v1910_v17 = vld [vmem:[#allocation16 + $0x80] sm:$0xff] }
 0x506   :  { %1839 = vmatpush.msrb.mxu1 %v1792_v16  ;;  %1864 = vmatpush.msra.mxu3 %v1806_v47  ;;  %v2125_v47 = vld [vmem:[#allocation16 + $0x158] sm:$0xff] }
 0x507   :  { %1946 = vmatpush.msrb.mxu0 %v1902_v8 }
 0x508   :  { %1840 = vmatpush.msrb.mxu1 %v1791_v49  ;;  %1865 = vmatpush.msra.mxu3 %v1805_v27  ;;  %v2141_v49 = vld [vmem:[#allocation16 + $0x1d8] sm:$0xff]  ;;  %v1823_v27 = vpop.permute.xlu2 %1822 }
 0x509   :  { %1984 = vmatpush.msra.mxu0 %v1917_v18 }
 0x50a   :  { %1841 = vmatpush.msrb.mxu1 %v1790_v34  ;;  %1866 = vmatpush.msra.mxu3 %v1804_v46  ;;  %v2124_v34 = vld [vmem:[#allocation16 + $0x150] sm:$0xff] }
 0x50b   :  { %1985 = vmatpush.msra.mxu0 %v1916_v32  ;;  %v2140_v46 = vld [vmem:[#allocation16 + $0x1d0] sm:$0xff]  ;;  %v2134_v32 = vld [vmem:[#allocation16 + $0x1a0] sm:$0xff] }
 0x50c   :  { %1842 = vmatpush.msrb.mxu1 %v1789_v3  ;;  %1867 = vmatpush.msra.mxu3 %v1803_v62  ;;  %v2123_v3 = vld [vmem:[#allocation16 + $0x148] sm:$0xff]  ;;  %v2122_v62 = vld [vmem:[#allocation16 + $0x140] sm:$0xff] }
 0x50d   :  { %1986 = vmatpush.msra.mxu0 %v1915_v22 }
 0x50e   :  { %1843 = vmatpush.msrb.mxu1 %v1788_v4  ;;  %1868 = vmatpush.msra.mxu3 %v1802_v15  ;;  %v2139_v4 = vld [vmem:[#allocation16 + $0x1c8] sm:$0xff]  ;;  %v2138_v15 = vld [vmem:[#allocation16 + $0x1c0] sm:$0xff] }
 0x50f   :  { %1987 = vmatpush.msra.mxu0 %v1914_v13  ;;  %v2131_v13 = vld [vmem:[#allocation16 + $0x188] sm:$0xff] }
 0x510   :  { %1844 = vmatpush.msrb.mxu1 %v1787_v45  ;;  %2158 = vmatpush.msrb.mxu3 %v2129_v53 }
 0x511   :  { %1988 = vmatpush.msra.mxu0 %v1913_v38 }
 0x512   :  { %1845 = vmatpush.msrb.mxu1 %v1786_v29  ;;  %2159 = vmatpush.msrb.mxu3 %v2128_v36 }
 0x513   :  { %1989 = vmatpush.msra.mxu0 %v1912_v25 }
 0x514   :  { %2008 = vmatpush.msra.mxu1 %v1925_v35  ;;  %2160 = vmatpush.msrb.mxu3 %v2127_v11 }
 0x515   :  { %1990 = vmatpush.msra.mxu0 %v1911_v39  ;;  %v3610_v39 = vmov 16.0  }
 0x516   :  { %2009 = vmatpush.msra.mxu1 %v1924_v52  ;;  %2161 = vmatpush.msrb.mxu3 %v2126_v59 }
 0x517   :  { %1991 = vmatpush.msra.mxu0 %v1910_v17 }
 0x518   :  { %2010 = vmatpush.msra.mxu1 %v1923_v44  ;;  %2162 = vmatpush.msrb.mxu3 %v2125_v47 }
 0x51a   :  { %2011 = vmatpush.msra.mxu1 %v1922_v5  ;;  %2163 = vmatpush.msrb.mxu3 %v2124_v34  ;;  %v2136_v5 = vld [vmem:[#allocation16 + $0x1b0] sm:$0xff] }
 0x51c   :  { %2012 = vmatpush.msra.mxu1 %v1921_v51  ;;  %2164 = vmatpush.msrb.mxu3 %v2123_v3  ;;  %v2135_v51 = vld [vmem:[#allocation16 + $0x1a8] sm:$0xff] }
 0x51e   :  { %2013 = vmatpush.msra.mxu1 %v1920_v14  ;;  %2165 = vmatpush.msrb.mxu3 %v2122_v62  ;;  %v2075_v62 = vld [vmem:[%s4652_s13] sm:$0xff] }
 0x520   :  { %2014 = vmatpush.msra.mxu1 %v1919_v23  ;;  %v2133_v23 = vld [vmem:[#allocation16 + $0x198] sm:$0xff] }
 0x522   :  { %2015 = vmatpush.msra.mxu1 %v1918_v26  ;;  %v2130_v26 = vld [vmem:[#allocation16 + $0x180] sm:$0xff] }
 0x570   :  { %v1711_v50 = vpop.f32.mrf.mxu3  ;;  %v1734_v58 = vpop.f32.mrf.mxu1 }
 0x571   :  { %v1735_v40 = vadd.f32 %v1734_v58, %v1711_v50  ;;  %v1757_v20 = vpop.f32.mrf.mxu2  ;;  %v1780_v55 = vpop.f32.mrf.mxu0 }
 0x572   :  { %v1781_v30 = vadd.f32 %v1780_v55, %v1757_v20  ;;  %v1828_v55 = vpop.permute.xlu2 %1827 }
 0x573   :  { %1846 = vmatmul.f32.vlgmr.msrb.gmra.mxu1 %v1735_v40 }
 0x574   :  { %1869 = vmatmul.f32.vlgmr.msra.gmra.mxu3 %v1781_v30  ;;  %2227 = vmatpush.msrb.mxu1 %v2145_v54 }
 0x576   :  { %2228 = vmatpush.msrb.mxu1 %v2144_v24  ;;  %v2891_v24 = vld [vmem:[#allocation17] ss:$0 sm:$0xff] }
 0x578   :  { %v1714_v56 = vpop.f32.mrf.mxu3  ;;  %v1737_v61 = vpop.f32.mrf.mxu1  ;;  %2229 = vmatpush.msrb.mxu1 %v2143_v9 }
 0x579   :  { %v1738_v0 = vadd.f32 %v1737_v61, %v1714_v56  ;;  %v1760_v6 = vpop.f32.mrf.mxu2  ;;  %v1783_v48 = vpop.f32.mrf.mxu0 }
 0x57a   :  { %v1784_v63 = vadd.f32 %v1783_v48, %v1760_v6  ;;  %2230 = vmatpush.msrb.mxu1 %v2142_v60 }
 0x57b   :  { %1849 = vmatmul.f32.gmra.mxu1 %v1738_v0 }
 0x57c   :  { %1872 = vmatmul.f32.gmra.mxu3 %v1784_v63  ;;  %2231 = vmatpush.msrb.mxu1 %v2141_v49 }
 0x57e   :  { %2232 = vmatpush.msrb.mxu1 %v2140_v46 }
 0x580   :  { %2233 = vmatpush.msrb.mxu1 %v2139_v4 }
 0x582   :  { %2234 = vmatpush.msrb.mxu1 %v2138_v15  ;;  %v2120_v15 = vld [vmem:[#allocation16 + $0x130] sm:$0xff] }
 0x5f0   :  { %v1847_v16 = vpop.f32.mrf.mxu1 }
 0x5f1   :  { %v1848_v45 = vadd.f32 %v1847_v16, %v1823_v27 }
 0x5f7   :  { %v1870_v29 = vpop.f32.mrf.mxu3 }
 0x5f8   :  { %v1871_v50 = vadd.f32 %v1870_v29, %v1848_v45  ;;  %v1850_v40 = vpop.f32.mrf.mxu1  ;;  %v2076_v45 = vld [vmem:[%s4652_s13 + $0x8] sm:$0xff] }
 0x5f9   :  { %v1851_v56 = vadd.f32 %v1850_v40, %v1828_v55  ;;  %2098 = vmatpush.msrb.mxu2 %v2076_v45  ;;  %v2121_v29 = vld [vmem:[#allocation16 + $0x138] sm:$0xff]  ;;  %v3611_v45 = vmov 8.0  }
 0x5fa   :  { %v1878_v58 = vmul.f32 0.044715, %v1871_v50  ;;  %v1876_v7 = vmul.f32 0.5, %v1871_v50 }
 0x5fb   :  { %2099 = vmatpush.msrb.mxu2 %v2075_v62 }
 0x5fc   :  { %v1880_v20 = vmul.f32 %v1878_v58, %v1871_v50  ;;  %v2119_v58 = vld [vmem:[#allocation16 + $0x128] sm:$0xff] }
 0x5fe   :  { %v1882_v30 = vmul.f32 %v1880_v20, %v1871_v50  ;;  %v2118_v20 = vld [vmem:[#allocation16 + $0x120] sm:$0xff] }
 0x5ff   :  { %v1873_v61 = vpop.f32.mrf.mxu3 }
 0x600   :  { %v1884_v0 = vadd.f32 %v1882_v30, %v1871_v50  ;;  %v1874_v6 = vadd.f32 %v1873_v61, %v1851_v56 }
 0x602   :  { %v1886_v48 = vmul.f32 0.7978846, %v1884_v0  ;;  %v1879_v63 = vmul.f32 0.044715, %v1874_v6  ;;  %v1877_v10 = vmul.f32 0.5, %v1874_v6 }
 0x604   :  { %2925 = vtanh.f32 %v1886_v48  ;;  %v1881_v33 = vmul.f32 %v1879_v63, %v1874_v6  ;;  %v2117_v48 = vld [vmem:[#allocation16 + $0x118] sm:$0xff]  ;;  %v2116_v63 = vld [vmem:[#allocation16 + $0x110] sm:$0xff] }
 0x606   :  { %v1883_v1 = vmul.f32 %v1881_v33, %v1874_v6 }
 0x608   :  { %v1885_v42 = vadd.f32 %v1883_v1, %v1874_v6  ;;  %v2115_v1 = vld [vmem:[#allocation16 + $0x108] sm:$0xff] }
 0x60a   :  { %v2926_v43 = vpop.eup %2925  ;;  %v1887_v35 = vmul.f32 0.7978846, %v1885_v42  ;;  %v2892_v42 = vld [vmem:[#allocation19] ss:$0 sm:$0xff] }
 0x60b   :  { %v1890_v52 = vadd.f32 1.0, %v2926_v43 }
 0x60c   :  { %2927 = vtanh.f32 %v1887_v35  ;;  %v2114_v35 = vld [vmem:[#allocation16 + $0x100] sm:$0xff] }
 0x60d   :  { %v1892_v41 = vmul.f32 %v1890_v52, %v1876_v7  ;;  %2929 = vrcp.f32 %v3610_v39  ;;  %v2893_v7 = vld [vmem:[#allocation20] ss:$0 sm:$0xff]  ;;  %v2895_v39 = vld [vmem:[#allocation25] ss:$0 sm:$0xff] }
 0x60f   :  { %2793 = vmatmul.msk.f32.vlgmr.msra.gmra.mxu2 %vm1928_vm11, %v1892_v41  ;;  %v1927_v44 = vrot.slane %v1892_v41, 2  ;;  %v1997_v57 = vrot.slane %v1892_v41, 6  ;;  %v1973_v14 = vrot.slane %v1892_v41, 4 }
 0x610   :  { %2180 = vmatpush.msra.mxu2 %v2121_v29 }
 0x611   :  { %2792 = vmatmul.msk.f32.vlgmr.msrb.gmra.mxu0 %vm1928_vm11, %v1927_v44  ;;  %2795 = vmatmul.msk.f32.vlgmr.msra.gmra.mxu1 %vm1928_vm11, %v1997_v57 }
 0x612   :  { %v2928_v8 = vpop.eup %2927  ;;  %2203 = vmatpush.msrb.mxu0 %v2137_v2  ;;  %2181 = vmatpush.msra.mxu2 %v2120_v15 }
 0x613   :  { %v1891_v18 = vadd.f32 1.0, %v2928_v8  ;;  %v2930_v59 = vpop.eup %2929 }
 0x614   :  { %2204 = vmatpush.msrb.mxu0 %v2136_v5  ;;  %v2031_v60 = vmul.f32 16.0, %v2930_v59  ;;  %vm2035_vm13 = vweird.f32 %v2930_v59  ;;  %2182 = vmatpush.msra.mxu2 %v2119_v58 }
 0x615   :  { %v4557_v31 = vmul.f32 %v1891_v18, %v1877_v10 }
 0x616   :  { %2205 = vmatpush.msrb.mxu0 %v2135_v51  ;;  %v2032_v17 = vsub.f32 1.0, %v2031_v60  ;;  %2183 = vmatpush.msra.mxu2 %v2118_v20 }
 0x617   :  { %v2147_v19 = vrot.slane %v4557_v31, 2  ;;  %v2216_v22 = vrot.slane %v4557_v31, 6  ;;  %v2192_v28 = vrot.slane %v4557_v31, 4 }
 0x618   :  { %2206 = vmatpush.msrb.mxu0 %v2134_v32  ;;  %v2033_v16 = vmul.f32 %v2930_v59, %v2032_v17  ;;  %2184 = vmatpush.msra.mxu2 %v2117_v48 }
 0x619   :  { %2794 = vmatmul.msk.f32.vlgmr.msra.gmra.mxu0 %vm1928_vm11, %v1973_v14  ;;  %2797 = vmatmul.msk.f32.vlgmr.msrb.gmra.mxu3 %vm1928_vm11, %v2147_v19  ;;  %v2330_v19 = vld [vmem:[#allocation23] sm:$0xff] }
 0x61a   :  { %2800 = vmatmul.msk.f32.vlgmr.msrb.gmra.mxu1 %vm1928_vm11, %v2216_v22  ;;  %2207 = vmatpush.msrb.mxu0 %v2133_v23  ;;  %v2034_v47 = vadd.f32 %v2930_v59, %v2033_v16  ;;  %v2329_v22 = vld [vmem:[#allocation2] sm:$0x3] }
 0x61b   :  { %2185 = vmatpush.msra.mxu2 %v2116_v63  ;;  %v2515_v23 = vld [vmem:[%s4653_s25 + $0x8] sm:$0xff] }
 0x61c   :  { %2208 = vmatpush.msrb.mxu0 %v2132_v12  ;;  %v4567_v49 = vsel %vm2035_vm13, %v2930_v59, %v2034_v47  ;;  %2534 = vmatpush.msra.mxu1 %v2515_v23  ;;  %v2894_v12 = vld [vmem:[#allocation22] ss:$0 sm:$0xff]  ;;  %v2897_v23 = vld [vmem:[#allocation19 + $0x1] ss:$0 sm:$0xff] }
 0x61d   :  { %2186 = vmatpush.msra.mxu2 %v2115_v1  ;;  %v2802_v1 = vld [vmem:[%s4652_s13 + $0x18] sm:$0xff] }
 0x61e   :  { %2209 = vmatpush.msrb.mxu0 %v2131_v13  ;;  %2314 = vmatpush.msra.mxu3 %v2802_v1 }
 0x61f   :  { %2187 = vmatpush.msra.mxu2 %v2114_v35 }
 0x620   :  { %2210 = vmatpush.msrb.mxu0 %v2130_v26 }
 0x621   :  { %2799 = vmatmul.msk.f32.vlgmr.msrb.gmra.mxu0 %vm1928_vm11, %v2192_v28 }
 0x68e   :  { %v1948_v53 = vpop.f32.mrf.mxu0  ;;  %v2017_v25 = vpop.f32.mrf.mxu1 }
 0x692   :  { %v1970_v54 = vpop.f32.mrf.mxu2 }
 0x693   :  { %v1971_v38 = vadd.f32 %v1970_v54, %v1948_v53 }
 0x696   :  { %v1993_v21 = vpop.f32.mrf.mxu0 }
 0x697   :  { %v1996_v36 = vadd.f32 %v1993_v21, %v1971_v38 }
 0x699   :  { %v2020_v37 = vadd.f32 %v2017_v25, %v1996_v36 }
 0x69b   :  { %v2025_v11 = vadd.f32 %v2891_v24, %v2020_v37 }
 0x69c   :  { %v2167_v38 = vpop.f32.mrf.mxu3 }
 0x69d   :  { %v2027_v9 = vsel %vm2026_vm12, %v2025_v11, 0.0 }
 0x69e   :  { %2028 = vadd.xlane.f32.xlu0 %v2027_v9  ;;  %v2212_v25 = vpop.f32.mrf.mxu0  ;;  %v2236_v9 = vpop.f32.mrf.mxu1 }
 0x711   :  { %v2029_v27 = vpop.xlane.xlu0 %2028 }
 0x712   :  { %v2037_v34 = vmul.f32 %v4567_v49, %v2029_v27 }
 0x714   :  { %v2038_v46 = vsub.f32 %v2025_v11, %v2037_v34 }
 0x716   :  { %v2039_v3 = vmul.f32 %v2038_v46, %v2038_v46 }
 0x718   :  { %v2040_v4 = vsel %vm2026_vm12, %v2039_v3, 0.0 }
 0x719   :  { %2041 = vadd.xlane.f32.xlu1 %v2040_v4 }
 0x78c   :  { %v2042_v50 = vpop.xlane.xlu1 %2041 }
 0x78d   :  { %v2043_v40 = vmul.f32 %v2042_v50, %v4567_v49 }
 0x78f   :  { %v2044_v55 = vadd.f32 1e-05, %v2043_v40 }
 0x791   :  { %2931 = vrsqrt.f32 %v2044_v55  ;;  %vm2051_vm15 = vweird.f32 %v2044_v55 }
 0x797   :  { %v2932_v30 = vpop.eup %2931 }
 0x798   :  { %v2046_v56 = vmul.f32 %v2932_v30, %v2044_v55  ;;  %vm2052_vm14 = vweird.f32 %v2932_v30 }
 0x799   :  { %vm2053_vm0 = vmor %vm2051_vm15, %vm2052_vm14  ;;  %vm2668_vm14 = vcmask 25600  }
 0x79a   :  { %v2047_v61 = vmul.f32 %v2932_v30, %v2046_v56 }
 0x79c   :  { %v2048_v0 = vmul.f32 0.5, %v2047_v61 }
 0x79e   :  { %v2049_v6 = vsub.f32 1.5, %v2048_v0 }
 0x7a0   :  { %v2050_v33 = vmul.f32 %v2932_v30, %v2049_v6 }
 0x7a2   :  { %v2054_v43 = vsel %vm2053_vm0, %v2932_v30, %v2050_v33 }
 0x7a3   :  { %v2055_v52 = vmul.f32 %v2054_v43, %v2038_v46 }
 0x7a5   :  { %v2060_v41 = vmul.f32 %v2892_v42, %v2055_v52  ;;  %v2801_v42 = vld [vmem:[%s4652_s13 + $0x10] sm:$0xff] }
 0x7a6   :  { %2315 = vmatpush.msra.mxu3 %v2801_v42 }
 0x7a7   :  { %v2065_v44 = vadd.f32 %v2893_v7, %v2060_v41 }
 0x7a9   :  { %v2067_v57 = vmul.f32 0.044715, %v2065_v44  ;;  %v2066_v51 = vmul.f32 0.5, %v2065_v44 }
 0x7ab   :  { %v2068_v2 = vmul.f32 %v2067_v57, %v2065_v44 }
 0x7ad   :  { %v2069_v5 = vmul.f32 %v2068_v2, %v2065_v44 }
 0x7af   :  { %v2070_v8 = vadd.f32 %v2069_v5, %v2065_v44 }
 0x7b1   :  { %v2071_v10 = vmul.f32 0.7978846, %v2070_v8 }
 0x7b3   :  { %2933 = vtanh.f32 %v2071_v10 }
 0x7b9   :  { %v2934_v18 = vpop.eup %2933 }
 0x7ba   :  { %v2073_v32 = vadd.f32 1.0, %v2934_v18 }
 0x7bc   :  { %v2074_v14 = vmul.f32 %v2073_v32, %v2066_v51 }
 0x7be   :  { %2796 = vmatmul.msk.f32.vlgmr.msrb.gmra.mxu2 %vm1417_vm10, %v2074_v14 }
 0x7bf   :  { %2354 = vmatpush.msrb.mxu2 %v2330_v19  ;;  %v2408_v19 = vld [vmem:[#allocation29] sm:$0xff] }
 0x7c0   :  { %2431 = vmatpush.msrb.mxu3 %v2408_v19 }
 0x7c6   :  { %2798 = vmatmul.msk.f32.vlgmr.msra.gmra.mxu2 %vm1928_vm11, %v4557_v31  ;;  %v2896_v31 = vld [vmem:[#allocation17 + $0x1] ss:$0 sm:$0xff] }
 0x7ce   :  { %2804 = vmatmul.msk.f32.vlgmr.msrb.gmra.mxu2 %vm2335_vm1, %v2329_v22 }
 0x841   :  { %v2101_v13 = vpop.f32.mrf.mxu2 }
 0x842   :  { %v2102_v26 = vadd.f32 %v2894_v12, %v2101_v13 }
 0x844   :  { %v2105_v28 = vmul.f32 0.044715, %v2102_v26  ;;  %v2104_v46 = vmul.f32 0.5, %v2102_v26 }
 0x846   :  { %v2106_v53 = vmul.f32 %v2105_v28, %v2102_v26 }
 0x848   :  { %v2107_v54 = vmul.f32 %v2106_v53, %v2102_v26  ;;  %v2899_v53 = vld [vmem:[#allocation26] ss:$0 sm:$0xff] }
 0x849   :  { %v2189_v21 = vpop.f32.mrf.mxu2 }
 0x84a   :  { %v2108_v36 = vadd.f32 %v2107_v54, %v2102_v26  ;;  %v2190_v24 = vadd.f32 %v2189_v21, %v2167_v38  ;;  %v2898_v26 = vld [vmem:[#allocation20 + $0x1] ss:$0 sm:$0xff]  ;;  %v2900_v21 = vld [vmem:[#allocation28] ss:$0 sm:$0xff] }
 0x84c   :  { %v2109_v37 = vmul.f32 0.7978846, %v2108_v36  ;;  %v2215_v11 = vadd.f32 %v2212_v25, %v2190_v24 }
 0x84e   :  { %2935 = vtanh.f32 %v2109_v37  ;;  %v2239_v59 = vadd.f32 %v2236_v9, %v2215_v11 }
 0x84f   :  { %2937 = vrcp.f32 %v3611_v45 }
 0x850   :  { %v2245_v60 = vadd.f32 %v2896_v31, %v2239_v59 }
 0x851   :  { %v2356_v17 = vpop.f32.mrf.mxu2 }
 0x852   :  { %v2357_v16 = vadd.f32 %v2895_v39, %v2356_v17  ;;  %v2246_v47 = vsel %vm2026_vm12, %v2245_v60, 0.0 }
 0x853   :  { %2247 = vadd.xlane.f32.xlu2 %v2246_v47 }
 0x854   :  { %v2936_v27 = vpop.eup %2935  ;;  %v2360_v34 = vsel %vm2359_vm2, %v2357_v16, 0.0 }
 0x855   :  { %2361 = vadd.xlane.f32.xlu0 %v2360_v34  ;;  %v2111_v3 = vadd.f32 1.0, %v2936_v27  ;;  %v2938_v62 = vpop.eup %2937 }
 0x856   :  { %v2364_v29 = vmul.f32 8.0, %v2938_v62  ;;  %vm2368_vm3 = vweird.f32 %v2938_v62 }
 0x857   :  { %v2112_v4 = vmul.f32 %v2111_v3, %v2104_v46 }
 0x858   :  { %v2365_v15 = vsub.f32 1.0, %v2364_v29 }
 0x859   :  { %2807 = vmatmul.msk.f32.vlgmr.msra.gmra.mxu1 %vm2335_vm1, %v2112_v4 }
 0x85a   :  { %v2366_v50 = vmul.f32 %v2938_v62, %v2365_v15 }
 0x85c   :  { %v2367_v58 = vadd.f32 %v2938_v62, %v2366_v50  ;;  %v2562_v50 = vld [vmem:[%s4653_s25 + $0x10] sm:$0xff] }
 0x85e   :  { %v4582_v20 = vsel %vm2368_vm3, %v2938_v62, %v2367_v58  ;;  %v2901_v58 = vld [vmem:[#allocation22 + $0x1] ss:$0 sm:$0xff] }
 0x8c6   :  { %v2248_v40 = vpop.xlane.xlu2 %2247 }
 0x8c7   :  { %v2249_v55 = vmul.f32 %v2248_v40, %v4567_v49 }
 0x8c8   :  { %v2362_v30 = vpop.xlane.xlu0 %2361 }
 0x8c9   :  { %v2250_v56 = vsub.f32 %v2245_v60, %v2249_v55  ;;  %v2370_v61 = vmul.f32 %v4582_v20, %v2362_v30 }
 0x8cb   :  { %v2371_v0 = vsub.f32 %v2357_v16, %v2370_v61  ;;  %v2251_v6 = vmul.f32 %v2250_v56, %v2250_v56  ;;  %v2902_v61 = vld [vmem:[#allocation31] ss:$0 sm:$0xff] }
 0x8cd   :  { %v2252_v48 = vsel %vm2026_vm12, %v2251_v6, 0.0  ;;  %v2372_v63 = vmul.f32 %v2371_v0, %v2371_v0 }
 0x8ce   :  { %2253 = vadd.xlane.f32.xlu1 %v2252_v48 }
 0x8cf   :  { %v2373_v33 = vsel %vm2359_vm2, %v2372_v63, 0.0 }
 0x8d0   :  { %2374 = vadd.xlane.f32.xlu2 %v2373_v33 }
 0x941   :  { %v2254_v43 = vpop.xlane.xlu1 %2253 }
 0x942   :  { %v2255_v35 = vmul.f32 %v2254_v43, %v4567_v49 }
 0x943   :  { %v2375_v7 = vpop.xlane.xlu2 %2374 }
 0x944   :  { %v2256_v52 = vadd.f32 1e-05, %v2255_v35  ;;  %v2376_v41 = vmul.f32 %v2375_v7, %v4582_v20 }
 0x946   :  { %2939 = vrsqrt.f32 %v2256_v52  ;;  %v2377_v44 = vadd.f32 1e-05, %v2376_v41  ;;  %vm2263_vm5 = vweird.f32 %v2256_v52 }
 0x948   :  { %2941 = vrsqrt.f32 %v2377_v44  ;;  %vm2384_vm8 = vweird.f32 %v2377_v44 }
 0x94c   :  { %v2940_v57 = vpop.eup %2939 }
 0x94d   :  { %v2258_v2 = vmul.f32 %v2940_v57, %v2256_v52  ;;  %vm2264_vm4 = vweird.f32 %v2940_v57 }
 0x94e   :  { %v2942_v5 = vpop.eup %2941  ;;  %vm2265_vm7 = vmor %vm2263_vm5, %vm2264_vm4 }
 0x94f   :  { %v2259_v8 = vmul.f32 %v2940_v57, %v2258_v2  ;;  %v2379_v10 = vmul.f32 %v2942_v5, %v2377_v44  ;;  %vm2385_vm6 = vweird.f32 %v2942_v5 }
 0x950   :  { %vm2386_vm9 = vmor %vm2384_vm8, %vm2385_vm6 }
 0x951   :  { %v2260_v18 = vmul.f32 0.5, %v2259_v8  ;;  %v2380_v51 = vmul.f32 %v2942_v5, %v2379_v10 }
 0x953   :  { %v2261_v32 = vsub.f32 1.5, %v2260_v18  ;;  %v2381_v14 = vmul.f32 0.5, %v2380_v51 }
 0x955   :  { %v2262_v49 = vmul.f32 %v2940_v57, %v2261_v32  ;;  %v2382_v22 = vsub.f32 1.5, %v2381_v14 }
 0x957   :  { %v2266_v12 = vsel %vm2265_vm7, %v2940_v57, %v2262_v49  ;;  %v2383_v13 = vmul.f32 %v2942_v5, %v2382_v22 }
 0x958   :  { %v2267_v28 = vmul.f32 %v2266_v12, %v2250_v56 }
 0x959   :  { %v2387_v54 = vsel %vm2386_vm9, %v2942_v5, %v2383_v13  ;;  %v2477_v5 = vld [vmem:[#allocation34] sm:$0xff]  ;;  %v2904_v13 = vld [vmem:[%s4654_s10] ss:$0 sm:$0xff] }
 0x95a   :  { %v2273_v38 = vmul.f32 %v2897_v23, %v2267_v28  ;;  %v2388_v36 = vmul.f32 %v2387_v54, %v2371_v0  ;;  %2500 = vmatpush.msra.mxu0 %v2477_v5  ;;  %v2903_v23 = vld [vmem:[#allocation32] ss:$0 sm:$0xff] }
 0x95c   :  { %v2279_v24 = vadd.f32 %v2898_v26, %v2273_v38  ;;  %v2393_v25 = vmul.f32 %v2899_v53, %v2388_v36 }
 0x95e   :  { %v2398_v37 = vadd.f32 %v2900_v21, %v2393_v25  ;;  %v2281_v11 = vmul.f32 0.044715, %v2279_v24  ;;  %v2280_v46 = vmul.f32 0.5, %v2279_v24 }
 0x960   :  { %v2282_v31 = vmul.f32 %v2281_v11, %v2279_v24  ;;  %v2400_v9 = vmul.f32 0.044715, %v2398_v37  ;;  %v2399_v29 = vmul.f32 0.5, %v2398_v37 }
 0x962   :  { %v2283_v39 = vmul.f32 %v2282_v31, %v2279_v24  ;;  %v2401_v59 = vmul.f32 %v2400_v9, %v2398_v37  ;;  %v2514_v31 = vld [vmem:[%s4653_s25] sm:$0xff] }
 0x963   :  { %2557 = vmatpush.msra.mxu2 %v2514_v31  ;;  %v2905_v9 = vld [vmem:[%s4655_s18] ss:$0 sm:$0xff] }
 0x964   :  { %v2284_v60 = vadd.f32 %v2283_v39, %v2279_v24  ;;  %v2402_v17 = vmul.f32 %v2401_v59, %v2398_v37 }
 0x966   :  { %v2285_v16 = vmul.f32 0.7978846, %v2284_v60  ;;  %v2403_v47 = vadd.f32 %v2402_v17, %v2398_v37 }
 0x968   :  { %2943 = vtanh.f32 %v2285_v16  ;;  %v2404_v27 = vmul.f32 0.7978846, %v2403_v47 }
 0x96a   :  { %2945 = vtanh.f32 %v2404_v27 }
 0x96e   :  { %v2944_v34 = vpop.eup %2943 }
 0x96f   :  { %v2287_v3 = vadd.f32 1.0, %v2944_v34 }
 0x970   :  { %v2946_v45 = vpop.eup %2945 }
 0x971   :  { %v2288_v4 = vmul.f32 %v2287_v3, %v2280_v46  ;;  %v2406_v62 = vadd.f32 1.0, %v2946_v45  ;;  %v2602_v45 = vld [vmem:[#allocation35 + $0x8] sm:$0xff] }
 0x972   :  { %2624 = vmatpush.msrb.mxu0 %v2602_v45 }
 0x973   :  { %2803 = vmatmul.msk.f32.vlgmr.msra.gmra.mxu3 %vm1417_vm10, %v2288_v4  ;;  %v2407_v15 = vmul.f32 %v2406_v62, %v2399_v29  ;;  %v2601_v62 = vld [vmem:[#allocation35] sm:$0xff]  ;;  %v2536_v29 = vpop.f32.mrf.mxu1 }
 0x974   :  { %2581 = vmatpush.msra.mxu3 %v2562_v50  ;;  %2625 = vmatpush.msrb.mxu0 %v2601_v62 }
 0x97b   :  { %2805 = vmatmul.msk.f32.vlgmr.msrb.gmra.mxu3 %vm2335_vm1, %v2407_v15 }
 0x9f6   :  { %v2317_v40 = vpop.f32.mrf.mxu3 }
 0x9f7   :  { %v2318_v55 = vadd.f32 %v2901_v58, %v2317_v40  ;;  %v2906_v58 = vld [vmem:[%s4656_s16] ss:$0 sm:$0xff] }
 0x9f9   :  { %v2321_v30 = vmul.f32 0.044715, %v2318_v55  ;;  %v2320_v43 = vmul.f32 0.5, %v2318_v55 }
 0x9fb   :  { %v2322_v56 = vmul.f32 %v2321_v30, %v2318_v55 }
 0x9fd   :  { %v2323_v0 = vmul.f32 %v2322_v56, %v2318_v55 }
 0x9fe   :  { %v2433_v6 = vpop.f32.mrf.mxu3 }
 0x9ff   :  { %v2324_v48 = vadd.f32 %v2323_v0, %v2318_v55  ;;  %v2434_v63 = vadd.f32 %v2902_v61, %v2433_v6 }
 0xa01   :  { %v2325_v33 = vmul.f32 0.7978846, %v2324_v48  ;;  %v2436_v1 = vsel %vm2359_vm2, %v2434_v63, 0.0 }
 0xa02   :  { %2437 = vadd.xlane.f32.xlu0 %v2436_v1 }
 0xa03   :  { %2947 = vtanh.f32 %v2325_v33 }
 0xa09   :  { %v2948_v42 = vpop.eup %2947 }
 0xa0a   :  { %v2327_v35 = vadd.f32 1.0, %v2948_v42 }
 0xa0c   :  { %v2328_v7 = vmul.f32 %v2327_v35, %v2320_v43  ;;  %v2640_v43 = vld [vmem:[%s3771_s19 + $0x8] sm:$0xff]  ;;  %v2639_v35 = vld [vmem:[%s3771_s19] sm:$0xff]  ;;  %s3612_s19 = smov [#allocation37]  }
 0xa0d   :  { %2662 = vmatpush.msrb.mxu1 %v2640_v43 }
 0xa0e   :  { %2809 = vmatmul.msk.f32.vlgmr.msra.gmra.mxu3 %vm2335_vm1, %v2328_v7  ;;  %v2907_v7 = vld [vmem:[%s3766_s4] ss:$0 sm:$0xff]  ;;  %s2675_s4 = sshll.u32 %s3612_s19, 4  ;;  %s2676_s4 = int_to_ptr.vmem [resolvable:$true] %s2675_s4 }
 0xa0f   :  { %2663 = vmatpush.msrb.mxu1 %v2639_v35 }
 0xa75   :  { %v2438_v52 = vpop.xlane.xlu0 %2437 }
 0xa76   :  { %v2439_v41 = vmul.f32 %v2438_v52, %v4582_v20 }
 0xa78   :  { %v2440_v44 = vsub.f32 %v2434_v63, %v2439_v41 }
 0xa7a   :  { %v2441_v57 = vmul.f32 %v2440_v44, %v2440_v44 }
 0xa7c   :  { %v2442_v2 = vsel %vm2359_vm2, %v2441_v57, 0.0 }
 0xa7d   :  { %2443 = vadd.xlane.f32.xlu1 %v2442_v2 }
 0xa91   :  { %v2583_v40 = vpop.f32.mrf.mxu3 }
 0xaf0   :  { %v2444_v8 = vpop.xlane.xlu1 %2443 }
 0xaf1   :  { %v2445_v10 = vmul.f32 %v2444_v8, %v4582_v20 }
 0xaf3   :  { %v2446_v18 = vadd.f32 1e-05, %v2445_v10 }
 0xaf5   :  { %2949 = vrsqrt.f32 %v2446_v18  ;;  %vm2453_vm12 = vweird.f32 %v2446_v18 }
 0xafb   :  { %v2950_v51 = vpop.eup %2949 }
 0xafc   :  { %v2448_v32 = vmul.f32 %v2950_v51, %v2446_v18  ;;  %vm2454_vm11 = vweird.f32 %v2950_v51 }
 0xafd   :  { %vm2455_vm13 = vmor %vm2453_vm12, %vm2454_vm11 }
 0xafe   :  { %v2449_v14 = vmul.f32 %v2950_v51, %v2448_v32 }
 0xb00   :  { %v2450_v19 = vmul.f32 0.5, %v2449_v14  ;;  %v2908_v14 = vld [vmem:[%s3776_s8] ss:$0 sm:$0xff] }
 0xb02   :  { %v2451_v49 = vsub.f32 1.5, %v2450_v19 }
 0xb04   :  { %v2452_v22 = vmul.f32 %v2950_v51, %v2451_v49 }
 0xb06   :  { %v2456_v12 = vsel %vm2455_vm13, %v2950_v51, %v2452_v22 }
 0xb07   :  { %v2457_v26 = vmul.f32 %v2456_v12, %v2440_v44 }
 0xb09   :  { %v2462_v28 = vmul.f32 %v2903_v23, %v2457_v26 }
 0xb0b   :  { %v2467_v53 = vadd.f32 %v2904_v13, %v2462_v28 }
 0xb0d   :  { %v2469_v20 = vmul.f32 0.044715, %v2467_v53  ;;  %v2468_v25 = vmul.f32 0.5, %v2467_v53 }
 0xb0f   :  { %v2470_v54 = vmul.f32 %v2469_v20, %v2467_v53 }
 0xb11   :  { %v2471_v38 = vmul.f32 %v2470_v54, %v2467_v53 }
 0xb13   :  { %v2472_v21 = vadd.f32 %v2471_v38, %v2467_v53 }
 0xb15   :  { %v2473_v36 = vmul.f32 0.7978846, %v2472_v21 }
 0xb17   :  { %2951 = vtanh.f32 %v2473_v36 }
 0xb1d   :  { %v2952_v24 = vpop.eup %2951 }
 0xb1e   :  { %v2475_v37 = vadd.f32 1.0, %v2952_v24 }
 0xb20   :  { %v2476_v11 = vmul.f32 %v2475_v37, %v2468_v25 }
 0xb22   :  { %2806 = vmatmul.msk.f32.vlgmr.msra.gmra.mxu0 %vm2335_vm1, %v2476_v11 }
 0xb9f   :  { %v2502_v39 = vpop.f32.mrf.mxu0 }
 0xba0   :  { %v2503_v59 = vadd.f32 %v2905_v9, %v2502_v39 }
 0xba2   :  { %v2506_v60 = vmul.f32 0.044715, %v2503_v59  ;;  %v2505_v46 = vmul.f32 0.5, %v2503_v59 }
 0xba4   :  { %v2507_v17 = vmul.f32 %v2506_v60, %v2503_v59 }
 0xba6   :  { %v2508_v16 = vmul.f32 %v2507_v17, %v2503_v59 }
 0xba8   :  { %v2509_v47 = vadd.f32 %v2508_v16, %v2503_v59 }
 0xbaa   :  { %v2510_v27 = vmul.f32 0.7978846, %v2509_v47 }
 0xbac   :  { %2953 = vtanh.f32 %v2510_v27 }
 0xbb2   :  { %v2954_v34 = vpop.eup %2953 }
 0xbb3   :  { %v2512_v3 = vadd.f32 1.0, %v2954_v34 }
 0xbb5   :  { %v2513_v4 = vmul.f32 %v2512_v3, %v2505_v46 }
 0xbb7   :  { %2808 = vmatmul.msk.f32.vlgmr.msra.gmra.mxu2 %vm2335_vm1, %v2513_v4 }
 0xc3a   :  { %v2559_v15 = vpop.f32.mrf.mxu2 }
 0xc3b   :  { %v2560_v50 = vadd.f32 %v2559_v15, %v2536_v29 }
 0xc3d   :  { %v2586_v55 = vadd.f32 %v2583_v40, %v2560_v50 }
 0xc3f   :  { %v2591_v30 = vadd.f32 %v2906_v58, %v2586_v55 }
 0xc41   :  { %v2593_v56 = vmul.f32 0.044715, %v2591_v30  ;;  %v2592_v33 = vmul.f32 0.5, %v2591_v30 }
 0xc43   :  { %v2594_v61 = vmul.f32 %v2593_v56, %v2591_v30 }
 0xc45   :  { %v2595_v0 = vmul.f32 %v2594_v61, %v2591_v30 }
 0xc47   :  { %v2596_v6 = vadd.f32 %v2595_v0, %v2591_v30 }
 0xc49   :  { %v2597_v48 = vmul.f32 0.7978846, %v2596_v6 }
 0xc4b   :  { %2955 = vtanh.f32 %v2597_v48 }
 0xc51   :  { %v2956_v63 = vpop.eup %2955 }
 0xc52   :  { %v2599_v1 = vadd.f32 1.0, %v2956_v63 }
 0xc54   :  { %v2600_v42 = vmul.f32 %v2599_v1, %v2592_v33 }
 0xc56   :  { %2810 = vmatmul.msk.f32.vlgmr.msrb.gmra.mxu0 %vm1417_vm10, %v2600_v42 }
 0xcd3   :  { %v2627_v52 = vpop.f32.mrf.mxu0 }
 0xcd4   :  { %v2628_v41 = vadd.f32 %v2907_v7, %v2627_v52 }
 0xcd6   :  { %v2631_v44 = vmul.f32 0.044715, %v2628_v41  ;;  %v2630_v18 = vmul.f32 0.5, %v2628_v41 }
 0xcd8   :  { %v2632_v57 = vmul.f32 %v2631_v44, %v2628_v41 }
 0xcda   :  { %v2633_v2 = vmul.f32 %v2632_v57, %v2628_v41 }
 0xcdc   :  { %v2634_v5 = vadd.f32 %v2633_v2, %v2628_v41 }
 0xcde   :  { %v2635_v8 = vmul.f32 0.7978846, %v2634_v5 }
 0xce0   :  { %2957 = vtanh.f32 %v2635_v8 }
 0xce6   :  { %v2958_v10 = vpop.eup %2957 }
 0xce7   :  { %v2637_v51 = vadd.f32 1.0, %v2958_v10 }
 0xce9   :  { %v2638_v32 = vmul.f32 %v2637_v51, %v2630_v18 }
 0xceb   :  { %2811 = vmatmul.msk.f32.vlgmr.msrb.gmra.mxu1 %vm1417_vm10, %v2638_v32 }
 0xd68   :  { %v2665_v19 = vpop.f32.mrf.mxu1 }
 0xd69   :  { %v2666_v49 = vadd.f32 %v2908_v14, %v2665_v19 }
 0xd6b   :  { %2669 = vst.msk [vmem:[#allocation37] sm:$0x3] %vm2668_vm14, %v2666_v49 }
 0xd6c   :  { %3510 = shalt.err (!%p3507_p2)
}
 0xd6d   :  { %2680 = dma.vmem_to_hbm [thread:$0]  %s2676_s4, 32, %s2678_s22, [#allocation4]  }
 0xd6e   :  { %3535 = dma.done.wait [#allocation4], 32  }
 0xd6f   :  { %3536 = vsyncadd [#allocation4], 4294967264 }
 0xd70   :  { %2685 = vsyncpa [#allocation3], 1 }
 0xd71   :  { %2686 = vsyncpa [#allocation6], 1 }
 0xd72   :  { %2687 = vsyncpa [#allocation9], 1 }
 0xd73   :  { %2688 = vsyncpa [#allocation12], 1 }
 0xd74   :  { %2689 = vsyncpa [#allocation15], 1 }
 0xd75   :  { %2690 = vsyncpa [#allocation18], 1 }
 0xd76   :  { %2691 = vsyncpa [#allocation21], 1 }
 0xd77   :  { %2692 = vsyncpa [#allocation24], 1 }
 0xd78   :  { %2693 = vsyncpa [#allocation27], 1 }
 0xd79   :  { %2694 = vsyncpa [#allocation30], 1 }
 0xd7a   :  { %2695 = vsyncpa [#allocation33], 1 }
 0xd7b   :  { %2696 = vsyncpa [#allocation36], 1 }
 0xd7c   :  { %2697 = vsyncpa [#allocation4], 1 }

</bundles_post_ra>
